<compile_context>
chip_gen: v5e
topology: v5e:2x2
jax: 0.10.0
libtpu: 0.0.40
codegen_flags: <defaults>
</compile_context>

<pallas_src>
import jax
import jax.numpy as jnp
from jax.experimental import pallas as pl
from jax.experimental.pallas import tpu as pltpu

EPS = 1e-5
NEG_SLOPE = 0.2          # LeakyReLU(0.2)


def _vmem_limit_bytes():
    # ~0.75x physical VMEM: ~96 MiB on v5e/v6e (128 MiB), ~48 MiB on v7x (64 MiB).
    try:
        return int(0.75 * pltpu.get_tpu_info().vmem_capacity_bytes)
    except Exception:
        return 48 * 1024 * 1024


# ---------------------------- in-kernel value helpers ----------------------------

def _leaky(x):
    return jnp.where(x > 0, x, NEG_SLOPE * x)


def _adains(x, gamma, beta):
    # InstanceNorm1d(affine=False, eps=1e-5) over the length axis + class-conditional affine.
    # One-pass stats (single pair of cross-sublane reductions): var = E[x^2] - mean^2.
    n = x.shape[0]
    mean = jnp.sum(x, axis=0, keepdims=True) * (1.0 / n)
    ex2 = jnp.sum(x * x, axis=0, keepdims=True) * (1.0 / n)
    var = jnp.maximum(ex2 - mean * mean, 0.0)       # guard cancellation
    return gamma * ((x - mean) * jax.lax.rsqrt(var + EPS)) + beta


def _shift_rows(x, d):
    # result[j] = x[j + d] if 0 <= j + d < L else 0 (static d, zero-padded row shift).
    if d == 0:
        return x
    L, C = x.shape
    z = jnp.zeros((abs(d), C), x.dtype)
    if d > 0:
        return jnp.concatenate([x[d:L, :], z], axis=0)
    return jnp.concatenate([z, x[0:L + d, :]], axis=0)


def _sum_shifted_taps(taps, pad_l):
    # 'same' conv epilogue: sum_k row-shift(tap_k, k - pad_l).
    acc = None
    for k, t in enumerate(taps):
        t = _shift_rows(t, k - pad_l)
        acc = t if acc is None else acc + t
    return acc


def _conv_taps(xb, w_ref, K, Co, fused):
    # Per-tap (L, Co) f32 partial products x @ W[k].
    if fused:
        # Lane-aligned Co: ONE wide MXU matmul against the Cout-concatenated weight,
        # then lane-tile-aligned column slices (one weight-load pass instead of K).
        yf = jnp.dot(xb, w_ref[...], preferred_element_type=jnp.float32)
        return [yf[:, k * Co:(k + 1) * Co] for k in range(K)]
    # Small / non-128-aligned Co: per-tap matmuls over the (K, Cin, Co) weight stack.
    return [jnp.dot(xb, w_ref[k], preferred_element_type=jnp.float32) for k in range(K)]


def _conv1d_same(x, w_ref, b_ref, K, pad_l, Co, fused):
    xb = x.astype(w_ref.dtype)               # single bf16 cast, hoisted out of the tap loop
    return _sum_shifted_taps(_conv_taps(xb, w_ref, K, Co, fused), pad_l) + b_ref[...]


def _upsample_conv(h, w_ref, b_ref, plan, Ci, fused):
    # Upsample(x2, nearest) + Conv1d('same') fused via the sub-pixel decomposition:
    # even/odd output phases are sums of row-shifted products against pre-summed weight
    # groups (host-side).  4*Lh MXU rows instead of 3*2Lh; no duplicated-input scratch.
    (ev_s, _), (od_s, _) = plan
    G = len(ev_s) + len(od_s)
    hb = h.astype(w_ref.dtype)
    if fused:
        z = jnp.dot(hb, w_ref[...], preferred_element_type=jnp.float32)     # (Lh, G*Ci)
        groups = [z[:, g * Ci:(g + 1) * Ci] for g in range(G)]
    else:
        groups = [jnp.dot(hb, w_ref[g], preferred_element_type=jnp.float32)
                  for g in range(G)]
    even = None
    for gi, s in enumerate(ev_s):
        t = _shift_rows(groups[gi], s)
        even = t if even is None else even + t
    odd = None
    for gi, s in enumerate(od_s):
        t = _shift_rows(groups[len(ev_s) + gi], s)
        odd = t if odd is None else odd + t
    return _leaky(even + b_ref[...]), _leaky(odd + b_ref[...])


def _concat_conv(un, sn, w_ref, b_ref, K, pad_l, Ci, lane_aligned):
    # Conv over torch.concat([up, skip], channels).
    if lane_aligned:
        # Production path: one deep (L, 2Ci) x (2Ci, K*Ci) contraction (fills the 256-deep
        # MXU); the channel concat and the output tap slices are lane-tile aligned.
        cat = jnp.concatenate([un, sn], axis=-1).astype(w_ref.dtype)
        yf = jnp.dot(cat, w_ref[...], preferred_element_type=jnp.float32)
        taps = [yf[:, k * Ci:(k + 1) * Ci] for k in range(K)]
    else:
        # Small-channel fallback: split-weight dual matmul per tap; the concat is never
        # materialized.  w_ref: (2K, Ci, Ci), first K taps hit the upsampled branch.
        ub = un.astype(w_ref.dtype)
        sb = sn.astype(w_ref.dtype)
        taps = [jnp.dot(ub, w_ref[k], preferred_element_type=jnp.float32)
                + jnp.dot(sb, w_ref[K + k], preferred_element_type=jnp.float32)
                for k in range(K)]
    return _sum_shifted_taps(taps, pad_l) + b_ref[...]


# ---------------------------- host-side weight packing ----------------------------

def _subpixel_plan(K, pad_l):
    # Static grouping of conv taps by the input-row shift they hit after nearest-x2 upsample.
    def grouped(parity):
        d = {}
        for k in range(K):
            s = (k - pad_l + parity) // 2
            d.setdefault(s, []).append(k)
        shifts = sorted(d)
        return tuple(shifts), tuple(tuple(d[s]) for s in shifts)
    return grouped(0), grouped(1)          # (even phase, odd phase)


def _pack_conv(w):
    # w: (K, Cin, Co) f32.  Lane-aligned Co -> (Cin, K*Co) for the single-matmul path;
    # otherwise keep the per-tap stack.  bf16 MXU operands either way.
    K, _, Co = w.shape
    if Co % 128 == 0:
        w = jnp.concatenate([w[k] for k in range(K)], axis=-1)
    return w.astype(jnp.bfloat16)


def _pack_upsample_conv(w, plan):
    # Pre-summed sub-pixel weight groups for Upsample(x2) + Conv1d.
    (_, ev_g), (_, od_g) = plan
    _, _, Co = w.shape
    mats = [sum(w[k] for k in g) for g in (list(ev_g) + list(od_g))]
    if Co % 128 == 0:
        return jnp.concatenate(mats, axis=-1).astype(jnp.bfloat16)     # (Cin, G*Co)
    return jnp.stack(mats, axis=0).astype(jnp.bfloat16)                # (G, Cin, Co)


def _pack_concat_conv(w, ci):
    # w: (K, 2Ci, Ci).  Deep path -> (2Ci, K*Ci); small path -> (2K, Ci, Ci) split halves
    # (rows :Ci hit the upsampled branch, Ci: the skip, matching torch.concat order).
    K = w.shape[0]
    if ci % 128 == 0:
        return jnp.concatenate([w[k] for k in range(K)], axis=-1).astype(jnp.bfloat16)
    up = jnp.stack([w[k, :ci, :] for k in range(K)], axis=0)
    sk = jnp.stack([w[k, ci:, :] for k in range(K)], axis=0)
    return jnp.concatenate([up, sk], axis=0).astype(jnp.bfloat16)


# ---------------------------- fused whole-UNet kernel ----------------------------

def _make_unet_kernel(cfg):
    depth, K, pad_l = cfg["depth"], cfg["K"], cfg["pad_l"]
    Fd = cfg["feature_dim"]
    enc, dec, plan = cfg["enc"], cfg["dec"], cfg["plan"]

    def kernel(ts_ref, *refs):
        # ts_ref (scalar-prefetched timestep) is only consumed by the index_maps.
        del ts_ref
        it = iter(refs)
        x_ref = next(it)
        enc_refs = [[next(it) for _ in range(5)] for _ in range(depth)]
        dec_refs = [[next(it) for _ in range(5)] for _ in range(depth)]
        wl_ref = next(it)
        bl_ref = next(it)
        o_ref = next(it)
        pool_scr = [next(it) for _ in range(depth)]
        up_scr = [next(it) for _ in range(depth)]

        h = x_ref[0].astype(jnp.float32)                    # (seq_len, feature_dim)
        skips = []

        # ----- encoder: AdaIN -> Conv+LeakyReLU (skip) -> Conv+LeakyReLU -> AvgPool -----
        for i in range(depth):
            L, _, Ch = enc[i]
            gb_ref, w1_ref, b1_ref, w2_ref, b2_ref = enc_refs[i]
            gb = gb_ref[0]                                  # (2, Cin): gamma, beta
            hn = _adains(h, gb[0:1, :], gb[1:2, :])
            fused = Ch % 128 == 0
            y1 = _leaky(_conv1d_same(hn, w1_ref, b1_ref, K, pad_l, Ch, fused))
            skips.append(y1)                                # stays VMEM-resident (fused net)
            y2 = _leaky(_conv1d_same(y1, w2_ref, b2_ref, K, pad_l, Ch, fused))
            # AvgPool1d(k=3, stride=2, padding=1, count_include_pad=True): 3-tap stride-2
            # add over a padded scratch.  Only row 0 is a read halo (the trailing pad row
            # is never touched by any stride-2 window for even L), so only it is zeroed.
            scr = pool_scr[i]
            scr[0:1, :] = jnp.zeros((1, Ch), jnp.float32)
            scr[1:1 + L, :] = y2
            Lh = L // 2
            h = (scr[pl.ds(0, Lh, stride=2), :]
                 + scr[pl.ds(1, Lh, stride=2), :]
                 + scr[pl.ds(2, Lh, stride=2), :]) * (1.0 / 3.0)

        # ----- decoder: Upsample+Conv+LeakyReLU -> [concat skip] -> AdaIN -> Conv+LeakyReLU -----
        for j in range(depth):
            Lh, _, Ci = dec[j]
            i = depth - 1 - j
            w1_ref, b1_ref, gb_ref, w2_ref, b2_ref = dec_refs[j]
            aligned = Ci % 128 == 0
            ue, uo = _upsample_conv(h, w1_ref, b1_ref, plan, Ci, aligned)
            # Interleave the even/odd output phases once (stride-2 sublane stores).
            uscr = up_scr[j]
            uscr[pl.ds(0, Lh, stride=2), :] = ue
            uscr[pl.ds(1, Lh, stride=2), :] = uo
            u = uscr[...]                                   # (2*Lh, Ci) f32
            # AdaIN of the concatenation is per-channel instance norm, so the halves are
            # normalized independently; the concat is only materialized on the deep path.
            gb = gb_ref[0]                                  # (4, Ci): g_up, b_up, g_skip, b_skip
            un = _adains(u, gb[0:1, :], gb[1:2, :])
            sn = _adains(skips[i], gb[2:3, :], gb[3:4, :])
            h = _leaky(_concat_conv(un, sn, w2_ref, b2_ref, K, pad_l, Ci, aligned))

        # ----- head: last Conv1d + Sigmoid (fused) -----
        out = jax.nn.sigmoid(_conv1d_same(h, wl_ref, bl_ref, K, pad_l, Fd, Fd % 128 == 0))
        o_ref[0] = out.astype(o_ref.dtype)

    return kernel


def unet1d_forward(params, x, timestep):
    cfg = params["cfg"]
    B, seq_len, Fd = x.shape
    assert seq_len == cfg["seq_len"] and Fd == cfg["feature_dim"]
    depth = cfg["depth"]

    def const_spec(a):
        nd = a.ndim
        return pl.BlockSpec(a.shape, lambda b, ts, nd=nd: (0,) * nd)

    def class_spec(a):          # gather the per-class AdaIN affine via the prefetched timestep
        nd = a.ndim
        return pl.BlockSpec((1,) + a.shape[1:],
                            lambda b, ts, nd=nd: (ts[b],) + (0,) * (nd - 1))

    in_specs = [pl.BlockSpec((1, seq_len, Fd), lambda b, ts: (b, 0, 0))]
    args = [x]
    for p in params["down"]:
        in_specs += [class_spec(p["gb"]), const_spec(p["w1"]), const_spec(p["b1"]),
                     const_spec(p["w2"]), const_spec(p["b2"])]
        args += [p["gb"], p["w1"], p["b1"], p["w2"], p["b2"]]
    for p in params["up"]:
        in_specs += [const_spec(p["w1"]), const_spec(p["b1"]), class_spec(p["gb"]),
                     const_spec(p["w2"]), const_spec(p["b2"])]
        args += [p["w1"], p["b1"], p["gb"], p["w2"], p["b2"]]
    in_specs += [const_spec(params["last"]["w"]), const_spec(params["last"]["b"])]
    args += [params["last"]["w"], params["last"]["b"]]

    scratch_shapes = []
    for (L, _, Ch) in cfg["enc"]:
        scratch_shapes.append(pltpu.VMEM((L + 2, Ch), jnp.float32))   # avgpool halo scratch
    for (Lh, _, Ci) in cfg["dec"]:
        scratch_shapes.append(pltpu.VMEM((2 * Lh, Ci), jnp.float32))  # even/odd interleave

    return pl.pallas_call(
        _make_unet_kernel(cfg),
        out_shape=jax.ShapeDtypeStruct((B, seq_len, Fd), jnp.float32),
        grid_spec=pltpu.PrefetchScalarGridSpec(
            num_scalar_prefetch=1,
            grid=(B,),
            in_specs=in_specs,
            out_specs=pl.BlockSpec((1, seq_len, Fd), lambda b, ts: (b, 0, 0)),
            scratch_shapes=scratch_shapes),
        compiler_params=pltpu.CompilerParams(
            dimension_semantics=("parallel",),
            vmem_limit_bytes=_vmem_limit_bytes()),
    )(timestep.astype(jnp.int32), *args)


# ---------------------------- deterministic parameter init ----------------------------

def _conv_init(key, in_ch, out_ch, K):
    kw, kb = jax.random.split(key)
    bound = (in_ch * K) ** -0.5
    w = jax.random.uniform(kw, (K, in_ch, out_ch), jnp.float32, -bound, bound)
    b = jax.random.uniform(kb, (1, out_ch), jnp.float32, -bound, bound)
    return w, b


def _adain_init(key, ch, num_classes):
    kg, kb = jax.random.split(key)
    gamma = 1.0 + 0.1 * jax.random.normal(kg, (num_classes, ch), jnp.float32)
    beta = 0.1 * jax.random.normal(kb, (num_classes, ch), jnp.float32)
    return gamma, beta


def init_params(key, seq_len, feature_dim, hidden_ch, num_classes, K):
    depth = len(hidden_ch)
    pad_l = (K - 1) // 2
    plan = _subpixel_plan(K, pad_l)
    keys = iter(jax.random.split(key, 6 * depth + 1))
    params = {"down": [], "up": [], "last": None}
    enc_meta, dec_meta = [], []

    L, prev = seq_len, feature_dim
    for i in range(depth):
        assert L % 2 == 0, "seq_len must be divisible by 2**depth"
        ch = hidden_ch[i]
        gamma, beta = _adain_init(next(keys), prev, num_classes)
        w1, b1 = _conv_init(next(keys), prev, ch, K)
        w2, b2 = _conv_init(next(keys), ch, ch, K)
        params["down"].append(dict(
            gb=jnp.stack([gamma, beta], axis=1),            # (num_classes, 2, Cin)
            w1=_pack_conv(w1), b1=b1, w2=_pack_conv(w2), b2=b2))
        enc_meta.append((L, prev, ch))
        prev, L = ch, L // 2

    for j in range(depth):
        i = depth - 1 - j
        ci = hidden_ch[i]
        w1, b1 = _conv_init(next(keys), prev, ci, K)
        gamma, beta = _adain_init(next(keys), 2 * ci, num_classes)
        w2, b2 = _conv_init(next(keys), 2 * ci, ci, K)
        gb = jnp.stack([gamma[:, :ci], beta[:, :ci], gamma[:, ci:], beta[:, ci:]], axis=1)
        params["up"].append(dict(
            w1=_pack_upsample_conv(w1, plan), b1=b1, gb=gb,
            w2=_pack_concat_conv(w2, ci), b2=b2))
        dec_meta.append((L, prev, ci))
        prev, L = ci, L * 2

    wl, bl = _conv_init(next(keys), hidden_ch[0], feature_dim, K)
    params["last"] = dict(w=_pack_conv(wl), b=bl)
    params["cfg"] = dict(depth=depth, K=K, pad_l=pad_l, seq_len=seq_len,
                         feature_dim=feature_dim, enc=tuple(enc_meta),
                         dec=tuple(dec_meta), plan=plan)
    return params


# ---------------------------- demo ----------------------------

if __name__ == "__main__":
    B = 2
    seq_len = 16
    feature_dim = 4
    num_classes = 8
    hidden_ch = (8, 16)
    kernel_size = 3

    key = jax.random.PRNGKey(0)
    kx, kt, kp = jax.random.split(key, 3)
    x = jax.random.normal(kx, (B, seq_len, feature_dim), jnp.float32)
    timestep = jax.random.randint(kt, (B,), 0, num_classes)
    params = init_params(kp, seq_len, feature_dim, hidden_ch, num_classes, kernel_size)

    fwd = jax.jit(lambda xx, tt: unet1d_forward(params, xx, tt))
    out = fwd(x, timestep)
    jax.block_until_ready(out)

    assert out.shape == (B, seq_len, feature_dim), out.shape
    assert out.dtype == jnp.float32
    assert bool(jnp.all(jnp.isfinite(out)))
    assert bool(jnp.all((out >= 0.0) & (out <= 1.0)))      # sigmoid output range
    print("KERNEL_OK")
</pallas_src>

<mosaic_0001>
module attributes {stable_mosaic.version = 11 : i64} {
  func.func @kernel(%arg0: i32, %arg1: memref<2xi32, #tpu.memory_space<smem>>, %arg2: memref<1x16x4xf32, #tpu.memory_space<vmem>>, %arg3: memref<1x2x4xf32, #tpu.memory_space<vmem>>, %arg4: memref<3x4x8xbf16, #tpu.memory_space<vmem>>, %arg5: memref<1x8xf32, #tpu.memory_space<vmem>>, %arg6: memref<3x8x8xbf16, #tpu.memory_space<vmem>>, %arg7: memref<1x8xf32, #tpu.memory_space<vmem>>, %arg8: memref<1x2x8xf32, #tpu.memory_space<vmem>>, %arg9: memref<3x8x16xbf16, #tpu.memory_space<vmem>>, %arg10: memref<1x16xf32, #tpu.memory_space<vmem>>, %arg11: memref<3x16x16xbf16, #tpu.memory_space<vmem>>, %arg12: memref<1x16xf32, #tpu.memory_space<vmem>>, %arg13: memref<4x16x16xbf16, #tpu.memory_space<vmem>>, %arg14: memref<1x16xf32, #tpu.memory_space<vmem>>, %arg15: memref<1x4x16xf32, #tpu.memory_space<vmem>>, %arg16: memref<6x16x16xbf16, #tpu.memory_space<vmem>>, %arg17: memref<1x16xf32, #tpu.memory_space<vmem>>, %arg18: memref<4x16x8xbf16, #tpu.memory_space<vmem>>, %arg19: memref<1x8xf32, #tpu.memory_space<vmem>>, %arg20: memref<1x4x8xf32, #tpu.memory_space<vmem>>, %arg21: memref<6x8x8xbf16, #tpu.memory_space<vmem>>, %arg22: memref<1x8xf32, #tpu.memory_space<vmem>>, %arg23: memref<3x8x4xbf16, #tpu.memory_space<vmem>>, %arg24: memref<1x4xf32, #tpu.memory_space<vmem>>, %arg25: memref<1x16x4xf32, #tpu.memory_space<vmem>>, %arg26: memref<18x8xf32, #tpu.memory_space<vmem>>, %arg27: memref<10x16xf32, #tpu.memory_space<vmem>>, %arg28: memref<8x16xf32, #tpu.memory_space<vmem>>, %arg29: memref<16x8xf32, #tpu.memory_space<vmem>>) attributes {dimension_semantics = [#tpu.dimension_semantics<parallel>], iteration_bounds = array<i64: 2>, scalar_prefetch = 1 : i64, scratch_operands = 4 : i64, tpu.core_type = #tpu.core_type<tc>, window_params = [{transform_indices = @transform_0, window_bounds = array<i64: 1, 16, 4>}, {transform_indices = @transform_1, window_bounds = array<i64: 1, 2, 4>}, {pipeline_mode = #tpu.pipeline_mode<synchronous>, transform_indices = @transform_2, window_bounds = array<i64: 3, 4, 8>}, {pipeline_mode = #tpu.pipeline_mode<synchronous>, transform_indices = @transform_3, window_bounds = array<i64: 1, 8>}, {pipeline_mode = #tpu.pipeline_mode<synchronous>, transform_indices = @transform_4, window_bounds = array<i64: 3, 8, 8>}, {pipeline_mode = #tpu.pipeline_mode<synchronous>, transform_indices = @transform_5, window_bounds = array<i64: 1, 8>}, {transform_indices = @transform_6, window_bounds = array<i64: 1, 2, 8>}, {pipeline_mode = #tpu.pipeline_mode<synchronous>, transform_indices = @transform_7, window_bounds = array<i64: 3, 8, 16>}, {pipeline_mode = #tpu.pipeline_mode<synchronous>, transform_indices = @transform_8, window_bounds = array<i64: 1, 16>}, {pipeline_mode = #tpu.pipeline_mode<synchronous>, transform_indices = @transform_9, window_bounds = array<i64: 3, 16, 16>}, {pipeline_mode = #tpu.pipeline_mode<synchronous>, transform_indices = @transform_10, window_bounds = array<i64: 1, 16>}, {pipeline_mode = #tpu.pipeline_mode<synchronous>, transform_indices = @transform_11, window_bounds = array<i64: 4, 16, 16>}, {pipeline_mode = #tpu.pipeline_mode<synchronous>, transform_indices = @transform_12, window_bounds = array<i64: 1, 16>}, {transform_indices = @transform_13, window_bounds = array<i64: 1, 4, 16>}, {pipeline_mode = #tpu.pipeline_mode<synchronous>, transform_indices = @transform_14, window_bounds = array<i64: 6, 16, 16>}, {pipeline_mode = #tpu.pipeline_mode<synchronous>, transform_indices = @transform_15, window_bounds = array<i64: 1, 16>}, {pipeline_mode = #tpu.pipeline_mode<synchronous>, transform_indices = @transform_16, window_bounds = array<i64: 4, 16, 8>}, {pipeline_mode = #tpu.pipeline_mode<synchronous>, transform_indices = @transform_17, window_bounds = array<i64: 1, 8>}, {transform_indices = @transform_18, window_bounds = array<i64: 1, 4, 8>}, {pipeline_mode = #tpu.pipeline_mode<synchronous>, transform_indices = @transform_19, window_bounds = array<i64: 6, 8, 8>}, {pipeline_mode = #tpu.pipeline_mode<synchronous>, transform_indices = @transform_20, window_bounds = array<i64: 1, 8>}, {pipeline_mode = #tpu.pipeline_mode<synchronous>, transform_indices = @transform_21, window_bounds = array<i64: 3, 8, 4>}, {pipeline_mode = #tpu.pipeline_mode<synchronous>, transform_indices = @transform_22, window_bounds = array<i64: 1, 4>}, {transform_indices = @transform_23, window_bounds = array<i64: 1, 16, 4>}]} {
    %c0 = arith.constant 0 : index
    %c0_0 = arith.constant 0 : index
    %c0_1 = arith.constant 0 : index
    %0 = vector.load %arg2[%c0, %c0_0, %c0_1] : memref<1x16x4xf32, #tpu.memory_space<vmem>>, vector<1x16x4xf32>
    %1 = vector.shape_cast %0 : vector<1x16x4xf32> to vector<16x4xf32>
    %c0_2 = arith.constant 0 : index
    %c0_3 = arith.constant 0 : index
    %c0_4 = arith.constant 0 : index
    %2 = vector.load %arg3[%c0_2, %c0_3, %c0_4] : memref<1x2x4xf32, #tpu.memory_space<vmem>>, vector<1x2x4xf32>
    %3 = vector.shape_cast %2 : vector<1x2x4xf32> to vector<2x4xf32>
    %4 = vector.extract_strided_slice %3 {offsets = [0, 0], sizes = [1, 4], strides = [1, 1]} : vector<2x4xf32> to vector<1x4xf32>
    %5 = vector.extract_strided_slice %3 {offsets = [1, 0], sizes = [1, 4], strides = [1, 1]} : vector<2x4xf32> to vector<1x4xf32>
    %cst = arith.constant dense<0.000000e+00> : vector<4xf32>
    %6 = vector.multi_reduction <add>, %1, %cst [0] : vector<16x4xf32> to vector<4xf32>
    %7 = vector.shape_cast %6 : vector<4xf32> to vector<1x4xf32>
    %cst_5 = arith.constant 6.250000e-02 : f32
    %8 = vector.broadcast %cst_5 : f32 to vector<1x4xf32>
    %9 = arith.mulf %7, %8 : vector<1x4xf32>
    %10 = arith.mulf %1, %1 : vector<16x4xf32>
    %cst_6 = arith.constant dense<0.000000e+00> : vector<4xf32>
    %11 = vector.multi_reduction <add>, %10, %cst_6 [0] : vector<16x4xf32> to vector<4xf32>
    %12 = vector.shape_cast %11 : vector<4xf32> to vector<1x4xf32>
    %cst_7 = arith.constant 6.250000e-02 : f32
    %13 = vector.broadcast %cst_7 : f32 to vector<1x4xf32>
    %14 = arith.mulf %12, %13 : vector<1x4xf32>
    %15 = arith.mulf %9, %9 : vector<1x4xf32>
    %16 = arith.subf %14, %15 : vector<1x4xf32>
    %cst_8 = arith.constant 0.000000e+00 : f32
    %17 = vector.broadcast %cst_8 : f32 to vector<1x4xf32>
    %18 = arith.maximumf %16, %17 : vector<1x4xf32>
    %19 = vector.broadcast %9 : vector<1x4xf32> to vector<16x4xf32>
    %20 = arith.subf %1, %19 : vector<16x4xf32>
    %cst_9 = arith.constant 9.99999974E-6 : f32
    %21 = vector.broadcast %cst_9 : f32 to vector<1x4xf32>
    %22 = arith.addf %18, %21 : vector<1x4xf32>
    %23 = math.rsqrt %22 : vector<1x4xf32>
    %24 = vector.broadcast %23 : vector<1x4xf32> to vector<16x4xf32>
    %25 = arith.mulf %20, %24 : vector<16x4xf32>
    %26 = vector.broadcast %4 : vector<1x4xf32> to vector<16x4xf32>
    %27 = arith.mulf %26, %25 : vector<16x4xf32>
    %28 = vector.broadcast %5 : vector<1x4xf32> to vector<16x4xf32>
    %29 = arith.addf %27, %28 : vector<16x4xf32>
    %30 = arith.truncf %29 : vector<16x4xf32> to vector<16x4xbf16>
    %c0_10 = arith.constant 0 : index
    %c0_11 = arith.constant 0 : index
    %c0_12 = arith.constant 0 : index
    %31 = vector.load %arg4[%c0_10, %c0_11, %c0_12] : memref<3x4x8xbf16, #tpu.memory_space<vmem>>, vector<1x4x8xbf16>
    %32 = vector.shape_cast %31 : vector<1x4x8xbf16> to vector<4x8xbf16>
    %cst_13 = arith.constant dense<0.000000e+00> : vector<16x8xf32>
    %33 = tpu.matmul %30, %32, %cst_13 {dimension_numbers = #tpu.dot_dimension_numbers<[1], [0], [0], [1], [0, 0, 1, 1], [], []>} : vector<16x4xbf16>, vector<4x8xbf16>, vector<16x8xf32> -> vector<16x8xf32>
    %c1 = arith.constant 1 : index
    %c0_14 = arith.constant 0 : index
    %c0_15 = arith.constant 0 : index
    %34 = vector.load %arg4[%c1, %c0_14, %c0_15] : memref<3x4x8xbf16, #tpu.memory_space<vmem>>, vector<1x4x8xbf16>
    %35 = vector.shape_cast %34 : vector<1x4x8xbf16> to vector<4x8xbf16>
    %cst_16 = arith.constant dense<0.000000e+00> : vector<16x8xf32>
    %36 = tpu.matmul %30, %35, %cst_16 {dimension_numbers = #tpu.dot_dimension_numbers<[1], [0], [0], [1], [0, 0, 1, 1], [], []>} : vector<16x4xbf16>, vector<4x8xbf16>, vector<16x8xf32> -> vector<16x8xf32>
    %c2 = arith.constant 2 : index
    %c0_17 = arith.constant 0 : index
    %c0_18 = arith.constant 0 : index
    %37 = vector.load %arg4[%c2, %c0_17, %c0_18] : memref<3x4x8xbf16, #tpu.memory_space<vmem>>, vector<1x4x8xbf16>
    %38 = vector.shape_cast %37 : vector<1x4x8xbf16> to vector<4x8xbf16>
    %cst_19 = arith.constant dense<0.000000e+00> : vector<16x8xf32>
    %39 = tpu.matmul %30, %38, %cst_19 {dimension_numbers = #tpu.dot_dimension_numbers<[1], [0], [0], [1], [0, 0, 1, 1], [], []>} : vector<16x4xbf16>, vector<4x8xbf16>, vector<16x8xf32> -> vector<16x8xf32>
    %cst_20 = arith.constant 0.000000e+00 : f32
    %40 = vector.broadcast %cst_20 : f32 to vector<1x8xf32>
    %41 = vector.extract_strided_slice %33 {offsets = [0, 0], sizes = [15, 8], strides = [1, 1]} : vector<16x8xf32> to vector<15x8xf32>
    %42 = tpu.concatenate %40, %41 in 0 : vector<1x8xf32>, vector<15x8xf32> -> vector<16x8xf32>
    %43 = arith.addf %42, %36 : vector<16x8xf32>
    %cst_21 = arith.constant 0.000000e+00 : f32
    %44 = vector.broadcast %cst_21 : f32 to vector<1x8xf32>
    %45 = vector.extract_strided_slice %39 {offsets = [1, 0], sizes = [15, 8], strides = [1, 1]} : vector<16x8xf32> to vector<15x8xf32>
    %46 = tpu.concatenate %45, %44 in 0 : vector<15x8xf32>, vector<1x8xf32> -> vector<16x8xf32>
    %47 = arith.addf %43, %46 : vector<16x8xf32>
    %c0_22 = arith.constant 0 : index
    %c0_23 = arith.constant 0 : index
    %48 = vector.load %arg5[%c0_22, %c0_23] : memref<1x8xf32, #tpu.memory_space<vmem>>, vector<1x8xf32>
    %49 = vector.broadcast %48 : vector<1x8xf32> to vector<16x8xf32>
    %50 = arith.addf %47, %49 : vector<16x8xf32>
    %cst_24 = arith.constant 0.000000e+00 : f32
    %51 = vector.broadcast %cst_24 : f32 to vector<16x8xf32>
    %52 = arith.cmpf ogt, %50, %51 : vector<16x8xf32>
    %cst_25 = arith.constant 2.000000e-01 : f32
    %53 = vector.broadcast %cst_25 : f32 to vector<16x8xf32>
    %54 = arith.mulf %53, %50 : vector<16x8xf32>
    %55 = arith.select %52, %50, %54 : vector<16x8xi1>, vector<16x8xf32>
    %56 = arith.truncf %55 : vector<16x8xf32> to vector<16x8xbf16>
    %c0_26 = arith.constant 0 : index
    %c0_27 = arith.constant 0 : index
    %c0_28 = arith.constant 0 : index
    %57 = vector.load %arg6[%c0_26, %c0_27, %c0_28] : memref<3x8x8xbf16, #tpu.memory_space<vmem>>, vector<1x8x8xbf16>
    %58 = vector.shape_cast %57 : vector<1x8x8xbf16> to vector<8x8xbf16>
    %cst_29 = arith.constant dense<0.000000e+00> : vector<16x8xf32>
    %59 = tpu.matmul %56, %58, %cst_29 {dimension_numbers = #tpu.dot_dimension_numbers<[1], [0], [0], [1], [0, 0, 1, 1], [], []>} : vector<16x8xbf16>, vector<8x8xbf16>, vector<16x8xf32> -> vector<16x8xf32>
    %c1_30 = arith.constant 1 : index
    %c0_31 = arith.constant 0 : index
    %c0_32 = arith.constant 0 : index
    %60 = vector.load %arg6[%c1_30, %c0_31, %c0_32] : memref<3x8x8xbf16, #tpu.memory_space<vmem>>, vector<1x8x8xbf16>
    %61 = vector.shape_cast %60 : vector<1x8x8xbf16> to vector<8x8xbf16>
    %cst_33 = arith.constant dense<0.000000e+00> : vector<16x8xf32>
    %62 = tpu.matmul %56, %61, %cst_33 {dimension_numbers = #tpu.dot_dimension_numbers<[1], [0], [0], [1], [0, 0, 1, 1], [], []>} : vector<16x8xbf16>, vector<8x8xbf16>, vector<16x8xf32> -> vector<16x8xf32>
    %c2_34 = arith.constant 2 : index
    %c0_35 = arith.constant 0 : index
    %c0_36 = arith.constant 0 : index
    %63 = vector.load %arg6[%c2_34, %c0_35, %c0_36] : memref<3x8x8xbf16, #tpu.memory_space<vmem>>, vector<1x8x8xbf16>
    %64 = vector.shape_cast %63 : vector<1x8x8xbf16> to vector<8x8xbf16>
    %cst_37 = arith.constant dense<0.000000e+00> : vector<16x8xf32>
    %65 = tpu.matmul %56, %64, %cst_37 {dimension_numbers = #tpu.dot_dimension_numbers<[1], [0], [0], [1], [0, 0, 1, 1], [], []>} : vector<16x8xbf16>, vector<8x8xbf16>, vector<16x8xf32> -> vector<16x8xf32>
    %cst_38 = arith.constant 0.000000e+00 : f32
    %66 = vector.broadcast %cst_38 : f32 to vector<1x8xf32>
    %67 = vector.extract_strided_slice %59 {offsets = [0, 0], sizes = [15, 8], strides = [1, 1]} : vector<16x8xf32> to vector<15x8xf32>
    %68 = tpu.concatenate %66, %67 in 0 : vector<1x8xf32>, vector<15x8xf32> -> vector<16x8xf32>
    %69 = arith.addf %68, %62 : vector<16x8xf32>
    %cst_39 = arith.constant 0.000000e+00 : f32
    %70 = vector.broadcast %cst_39 : f32 to vector<1x8xf32>
    %71 = vector.extract_strided_slice %65 {offsets = [1, 0], sizes = [15, 8], strides = [1, 1]} : vector<16x8xf32> to vector<15x8xf32>
    %72 = tpu.concatenate %71, %70 in 0 : vector<15x8xf32>, vector<1x8xf32> -> vector<16x8xf32>
    %73 = arith.addf %69, %72 : vector<16x8xf32>
    %c0_40 = arith.constant 0 : index
    %c0_41 = arith.constant 0 : index
    %74 = vector.load %arg7[%c0_40, %c0_41] : memref<1x8xf32, #tpu.memory_space<vmem>>, vector<1x8xf32>
    %75 = vector.broadcast %74 : vector<1x8xf32> to vector<16x8xf32>
    %76 = arith.addf %73, %75 : vector<16x8xf32>
    %cst_42 = arith.constant 0.000000e+00 : f32
    %77 = vector.broadcast %cst_42 : f32 to vector<16x8xf32>
    %78 = arith.cmpf ogt, %76, %77 : vector<16x8xf32>
    %cst_43 = arith.constant 2.000000e-01 : f32
    %79 = vector.broadcast %cst_43 : f32 to vector<16x8xf32>
    %80 = arith.mulf %79, %76 : vector<16x8xf32>
    %81 = arith.select %78, %76, %80 : vector<16x8xi1>, vector<16x8xf32>
    %cst_44 = arith.constant 0.000000e+00 : f32
    %82 = vector.broadcast %cst_44 : f32 to vector<1x8xf32>
    %c0_45 = arith.constant 0 : index
    %c0_46 = arith.constant 0 : index
    %83 = vector.load %arg26[%c0_45, %c0_46] : memref<18x8xf32, #tpu.memory_space<vmem>>, vector<1x8xf32>
    tpu.vector_store %arg26[%c0_45, %c0_46], %82 {strides = array<i32>} : memref<18x8xf32, #tpu.memory_space<vmem>>, vector<1x8xf32>,
    %c1_47 = arith.constant 1 : index
    %c0_48 = arith.constant 0 : index
    %84 = vector.load %arg26[%c1_47, %c0_48] : memref<18x8xf32, #tpu.memory_space<vmem>>, vector<16x8xf32>
    tpu.vector_store %arg26[%c1_47, %c0_48], %81 {strides = array<i32>} : memref<18x8xf32, #tpu.memory_space<vmem>>, vector<16x8xf32>,
    %c0_49 = arith.constant 0 : index
    %c0_50 = arith.constant 0 : index
    %85 = tpu.strided_load %arg26[%c0_49, %c0_50] {strides = array<i32: 2, 1>} : memref<18x8xf32, #tpu.memory_space<vmem>>, vector<8x8xf32>
    %c1_51 = arith.constant 1 : index
    %c0_52 = arith.constant 0 : index
    %86 = tpu.strided_load %arg26[%c1_51, %c0_52] {strides = array<i32: 2, 1>} : memref<18x8xf32, #tpu.memory_space<vmem>>, vector<8x8xf32>
    %87 = arith.addf %85, %86 : vector<8x8xf32>
    %c2_53 = arith.constant 2 : index
    %c0_54 = arith.constant 0 : index
    %88 = tpu.strided_load %arg26[%c2_53, %c0_54] {strides = array<i32: 2, 1>} : memref<18x8xf32, #tpu.memory_space<vmem>>, vector<8x8xf32>
    %89 = arith.addf %87, %88 : vector<8x8xf32>
    %cst_55 = arith.constant 0.333333343 : f32
    %90 = vector.broadcast %cst_55 : f32 to vector<8x8xf32>
    %91 = arith.mulf %89, %90 : vector<8x8xf32>
    %c0_56 = arith.constant 0 : index
    %c0_57 = arith.constant 0 : index
    %c0_58 = arith.constant 0 : index
    %92 = vector.load %arg8[%c0_56, %c0_57, %c0_58] : memref<1x2x8xf32, #tpu.memory_space<vmem>>, vector<1x2x8xf32>
    %93 = vector.shape_cast %92 : vector<1x2x8xf32> to vector<2x8xf32>
    %94 = vector.extract_strided_slice %93 {offsets = [0, 0], sizes = [1, 8], strides = [1, 1]} : vector<2x8xf32> to vector<1x8xf32>
    %95 = vector.extract_strided_slice %93 {offsets = [1, 0], sizes = [1, 8], strides = [1, 1]} : vector<2x8xf32> to vector<1x8xf32>
    %cst_59 = arith.constant dense<0.000000e+00> : vector<8xf32>
    %96 = vector.multi_reduction <add>, %91, %cst_59 [0] : vector<8x8xf32> to vector<8xf32>
    %97 = vector.shape_cast %96 : vector<8xf32> to vector<1x8xf32>
    %cst_60 = arith.constant 1.250000e-01 : f32
    %98 = vector.broadcast %cst_60 : f32 to vector<1x8xf32>
    %99 = arith.mulf %97, %98 : vector<1x8xf32>
    %100 = arith.mulf %91, %91 : vector<8x8xf32>
    %cst_61 = arith.constant dense<0.000000e+00> : vector<8xf32>
    %101 = vector.multi_reduction <add>, %100, %cst_61 [0] : vector<8x8xf32> to vector<8xf32>
    %102 = vector.shape_cast %101 : vector<8xf32> to vector<1x8xf32>
    %cst_62 = arith.constant 1.250000e-01 : f32
    %103 = vector.broadcast %cst_62 : f32 to vector<1x8xf32>
    %104 = arith.mulf %102, %103 : vector<1x8xf32>
    %105 = arith.mulf %99, %99 : vector<1x8xf32>
    %106 = arith.subf %104, %105 : vector<1x8xf32>
    %cst_63 = arith.constant 0.000000e+00 : f32
    %107 = vector.broadcast %cst_63 : f32 to vector<1x8xf32>
    %108 = arith.maximumf %106, %107 : vector<1x8xf32>
    %109 = vector.broadcast %99 : vector<1x8xf32> to vector<8x8xf32>
    %110 = arith.subf %91, %109 : vector<8x8xf32>
    %cst_64 = arith.constant 9.99999974E-6 : f32
    %111 = vector.broadcast %cst_64 : f32 to vector<1x8xf32>
    %112 = arith.addf %108, %111 : vector<1x8xf32>
    %113 = math.rsqrt %112 : vector<1x8xf32>
    %114 = vector.broadcast %113 : vector<1x8xf32> to vector<8x8xf32>
    %115 = arith.mulf %110, %114 : vector<8x8xf32>
    %116 = vector.broadcast %94 : vector<1x8xf32> to vector<8x8xf32>
    %117 = arith.mulf %116, %115 : vector<8x8xf32>
    %118 = vector.broadcast %95 : vector<1x8xf32> to vector<8x8xf32>
    %119 = arith.addf %117, %118 : vector<8x8xf32>
    %120 = arith.truncf %119 : vector<8x8xf32> to vector<8x8xbf16>
    %c0_65 = arith.constant 0 : index
    %c0_66 = arith.constant 0 : index
    %c0_67 = arith.constant 0 : index
    %121 = vector.load %arg9[%c0_65, %c0_66, %c0_67] : memref<3x8x16xbf16, #tpu.memory_space<vmem>>, vector<1x8x16xbf16>
    %122 = vector.shape_cast %121 : vector<1x8x16xbf16> to vector<8x16xbf16>
    %cst_68 = arith.constant dense<0.000000e+00> : vector<8x16xf32>
    %123 = tpu.matmul %120, %122, %cst_68 {dimension_numbers = #tpu.dot_dimension_numbers<[1], [0], [0], [1], [0, 0, 1, 1], [], []>} : vector<8x8xbf16>, vector<8x16xbf16>, vector<8x16xf32> -> vector<8x16xf32>
    %c1_69 = arith.constant 1 : index
    %c0_70 = arith.constant 0 : index
    %c0_71 = arith.constant 0 : index
    %124 = vector.load %arg9[%c1_69, %c0_70, %c0_71] : memref<3x8x16xbf16, #tpu.memory_space<vmem>>, vector<1x8x16xbf16>
    %125 = vector.shape_cast %124 : vector<1x8x16xbf16> to vector<8x16xbf16>
    %cst_72 = arith.constant dense<0.000000e+00> : vector<8x16xf32>
    %126 = tpu.matmul %120, %125, %cst_72 {dimension_numbers = #tpu.dot_dimension_numbers<[1], [0], [0], [1], [0, 0, 1, 1], [], []>} : vector<8x8xbf16>, vector<8x16xbf16>, vector<8x16xf32> -> vector<8x16xf32>
    %c2_73 = arith.constant 2 : index
    %c0_74 = arith.constant 0 : index
    %c0_75 = arith.constant 0 : index
    %127 = vector.load %arg9[%c2_73, %c0_74, %c0_75] : memref<3x8x16xbf16, #tpu.memory_space<vmem>>, vector<1x8x16xbf16>
    %128 = vector.shape_cast %127 : vector<1x8x16xbf16> to vector<8x16xbf16>
    %cst_76 = arith.constant dense<0.000000e+00> : vector<8x16xf32>
    %129 = tpu.matmul %120, %128, %cst_76 {dimension_numbers = #tpu.dot_dimension_numbers<[1], [0], [0], [1], [0, 0, 1, 1], [], []>} : vector<8x8xbf16>, vector<8x16xbf16>, vector<8x16xf32> -> vector<8x16xf32>
    %cst_77 = arith.constant 0.000000e+00 : f32
    %130 = vector.broadcast %cst_77 : f32 to vector<1x16xf32>
    %131 = vector.extract_strided_slice %123 {offsets = [0, 0], sizes = [7, 16], strides = [1, 1]} : vector<8x16xf32> to vector<7x16xf32>
    %132 = tpu.concatenate %130, %131 in 0 : vector<1x16xf32>, vector<7x16xf32> -> vector<8x16xf32>
    %133 = arith.addf %132, %126 : vector<8x16xf32>
    %cst_78 = arith.constant 0.000000e+00 : f32
    %134 = vector.broadcast %cst_78 : f32 to vector<1x16xf32>
    %135 = vector.extract_strided_slice %129 {offsets = [1, 0], sizes = [7, 16], strides = [1, 1]} : vector<8x16xf32> to vector<7x16xf32>
    %136 = tpu.concatenate %135, %134 in 0 : vector<7x16xf32>, vector<1x16xf32> -> vector<8x16xf32>
    %137 = arith.addf %133, %136 : vector<8x16xf32>
    %c0_79 = arith.constant 0 : index
    %c0_80 = arith.constant 0 : index
    %138 = vector.load %arg10[%c0_79, %c0_80] : memref<1x16xf32, #tpu.memory_space<vmem>>, vector<1x16xf32>
    %139 = vector.broadcast %138 : vector<1x16xf32> to vector<8x16xf32>
    %140 = arith.addf %137, %139 : vector<8x16xf32>
    %cst_81 = arith.constant 0.000000e+00 : f32
    %141 = vector.broadcast %cst_81 : f32 to vector<8x16xf32>
    %142 = arith.cmpf ogt, %140, %141 : vector<8x16xf32>
    %cst_82 = arith.constant 2.000000e-01 : f32
    %143 = vector.broadcast %cst_82 : f32 to vector<8x16xf32>
    %144 = arith.mulf %143, %140 : vector<8x16xf32>
    %145 = arith.select %142, %140, %144 : vector<8x16xi1>, vector<8x16xf32>
    %146 = arith.truncf %145 : vector<8x16xf32> to vector<8x16xbf16>
    %c0_83 = arith.constant 0 : index
    %c0_84 = arith.constant 0 : index
    %c0_85 = arith.constant 0 : index
    %147 = vector.load %arg11[%c0_83, %c0_84, %c0_85] : memref<3x16x16xbf16, #tpu.memory_space<vmem>>, vector<1x16x16xbf16>
    %148 = vector.shape_cast %147 : vector<1x16x16xbf16> to vector<16x16xbf16>
    %cst_86 = arith.constant dense<0.000000e+00> : vector<8x16xf32>
    %149 = tpu.matmul %146, %148, %cst_86 {dimension_numbers = #tpu.dot_dimension_numbers<[1], [0], [0], [1], [0, 0, 1, 1], [], []>} : vector<8x16xbf16>, vector<16x16xbf16>, vector<8x16xf32> -> vector<8x16xf32>
    %c1_87 = arith.constant 1 : index
    %c0_88 = arith.constant 0 : index
    %c0_89 = arith.constant 0 : index
    %150 = vector.load %arg11[%c1_87, %c0_88, %c0_89] : memref<3x16x16xbf16, #tpu.memory_space<vmem>>, vector<1x16x16xbf16>
    %151 = vector.shape_cast %150 : vector<1x16x16xbf16> to vector<16x16xbf16>
    %cst_90 = arith.constant dense<0.000000e+00> : vector<8x16xf32>
    %152 = tpu.matmul %146, %151, %cst_90 {dimension_numbers = #tpu.dot_dimension_numbers<[1], [0], [0], [1], [0, 0, 1, 1], [], []>} : vector<8x16xbf16>, vector<16x16xbf16>, vector<8x16xf32> -> vector<8x16xf32>
    %c2_91 = arith.constant 2 : index
    %c0_92 = arith.constant 0 : index
    %c0_93 = arith.constant 0 : index
    %153 = vector.load %arg11[%c2_91, %c0_92, %c0_93] : memref<3x16x16xbf16, #tpu.memory_space<vmem>>, vector<1x16x16xbf16>
    %154 = vector.shape_cast %153 : vector<1x16x16xbf16> to vector<16x16xbf16>
    %cst_94 = arith.constant dense<0.000000e+00> : vector<8x16xf32>
    %155 = tpu.matmul %146, %154, %cst_94 {dimension_numbers = #tpu.dot_dimension_numbers<[1], [0], [0], [1], [0, 0, 1, 1], [], []>} : vector<8x16xbf16>, vector<16x16xbf16>, vector<8x16xf32> -> vector<8x16xf32>
    %cst_95 = arith.constant 0.000000e+00 : f32
    %156 = vector.broadcast %cst_95 : f32 to vector<1x16xf32>
    %157 = vector.extract_strided_slice %149 {offsets = [0, 0], sizes = [7, 16], strides = [1, 1]} : vector<8x16xf32> to vector<7x16xf32>
    %158 = tpu.concatenate %156, %157 in 0 : vector<1x16xf32>, vector<7x16xf32> -> vector<8x16xf32>
    %159 = arith.addf %158, %152 : vector<8x16xf32>
    %cst_96 = arith.constant 0.000000e+00 : f32
    %160 = vector.broadcast %cst_96 : f32 to vector<1x16xf32>
    %161 = vector.extract_strided_slice %155 {offsets = [1, 0], sizes = [7, 16], strides = [1, 1]} : vector<8x16xf32> to vector<7x16xf32>
    %162 = tpu.concatenate %161, %160 in 0 : vector<7x16xf32>, vector<1x16xf32> -> vector<8x16xf32>
    %163 = arith.addf %159, %162 : vector<8x16xf32>
    %c0_97 = arith.constant 0 : index
    %c0_98 = arith.constant 0 : index
    %164 = vector.load %arg12[%c0_97, %c0_98] : memref<1x16xf32, #tpu.memory_space<vmem>>, vector<1x16xf32>
    %165 = vector.broadcast %164 : vector<1x16xf32> to vector<8x16xf32>
    %166 = arith.addf %163, %165 : vector<8x16xf32>
    %cst_99 = arith.constant 0.000000e+00 : f32
    %167 = vector.broadcast %cst_99 : f32 to vector<8x16xf32>
    %168 = arith.cmpf ogt, %166, %167 : vector<8x16xf32>
    %cst_100 = arith.constant 2.000000e-01 : f32
    %169 = vector.broadcast %cst_100 : f32 to vector<8x16xf32>
    %170 = arith.mulf %169, %166 : vector<8x16xf32>
    %171 = arith.select %168, %166, %170 : vector<8x16xi1>, vector<8x16xf32>
    %cst_101 = arith.constant 0.000000e+00 : f32
    %172 = vector.broadcast %cst_101 : f32 to vector<1x16xf32>
    %c0_102 = arith.constant 0 : index
    %c0_103 = arith.constant 0 : index
    %173 = vector.load %arg27[%c0_102, %c0_103] : memref<10x16xf32, #tpu.memory_space<vmem>>, vector<1x16xf32>
    tpu.vector_store %arg27[%c0_102, %c0_103], %172 {strides = array<i32>} : memref<10x16xf32, #tpu.memory_space<vmem>>, vector<1x16xf32>,
    %c1_104 = arith.constant 1 : index
    %c0_105 = arith.constant 0 : index
    %174 = vector.load %arg27[%c1_104, %c0_105] : memref<10x16xf32, #tpu.memory_space<vmem>>, vector<8x16xf32>
    tpu.vector_store %arg27[%c1_104, %c0_105], %171 {strides = array<i32>} : memref<10x16xf32, #tpu.memory_space<vmem>>, vector<8x16xf32>,
    %c0_106 = arith.constant 0 : index
    %c0_107 = arith.constant 0 : index
    %175 = tpu.strided_load %arg27[%c0_106, %c0_107] {strides = array<i32: 2, 1>} : memref<10x16xf32, #tpu.memory_space<vmem>>, vector<4x16xf32>
    %c1_108 = arith.constant 1 : index
    %c0_109 = arith.constant 0 : index
    %176 = tpu.strided_load %arg27[%c1_108, %c0_109] {strides = array<i32: 2, 1>} : memref<10x16xf32, #tpu.memory_space<vmem>>, vector<4x16xf32>
    %177 = arith.addf %175, %176 : vector<4x16xf32>
    %c2_110 = arith.constant 2 : index
    %c0_111 = arith.constant 0 : index
    %178 = tpu.strided_load %arg27[%c2_110, %c0_111] {strides = array<i32: 2, 1>} : memref<10x16xf32, #tpu.memory_space<vmem>>, vector<4x16xf32>
    %179 = arith.addf %177, %178 : vector<4x16xf32>
    %cst_112 = arith.constant 0.333333343 : f32
    %180 = vector.broadcast %cst_112 : f32 to vector<4x16xf32>
    %181 = arith.mulf %179, %180 : vector<4x16xf32>
    %182 = arith.truncf %181 : vector<4x16xf32> to vector<4x16xbf16>
    %c0_113 = arith.constant 0 : index
    %c0_114 = arith.constant 0 : index
    %c0_115 = arith.constant 0 : index
    %183 = vector.load %arg13[%c0_113, %c0_114, %c0_115] : memref<4x16x16xbf16, #tpu.memory_space<vmem>>, vector<1x16x16xbf16>
    %184 = vector.shape_cast %183 : vector<1x16x16xbf16> to vector<16x16xbf16>
    %cst_116 = arith.constant dense<0.000000e+00> : vector<4x16xf32>
    %185 = tpu.matmul %182, %184, %cst_116 {dimension_numbers = #tpu.dot_dimension_numbers<[1], [0], [0], [1], [0, 0, 1, 1], [], []>} : vector<4x16xbf16>, vector<16x16xbf16>, vector<4x16xf32> -> vector<4x16xf32>
    %c1_117 = arith.constant 1 : index
    %c0_118 = arith.constant 0 : index
    %c0_119 = arith.constant 0 : index
    %186 = vector.load %arg13[%c1_117, %c0_118, %c0_119] : memref<4x16x16xbf16, #tpu.memory_space<vmem>>, vector<1x16x16xbf16>
    %187 = vector.shape_cast %186 : vector<1x16x16xbf16> to vector<16x16xbf16>
    %cst_120 = arith.constant dense<0.000000e+00> : vector<4x16xf32>
    %188 = tpu.matmul %182, %187, %cst_120 {dimension_numbers = #tpu.dot_dimension_numbers<[1], [0], [0], [1], [0, 0, 1, 1], [], []>} : vector<4x16xbf16>, vector<16x16xbf16>, vector<4x16xf32> -> vector<4x16xf32>
    %c2_121 = arith.constant 2 : index
    %c0_122 = arith.constant 0 : index
    %c0_123 = arith.constant 0 : index
    %189 = vector.load %arg13[%c2_121, %c0_122, %c0_123] : memref<4x16x16xbf16, #tpu.memory_space<vmem>>, vector<1x16x16xbf16>
    %190 = vector.shape_cast %189 : vector<1x16x16xbf16> to vector<16x16xbf16>
    %cst_124 = arith.constant dense<0.000000e+00> : vector<4x16xf32>
    %191 = tpu.matmul %182, %190, %cst_124 {dimension_numbers = #tpu.dot_dimension_numbers<[1], [0], [0], [1], [0, 0, 1, 1], [], []>} : vector<4x16xbf16>, vector<16x16xbf16>, vector<4x16xf32> -> vector<4x16xf32>
    %c3 = arith.constant 3 : index
    %c0_125 = arith.constant 0 : index
    %c0_126 = arith.constant 0 : index
    %192 = vector.load %arg13[%c3, %c0_125, %c0_126] : memref<4x16x16xbf16, #tpu.memory_space<vmem>>, vector<1x16x16xbf16>
    %193 = vector.shape_cast %192 : vector<1x16x16xbf16> to vector<16x16xbf16>
    %cst_127 = arith.constant dense<0.000000e+00> : vector<4x16xf32>
    %194 = tpu.matmul %182, %193, %cst_127 {dimension_numbers = #tpu.dot_dimension_numbers<[1], [0], [0], [1], [0, 0, 1, 1], [], []>} : vector<4x16xbf16>, vector<16x16xbf16>, vector<4x16xf32> -> vector<4x16xf32>
    %cst_128 = arith.constant 0.000000e+00 : f32
    %195 = vector.broadcast %cst_128 : f32 to vector<1x16xf32>
    %196 = vector.extract_strided_slice %185 {offsets = [0, 0], sizes = [3, 16], strides = [1, 1]} : vector<4x16xf32> to vector<3x16xf32>
    %197 = tpu.concatenate %195, %196 in 0 : vector<1x16xf32>, vector<3x16xf32> -> vector<4x16xf32>
    %198 = arith.addf %197, %188 : vector<4x16xf32>
    %cst_129 = arith.constant 0.000000e+00 : f32
    %199 = vector.broadcast %cst_129 : f32 to vector<1x16xf32>
    %200 = vector.extract_strided_slice %194 {offsets = [1, 0], sizes = [3, 16], strides = [1, 1]} : vector<4x16xf32> to vector<3x16xf32>
    %201 = tpu.concatenate %200, %199 in 0 : vector<3x16xf32>, vector<1x16xf32> -> vector<4x16xf32>
    %202 = arith.addf %191, %201 : vector<4x16xf32>
    %c0_130 = arith.constant 0 : index
    %c0_131 = arith.constant 0 : index
    %203 = vector.load %arg14[%c0_130, %c0_131] : memref<1x16xf32, #tpu.memory_space<vmem>>, vector<1x16xf32>
    %204 = vector.broadcast %203 : vector<1x16xf32> to vector<4x16xf32>
    %205 = arith.addf %198, %204 : vector<4x16xf32>
    %cst_132 = arith.constant 0.000000e+00 : f32
    %206 = vector.broadcast %cst_132 : f32 to vector<4x16xf32>
    %207 = arith.cmpf ogt, %205, %206 : vector<4x16xf32>
    %cst_133 = arith.constant 2.000000e-01 : f32
    %208 = vector.broadcast %cst_133 : f32 to vector<4x16xf32>
    %209 = arith.mulf %208, %205 : vector<4x16xf32>
    %210 = arith.select %207, %205, %209 : vector<4x16xi1>, vector<4x16xf32>
    %c0_134 = arith.constant 0 : index
    %c0_135 = arith.constant 0 : index
    %211 = vector.load %arg14[%c0_134, %c0_135] : memref<1x16xf32, #tpu.memory_space<vmem>>, vector<1x16xf32>
    %212 = vector.broadcast %211 : vector<1x16xf32> to vector<4x16xf32>
    %213 = arith.addf %202, %212 : vector<4x16xf32>
    %cst_136 = arith.constant 0.000000e+00 : f32
    %214 = vector.broadcast %cst_136 : f32 to vector<4x16xf32>
    %215 = arith.cmpf ogt, %213, %214 : vector<4x16xf32>
    %cst_137 = arith.constant 2.000000e-01 : f32
    %216 = vector.broadcast %cst_137 : f32 to vector<4x16xf32>
    %217 = arith.mulf %216, %213 : vector<4x16xf32>
    %218 = arith.select %215, %213, %217 : vector<4x16xi1>, vector<4x16xf32>
    %c0_138 = arith.constant 0 : index
    %c0_139 = arith.constant 0 : index
    %219 = tpu.strided_load %arg28[%c0_138, %c0_139] {strides = array<i32: 2, 1>} : memref<8x16xf32, #tpu.memory_space<vmem>>, vector<4x16xf32>
    tpu.strided_store %arg28[%c0_138, %c0_139], %210 {strides = array<i32: 2, 1>} : memref<8x16xf32, #tpu.memory_space<vmem>>, vector<4x16xf32>
    %c1_140 = arith.constant 1 : index
    %c0_141 = arith.constant 0 : index
    %220 = tpu.strided_load %arg28[%c1_140, %c0_141] {strides = array<i32: 2, 1>} : memref<8x16xf32, #tpu.memory_space<vmem>>, vector<4x16xf32>
    tpu.strided_store %arg28[%c1_140, %c0_141], %218 {strides = array<i32: 2, 1>} : memref<8x16xf32, #tpu.memory_space<vmem>>, vector<4x16xf32>
    %c0_142 = arith.constant 0 : index
    %c0_143 = arith.constant 0 : index
    %221 = vector.load %arg28[%c0_142, %c0_143] : memref<8x16xf32, #tpu.memory_space<vmem>>, vector<8x16xf32>
    %c0_144 = arith.constant 0 : index
    %c0_145 = arith.constant 0 : index
    %c0_146 = arith.constant 0 : index
    %222 = vector.load %arg15[%c0_144, %c0_145, %c0_146] : memref<1x4x16xf32, #tpu.memory_space<vmem>>, vector<1x4x16xf32>
    %223 = vector.shape_cast %222 : vector<1x4x16xf32> to vector<4x16xf32>
    %224 = vector.extract_strided_slice %223 {offsets = [0, 0], sizes = [1, 16], strides = [1, 1]} : vector<4x16xf32> to vector<1x16xf32>
    %225 = vector.extract_strided_slice %223 {offsets = [1, 0], sizes = [1, 16], strides = [1, 1]} : vector<4x16xf32> to vector<1x16xf32>
    %cst_147 = arith.constant dense<0.000000e+00> : vector<16xf32>
    %226 = vector.multi_reduction <add>, %221, %cst_147 [0] : vector<8x16xf32> to vector<16xf32>
    %227 = vector.shape_cast %226 : vector<16xf32> to vector<1x16xf32>
    %cst_148 = arith.constant 1.250000e-01 : f32
    %228 = vector.broadcast %cst_148 : f32 to vector<1x16xf32>
    %229 = arith.mulf %227, %228 : vector<1x16xf32>
    %230 = arith.mulf %221, %221 : vector<8x16xf32>
    %cst_149 = arith.constant dense<0.000000e+00> : vector<16xf32>
    %231 = vector.multi_reduction <add>, %230, %cst_149 [0] : vector<8x16xf32> to vector<16xf32>
    %232 = vector.shape_cast %231 : vector<16xf32> to vector<1x16xf32>
    %cst_150 = arith.constant 1.250000e-01 : f32
    %233 = vector.broadcast %cst_150 : f32 to vector<1x16xf32>
    %234 = arith.mulf %232, %233 : vector<1x16xf32>
    %235 = arith.mulf %229, %229 : vector<1x16xf32>
    %236 = arith.subf %234, %235 : vector<1x16xf32>
    %cst_151 = arith.constant 0.000000e+00 : f32
    %237 = vector.broadcast %cst_151 : f32 to vector<1x16xf32>
    %238 = arith.maximumf %236, %237 : vector<1x16xf32>
    %239 = vector.broadcast %229 : vector<1x16xf32> to vector<8x16xf32>
    %240 = arith.subf %221, %239 : vector<8x16xf32>
    %cst_152 = arith.constant 9.99999974E-6 : f32
    %241 = vector.broadcast %cst_152 : f32 to vector<1x16xf32>
    %242 = arith.addf %238, %241 : vector<1x16xf32>
    %243 = math.rsqrt %242 : vector<1x16xf32>
    %244 = vector.broadcast %243 : vector<1x16xf32> to vector<8x16xf32>
    %245 = arith.mulf %240, %244 : vector<8x16xf32>
    %246 = vector.broadcast %224 : vector<1x16xf32> to vector<8x16xf32>
    %247 = arith.mulf %246, %245 : vector<8x16xf32>
    %248 = vector.broadcast %225 : vector<1x16xf32> to vector<8x16xf32>
    %249 = arith.addf %247, %248 : vector<8x16xf32>
    %250 = vector.extract_strided_slice %223 {offsets = [2, 0], sizes = [1, 16], strides = [1, 1]} : vector<4x16xf32> to vector<1x16xf32>
    %251 = vector.extract_strided_slice %223 {offsets = [3, 0], sizes = [1, 16], strides = [1, 1]} : vector<4x16xf32> to vector<1x16xf32>
    %cst_153 = arith.constant dense<0.000000e+00> : vector<16xf32>
    %252 = vector.multi_reduction <add>, %145, %cst_153 [0] : vector<8x16xf32> to vector<16xf32>
    %253 = vector.shape_cast %252 : vector<16xf32> to vector<1x16xf32>
    %cst_154 = arith.constant 1.250000e-01 : f32
    %254 = vector.broadcast %cst_154 : f32 to vector<1x16xf32>
    %255 = arith.mulf %253, %254 : vector<1x16xf32>
    %256 = arith.mulf %145, %145 : vector<8x16xf32>
    %cst_155 = arith.constant dense<0.000000e+00> : vector<16xf32>
    %257 = vector.multi_reduction <add>, %256, %cst_155 [0] : vector<8x16xf32> to vector<16xf32>
    %258 = vector.shape_cast %257 : vector<16xf32> to vector<1x16xf32>
    %cst_156 = arith.constant 1.250000e-01 : f32
    %259 = vector.broadcast %cst_156 : f32 to vector<1x16xf32>
    %260 = arith.mulf %258, %259 : vector<1x16xf32>
    %261 = arith.mulf %255, %255 : vector<1x16xf32>
    %262 = arith.subf %260, %261 : vector<1x16xf32>
    %cst_157 = arith.constant 0.000000e+00 : f32
    %263 = vector.broadcast %cst_157 : f32 to vector<1x16xf32>
    %264 = arith.maximumf %262, %263 : vector<1x16xf32>
    %265 = vector.broadcast %255 : vector<1x16xf32> to vector<8x16xf32>
    %266 = arith.subf %145, %265 : vector<8x16xf32>
    %cst_158 = arith.constant 9.99999974E-6 : f32
    %267 = vector.broadcast %cst_158 : f32 to vector<1x16xf32>
    %268 = arith.addf %264, %267 : vector<1x16xf32>
    %269 = math.rsqrt %268 : vector<1x16xf32>
    %270 = vector.broadcast %269 : vector<1x16xf32> to vector<8x16xf32>
    %271 = arith.mulf %266, %270 : vector<8x16xf32>
    %272 = vector.broadcast %250 : vector<1x16xf32> to vector<8x16xf32>
    %273 = arith.mulf %272, %271 : vector<8x16xf32>
    %274 = vector.broadcast %251 : vector<1x16xf32> to vector<8x16xf32>
    %275 = arith.addf %273, %274 : vector<8x16xf32>
    %276 = arith.truncf %249 : vector<8x16xf32> to vector<8x16xbf16>
    %277 = arith.truncf %275 : vector<8x16xf32> to vector<8x16xbf16>
    %c0_159 = arith.constant 0 : index
    %c0_160 = arith.constant 0 : index
    %c0_161 = arith.constant 0 : index
    %278 = vector.load %arg16[%c0_159, %c0_160, %c0_161] : memref<6x16x16xbf16, #tpu.memory_space<vmem>>, vector<1x16x16xbf16>
    %279 = vector.shape_cast %278 : vector<1x16x16xbf16> to vector<16x16xbf16>
    %cst_162 = arith.constant dense<0.000000e+00> : vector<8x16xf32>
    %280 = tpu.matmul %276, %279, %cst_162 {dimension_numbers = #tpu.dot_dimension_numbers<[1], [0], [0], [1], [0, 0, 1, 1], [], []>} : vector<8x16xbf16>, vector<16x16xbf16>, vector<8x16xf32> -> vector<8x16xf32>
    %c3_163 = arith.constant 3 : index
    %c0_164 = arith.constant 0 : index
    %c0_165 = arith.constant 0 : index
    %281 = vector.load %arg16[%c3_163, %c0_164, %c0_165] : memref<6x16x16xbf16, #tpu.memory_space<vmem>>, vector<1x16x16xbf16>
    %282 = vector.shape_cast %281 : vector<1x16x16xbf16> to vector<16x16xbf16>
    %cst_166 = arith.constant dense<0.000000e+00> : vector<8x16xf32>
    %283 = tpu.matmul %277, %282, %cst_166 {dimension_numbers = #tpu.dot_dimension_numbers<[1], [0], [0], [1], [0, 0, 1, 1], [], []>} : vector<8x16xbf16>, vector<16x16xbf16>, vector<8x16xf32> -> vector<8x16xf32>
    %284 = arith.addf %280, %283 : vector<8x16xf32>
    %c1_167 = arith.constant 1 : index
    %c0_168 = arith.constant 0 : index
    %c0_169 = arith.constant 0 : index
    %285 = vector.load %arg16[%c1_167, %c0_168, %c0_169] : memref<6x16x16xbf16, #tpu.memory_space<vmem>>, vector<1x16x16xbf16>
    %286 = vector.shape_cast %285 : vector<1x16x16xbf16> to vector<16x16xbf16>
    %cst_170 = arith.constant dense<0.000000e+00> : vector<8x16xf32>
    %287 = tpu.matmul %276, %286, %cst_170 {dimension_numbers = #tpu.dot_dimension_numbers<[1], [0], [0], [1], [0, 0, 1, 1], [], []>} : vector<8x16xbf16>, vector<16x16xbf16>, vector<8x16xf32> -> vector<8x16xf32>
    %c4 = arith.constant 4 : index
    %c0_171 = arith.constant 0 : index
    %c0_172 = arith.constant 0 : index
    %288 = vector.load %arg16[%c4, %c0_171, %c0_172] : memref<6x16x16xbf16, #tpu.memory_space<vmem>>, vector<1x16x16xbf16>
    %289 = vector.shape_cast %288 : vector<1x16x16xbf16> to vector<16x16xbf16>
    %cst_173 = arith.constant dense<0.000000e+00> : vector<8x16xf32>
    %290 = tpu.matmul %277, %289, %cst_173 {dimension_numbers = #tpu.dot_dimension_numbers<[1], [0], [0], [1], [0, 0, 1, 1], [], []>} : vector<8x16xbf16>, vector<16x16xbf16>, vector<8x16xf32> -> vector<8x16xf32>
    %291 = arith.addf %287, %290 : vector<8x16xf32>
    %c2_174 = arith.constant 2 : index
    %c0_175 = arith.constant 0 : index
    %c0_176 = arith.constant 0 : index
    %292 = vector.load %arg16[%c2_174, %c0_175, %c0_176] : memref<6x16x16xbf16, #tpu.memory_space<vmem>>, vector<1x16x16xbf16>
    %293 = vector.shape_cast %292 : vector<1x16x16xbf16> to vector<16x16xbf16>
    %cst_177 = arith.constant dense<0.000000e+00> : vector<8x16xf32>
    %294 = tpu.matmul %276, %293, %cst_177 {dimension_numbers = #tpu.dot_dimension_numbers<[1], [0], [0], [1], [0, 0, 1, 1], [], []>} : vector<8x16xbf16>, vector<16x16xbf16>, vector<8x16xf32> -> vector<8x16xf32>
    %c5 = arith.constant 5 : index
    %c0_178 = arith.constant 0 : index
    %c0_179 = arith.constant 0 : index
    %295 = vector.load %arg16[%c5, %c0_178, %c0_179] : memref<6x16x16xbf16, #tpu.memory_space<vmem>>, vector<1x16x16xbf16>
    %296 = vector.shape_cast %295 : vector<1x16x16xbf16> to vector<16x16xbf16>
    %cst_180 = arith.constant dense<0.000000e+00> : vector<8x16xf32>
    %297 = tpu.matmul %277, %296, %cst_180 {dimension_numbers = #tpu.dot_dimension_numbers<[1], [0], [0], [1], [0, 0, 1, 1], [], []>} : vector<8x16xbf16>, vector<16x16xbf16>, vector<8x16xf32> -> vector<8x16xf32>
    %298 = arith.addf %294, %297 : vector<8x16xf32>
    %cst_181 = arith.constant 0.000000e+00 : f32
    %299 = vector.broadcast %cst_181 : f32 to vector<1x16xf32>
    %300 = vector.extract_strided_slice %284 {offsets = [0, 0], sizes = [7, 16], strides = [1, 1]} : vector<8x16xf32> to vector<7x16xf32>
    %301 = tpu.concatenate %299, %300 in 0 : vector<1x16xf32>, vector<7x16xf32> -> vector<8x16xf32>
    %302 = arith.addf %301, %291 : vector<8x16xf32>
    %cst_182 = arith.constant 0.000000e+00 : f32
    %303 = vector.broadcast %cst_182 : f32 to vector<1x16xf32>
    %304 = vector.extract_strided_slice %298 {offsets = [1, 0], sizes = [7, 16], strides = [1, 1]} : vector<8x16xf32> to vector<7x16xf32>
    %305 = tpu.concatenate %304, %303 in 0 : vector<7x16xf32>, vector<1x16xf32> -> vector<8x16xf32>
    %306 = arith.addf %302, %305 : vector<8x16xf32>
    %c0_183 = arith.constant 0 : index
    %c0_184 = arith.constant 0 : index
    %307 = vector.load %arg17[%c0_183, %c0_184] : memref<1x16xf32, #tpu.memory_space<vmem>>, vector<1x16xf32>
    %308 = vector.broadcast %307 : vector<1x16xf32> to vector<8x16xf32>
    %309 = arith.addf %306, %308 : vector<8x16xf32>
    %cst_185 = arith.constant 0.000000e+00 : f32
    %310 = vector.broadcast %cst_185 : f32 to vector<8x16xf32>
    %311 = arith.cmpf ogt, %309, %310 : vector<8x16xf32>
    %cst_186 = arith.constant 2.000000e-01 : f32
    %312 = vector.broadcast %cst_186 : f32 to vector<8x16xf32>
    %313 = arith.mulf %312, %309 : vector<8x16xf32>
    %314 = arith.select %311, %309, %313 : vector<8x16xi1>, vector<8x16xf32>
    %315 = arith.truncf %314 : vector<8x16xf32> to vector<8x16xbf16>
    %c0_187 = arith.constant 0 : index
    %c0_188 = arith.constant 0 : index
    %c0_189 = arith.constant 0 : index
    %316 = vector.load %arg18[%c0_187, %c0_188, %c0_189] : memref<4x16x8xbf16, #tpu.memory_space<vmem>>, vector<1x16x8xbf16>
    %317 = vector.shape_cast %316 : vector<1x16x8xbf16> to vector<16x8xbf16>
    %cst_190 = arith.constant dense<0.000000e+00> : vector<8x8xf32>
    %318 = tpu.matmul %315, %317, %cst_190 {dimension_numbers = #tpu.dot_dimension_numbers<[1], [0], [0], [1], [0, 0, 1, 1], [], []>} : vector<8x16xbf16>, vector<16x8xbf16>, vector<8x8xf32> -> vector<8x8xf32>
    %c1_191 = arith.constant 1 : index
    %c0_192 = arith.constant 0 : index
    %c0_193 = arith.constant 0 : index
    %319 = vector.load %arg18[%c1_191, %c0_192, %c0_193] : memref<4x16x8xbf16, #tpu.memory_space<vmem>>, vector<1x16x8xbf16>
    %320 = vector.shape_cast %319 : vector<1x16x8xbf16> to vector<16x8xbf16>
    %cst_194 = arith.constant dense<0.000000e+00> : vector<8x8xf32>
    %321 = tpu.matmul %315, %320, %cst_194 {dimension_numbers = #tpu.dot_dimension_numbers<[1], [0], [0], [1], [0, 0, 1, 1], [], []>} : vector<8x16xbf16>, vector<16x8xbf16>, vector<8x8xf32> -> vector<8x8xf32>
    %c2_195 = arith.constant 2 : index
    %c0_196 = arith.constant 0 : index
    %c0_197 = arith.constant 0 : index
    %322 = vector.load %arg18[%c2_195, %c0_196, %c0_197] : memref<4x16x8xbf16, #tpu.memory_space<vmem>>, vector<1x16x8xbf16>
    %323 = vector.shape_cast %322 : vector<1x16x8xbf16> to vector<16x8xbf16>
    %cst_198 = arith.constant dense<0.000000e+00> : vector<8x8xf32>
    %324 = tpu.matmul %315, %323, %cst_198 {dimension_numbers = #tpu.dot_dimension_numbers<[1], [0], [0], [1], [0, 0, 1, 1], [], []>} : vector<8x16xbf16>, vector<16x8xbf16>, vector<8x8xf32> -> vector<8x8xf32>
    %c3_199 = arith.constant 3 : index
    %c0_200 = arith.constant 0 : index
    %c0_201 = arith.constant 0 : index
    %325 = vector.load %arg18[%c3_199, %c0_200, %c0_201] : memref<4x16x8xbf16, #tpu.memory_space<vmem>>, vector<1x16x8xbf16>
    %326 = vector.shape_cast %325 : vector<1x16x8xbf16> to vector<16x8xbf16>
    %cst_202 = arith.constant dense<0.000000e+00> : vector<8x8xf32>
    %327 = tpu.matmul %315, %326, %cst_202 {dimension_numbers = #tpu.dot_dimension_numbers<[1], [0], [0], [1], [0, 0, 1, 1], [], []>} : vector<8x16xbf16>, vector<16x8xbf16>, vector<8x8xf32> -> vector<8x8xf32>
    %cst_203 = arith.constant 0.000000e+00 : f32
    %328 = vector.broadcast %cst_203 : f32 to vector<1x8xf32>
    %329 = vector.extract_strided_slice %318 {offsets = [0, 0], sizes = [7, 8], strides = [1, 1]} : vector<8x8xf32> to vector<7x8xf32>
    %330 = tpu.concatenate %328, %329 in 0 : vector<1x8xf32>, vector<7x8xf32> -> vector<8x8xf32>
    %331 = arith.addf %330, %321 : vector<8x8xf32>
    %cst_204 = arith.constant 0.000000e+00 : f32
    %332 = vector.broadcast %cst_204 : f32 to vector<1x8xf32>
    %333 = vector.extract_strided_slice %327 {offsets = [1, 0], sizes = [7, 8], strides = [1, 1]} : vector<8x8xf32> to vector<7x8xf32>
    %334 = tpu.concatenate %333, %332 in 0 : vector<7x8xf32>, vector<1x8xf32> -> vector<8x8xf32>
    %335 = arith.addf %324, %334 : vector<8x8xf32>
    %c0_205 = arith.constant 0 : index
    %c0_206 = arith.constant 0 : index
    %336 = vector.load %arg19[%c0_205, %c0_206] : memref<1x8xf32, #tpu.memory_space<vmem>>, vector<1x8xf32>
    %337 = vector.broadcast %336 : vector<1x8xf32> to vector<8x8xf32>
    %338 = arith.addf %331, %337 : vector<8x8xf32>
    %cst_207 = arith.constant 0.000000e+00 : f32
    %339 = vector.broadcast %cst_207 : f32 to vector<8x8xf32>
    %340 = arith.cmpf ogt, %338, %339 : vector<8x8xf32>
    %cst_208 = arith.constant 2.000000e-01 : f32
    %341 = vector.broadcast %cst_208 : f32 to vector<8x8xf32>
    %342 = arith.mulf %341, %338 : vector<8x8xf32>
    %343 = arith.select %340, %338, %342 : vector<8x8xi1>, vector<8x8xf32>
    %c0_209 = arith.constant 0 : index
    %c0_210 = arith.constant 0 : index
    %344 = vector.load %arg19[%c0_209, %c0_210] : memref<1x8xf32, #tpu.memory_space<vmem>>, vector<1x8xf32>
    %345 = vector.broadcast %344 : vector<1x8xf32> to vector<8x8xf32>
    %346 = arith.addf %335, %345 : vector<8x8xf32>
    %cst_211 = arith.constant 0.000000e+00 : f32
    %347 = vector.broadcast %cst_211 : f32 to vector<8x8xf32>
    %348 = arith.cmpf ogt, %346, %347 : vector<8x8xf32>
    %cst_212 = arith.constant 2.000000e-01 : f32
    %349 = vector.broadcast %cst_212 : f32 to vector<8x8xf32>
    %350 = arith.mulf %349, %346 : vector<8x8xf32>
    %351 = arith.select %348, %346, %350 : vector<8x8xi1>, vector<8x8xf32>
    %c0_213 = arith.constant 0 : index
    %c0_214 = arith.constant 0 : index
    %352 = tpu.strided_load %arg29[%c0_213, %c0_214] {strides = array<i32: 2, 1>} : memref<16x8xf32, #tpu.memory_space<vmem>>, vector<8x8xf32>
    tpu.strided_store %arg29[%c0_213, %c0_214], %343 {strides = array<i32: 2, 1>} : memref<16x8xf32, #tpu.memory_space<vmem>>, vector<8x8xf32>
    %c1_215 = arith.constant 1 : index
    %c0_216 = arith.constant 0 : index
    %353 = tpu.strided_load %arg29[%c1_215, %c0_216] {strides = array<i32: 2, 1>} : memref<16x8xf32, #tpu.memory_space<vmem>>, vector<8x8xf32>
    tpu.strided_store %arg29[%c1_215, %c0_216], %351 {strides = array<i32: 2, 1>} : memref<16x8xf32, #tpu.memory_space<vmem>>, vector<8x8xf32>
    %c0_217 = arith.constant 0 : index
    %c0_218 = arith.constant 0 : index
    %354 = vector.load %arg29[%c0_217, %c0_218] : memref<16x8xf32, #tpu.memory_space<vmem>>, vector<16x8xf32>
    %c0_219 = arith.constant 0 : index
    %c0_220 = arith.constant 0 : index
    %c0_221 = arith.constant 0 : index
    %355 = vector.load %arg20[%c0_219, %c0_220, %c0_221] : memref<1x4x8xf32, #tpu.memory_space<vmem>>, vector<1x4x8xf32>
    %356 = vector.shape_cast %355 : vector<1x4x8xf32> to vector<4x8xf32>
    %357 = vector.extract_strided_slice %356 {offsets = [0, 0], sizes = [1, 8], strides = [1, 1]} : vector<4x8xf32> to vector<1x8xf32>
    %358 = vector.extract_strided_slice %356 {offsets = [1, 0], sizes = [1, 8], strides = [1, 1]} : vector<4x8xf32> to vector<1x8xf32>
    %cst_222 = arith.constant dense<0.000000e+00> : vector<8xf32>
    %359 = vector.multi_reduction <add>, %354, %cst_222 [0] : vector<16x8xf32> to vector<8xf32>
    %360 = vector.shape_cast %359 : vector<8xf32> to vector<1x8xf32>
    %cst_223 = arith.constant 6.250000e-02 : f32
    %361 = vector.broadcast %cst_223 : f32 to vector<1x8xf32>
    %362 = arith.mulf %360, %361 : vector<1x8xf32>
    %363 = arith.mulf %354, %354 : vector<16x8xf32>
    %cst_224 = arith.constant dense<0.000000e+00> : vector<8xf32>
    %364 = vector.multi_reduction <add>, %363, %cst_224 [0] : vector<16x8xf32> to vector<8xf32>
    %365 = vector.shape_cast %364 : vector<8xf32> to vector<1x8xf32>
    %cst_225 = arith.constant 6.250000e-02 : f32
    %366 = vector.broadcast %cst_225 : f32 to vector<1x8xf32>
    %367 = arith.mulf %365, %366 : vector<1x8xf32>
    %368 = arith.mulf %362, %362 : vector<1x8xf32>
    %369 = arith.subf %367, %368 : vector<1x8xf32>
    %cst_226 = arith.constant 0.000000e+00 : f32
    %370 = vector.broadcast %cst_226 : f32 to vector<1x8xf32>
    %371 = arith.maximumf %369, %370 : vector<1x8xf32>
    %372 = vector.broadcast %362 : vector<1x8xf32> to vector<16x8xf32>
    %373 = arith.subf %354, %372 : vector<16x8xf32>
    %cst_227 = arith.constant 9.99999974E-6 : f32
    %374 = vector.broadcast %cst_227 : f32 to vector<1x8xf32>
    %375 = arith.addf %371, %374 : vector<1x8xf32>
    %376 = math.rsqrt %375 : vector<1x8xf32>
    %377 = vector.broadcast %376 : vector<1x8xf32> to vector<16x8xf32>
    %378 = arith.mulf %373, %377 : vector<16x8xf32>
    %379 = vector.broadcast %357 : vector<1x8xf32> to vector<16x8xf32>
    %380 = arith.mulf %379, %378 : vector<16x8xf32>
    %381 = vector.broadcast %358 : vector<1x8xf32> to vector<16x8xf32>
    %382 = arith.addf %380, %381 : vector<16x8xf32>
    %383 = vector.extract_strided_slice %356 {offsets = [2, 0], sizes = [1, 8], strides = [1, 1]} : vector<4x8xf32> to vector<1x8xf32>
    %384 = vector.extract_strided_slice %356 {offsets = [3, 0], sizes = [1, 8], strides = [1, 1]} : vector<4x8xf32> to vector<1x8xf32>
    %cst_228 = arith.constant dense<0.000000e+00> : vector<8xf32>
    %385 = vector.multi_reduction <add>, %55, %cst_228 [0] : vector<16x8xf32> to vector<8xf32>
    %386 = vector.shape_cast %385 : vector<8xf32> to vector<1x8xf32>
    %cst_229 = arith.constant 6.250000e-02 : f32
    %387 = vector.broadcast %cst_229 : f32 to vector<1x8xf32>
    %388 = arith.mulf %386, %387 : vector<1x8xf32>
    %389 = arith.mulf %55, %55 : vector<16x8xf32>
    %cst_230 = arith.constant dense<0.000000e+00> : vector<8xf32>
    %390 = vector.multi_reduction <add>, %389, %cst_230 [0] : vector<16x8xf32> to vector<8xf32>
    %391 = vector.shape_cast %390 : vector<8xf32> to vector<1x8xf32>
    %cst_231 = arith.constant 6.250000e-02 : f32
    %392 = vector.broadcast %cst_231 : f32 to vector<1x8xf32>
    %393 = arith.mulf %391, %392 : vector<1x8xf32>
    %394 = arith.mulf %388, %388 : vector<1x8xf32>
    %395 = arith.subf %393, %394 : vector<1x8xf32>
    %cst_232 = arith.constant 0.000000e+00 : f32
    %396 = vector.broadcast %cst_232 : f32 to vector<1x8xf32>
    %397 = arith.maximumf %395, %396 : vector<1x8xf32>
    %398 = vector.broadcast %388 : vector<1x8xf32> to vector<16x8xf32>
    %399 = arith.subf %55, %398 : vector<16x8xf32>
    %cst_233 = arith.constant 9.99999974E-6 : f32
    %400 = vector.broadcast %cst_233 : f32 to vector<1x8xf32>
    %401 = arith.addf %397, %400 : vector<1x8xf32>
    %402 = math.rsqrt %401 : vector<1x8xf32>
    %403 = vector.broadcast %402 : vector<1x8xf32> to vector<16x8xf32>
    %404 = arith.mulf %399, %403 : vector<16x8xf32>
    %405 = vector.broadcast %383 : vector<1x8xf32> to vector<16x8xf32>
    %406 = arith.mulf %405, %404 : vector<16x8xf32>
    %407 = vector.broadcast %384 : vector<1x8xf32> to vector<16x8xf32>
    %408 = arith.addf %406, %407 : vector<16x8xf32>
    %409 = arith.truncf %382 : vector<16x8xf32> to vector<16x8xbf16>
    %410 = arith.truncf %408 : vector<16x8xf32> to vector<16x8xbf16>
    %c0_234 = arith.constant 0 : index
    %c0_235 = arith.constant 0 : index
    %c0_236 = arith.constant 0 : index
    %411 = vector.load %arg21[%c0_234, %c0_235, %c0_236] : memref<6x8x8xbf16, #tpu.memory_space<vmem>>, vector<1x8x8xbf16>
    %412 = vector.shape_cast %411 : vector<1x8x8xbf16> to vector<8x8xbf16>
    %cst_237 = arith.constant dense<0.000000e+00> : vector<16x8xf32>
    %413 = tpu.matmul %409, %412, %cst_237 {dimension_numbers = #tpu.dot_dimension_numbers<[1], [0], [0], [1], [0, 0, 1, 1], [], []>} : vector<16x8xbf16>, vector<8x8xbf16>, vector<16x8xf32> -> vector<16x8xf32>
    %c3_238 = arith.constant 3 : index
    %c0_239 = arith.constant 0 : index
    %c0_240 = arith.constant 0 : index
    %414 = vector.load %arg21[%c3_238, %c0_239, %c0_240] : memref<6x8x8xbf16, #tpu.memory_space<vmem>>, vector<1x8x8xbf16>
    %415 = vector.shape_cast %414 : vector<1x8x8xbf16> to vector<8x8xbf16>
    %cst_241 = arith.constant dense<0.000000e+00> : vector<16x8xf32>
    %416 = tpu.matmul %410, %415, %cst_241 {dimension_numbers = #tpu.dot_dimension_numbers<[1], [0], [0], [1], [0, 0, 1, 1], [], []>} : vector<16x8xbf16>, vector<8x8xbf16>, vector<16x8xf32> -> vector<16x8xf32>
    %417 = arith.addf %413, %416 : vector<16x8xf32>
    %c1_242 = arith.constant 1 : index
    %c0_243 = arith.constant 0 : index
    %c0_244 = arith.constant 0 : index
    %418 = vector.load %arg21[%c1_242, %c0_243, %c0_244] : memref<6x8x8xbf16, #tpu.memory_space<vmem>>, vector<1x8x8xbf16>
    %419 = vector.shape_cast %418 : vector<1x8x8xbf16> to vector<8x8xbf16>
    %cst_245 = arith.constant dense<0.000000e+00> : vector<16x8xf32>
    %420 = tpu.matmul %409, %419, %cst_245 {dimension_numbers = #tpu.dot_dimension_numbers<[1], [0], [0], [1], [0, 0, 1, 1], [], []>} : vector<16x8xbf16>, vector<8x8xbf16>, vector<16x8xf32> -> vector<16x8xf32>
    %c4_246 = arith.constant 4 : index
    %c0_247 = arith.constant 0 : index
    %c0_248 = arith.constant 0 : index
    %421 = vector.load %arg21[%c4_246, %c0_247, %c0_248] : memref<6x8x8xbf16, #tpu.memory_space<vmem>>, vector<1x8x8xbf16>
    %422 = vector.shape_cast %421 : vector<1x8x8xbf16> to vector<8x8xbf16>
    %cst_249 = arith.constant dense<0.000000e+00> : vector<16x8xf32>
    %423 = tpu.matmul %410, %422, %cst_249 {dimension_numbers = #tpu.dot_dimension_numbers<[1], [0], [0], [1], [0, 0, 1, 1], [], []>} : vector<16x8xbf16>, vector<8x8xbf16>, vector<16x8xf32> -> vector<16x8xf32>
    %424 = arith.addf %420, %423 : vector<16x8xf32>
    %c2_250 = arith.constant 2 : index
    %c0_251 = arith.constant 0 : index
    %c0_252 = arith.constant 0 : index
    %425 = vector.load %arg21[%c2_250, %c0_251, %c0_252] : memref<6x8x8xbf16, #tpu.memory_space<vmem>>, vector<1x8x8xbf16>
    %426 = vector.shape_cast %425 : vector<1x8x8xbf16> to vector<8x8xbf16>
    %cst_253 = arith.constant dense<0.000000e+00> : vector<16x8xf32>
    %427 = tpu.matmul %409, %426, %cst_253 {dimension_numbers = #tpu.dot_dimension_numbers<[1], [0], [0], [1], [0, 0, 1, 1], [], []>} : vector<16x8xbf16>, vector<8x8xbf16>, vector<16x8xf32> -> vector<16x8xf32>
    %c5_254 = arith.constant 5 : index
    %c0_255 = arith.constant 0 : index
    %c0_256 = arith.constant 0 : index
    %428 = vector.load %arg21[%c5_254, %c0_255, %c0_256] : memref<6x8x8xbf16, #tpu.memory_space<vmem>>, vector<1x8x8xbf16>
    %429 = vector.shape_cast %428 : vector<1x8x8xbf16> to vector<8x8xbf16>
    %cst_257 = arith.constant dense<0.000000e+00> : vector<16x8xf32>
    %430 = tpu.matmul %410, %429, %cst_257 {dimension_numbers = #tpu.dot_dimension_numbers<[1], [0], [0], [1], [0, 0, 1, 1], [], []>} : vector<16x8xbf16>, vector<8x8xbf16>, vector<16x8xf32> -> vector<16x8xf32>
    %431 = arith.addf %427, %430 : vector<16x8xf32>
    %cst_258 = arith.constant 0.000000e+00 : f32
    %432 = vector.broadcast %cst_258 : f32 to vector<1x8xf32>
    %433 = vector.extract_strided_slice %417 {offsets = [0, 0], sizes = [15, 8], strides = [1, 1]} : vector<16x8xf32> to vector<15x8xf32>
    %434 = tpu.concatenate %432, %433 in 0 : vector<1x8xf32>, vector<15x8xf32> -> vector<16x8xf32>
    %435 = arith.addf %434, %424 : vector<16x8xf32>
    %cst_259 = arith.constant 0.000000e+00 : f32
    %436 = vector.broadcast %cst_259 : f32 to vector<1x8xf32>
    %437 = vector.extract_strided_slice %431 {offsets = [1, 0], sizes = [15, 8], strides = [1, 1]} : vector<16x8xf32> to vector<15x8xf32>
    %438 = tpu.concatenate %437, %436 in 0 : vector<15x8xf32>, vector<1x8xf32> -> vector<16x8xf32>
    %439 = arith.addf %435, %438 : vector<16x8xf32>
    %c0_260 = arith.constant 0 : index
    %c0_261 = arith.constant 0 : index
    %440 = vector.load %arg22[%c0_260, %c0_261] : memref<1x8xf32, #tpu.memory_space<vmem>>, vector<1x8xf32>
    %441 = vector.broadcast %440 : vector<1x8xf32> to vector<16x8xf32>
    %442 = arith.addf %439, %441 : vector<16x8xf32>
    %cst_262 = arith.constant 0.000000e+00 : f32
    %443 = vector.broadcast %cst_262 : f32 to vector<16x8xf32>
    %444 = arith.cmpf ogt, %442, %443 : vector<16x8xf32>
    %cst_263 = arith.constant 2.000000e-01 : f32
    %445 = vector.broadcast %cst_263 : f32 to vector<16x8xf32>
    %446 = arith.mulf %445, %442 : vector<16x8xf32>
    %447 = arith.select %444, %442, %446 : vector<16x8xi1>, vector<16x8xf32>
    %448 = arith.truncf %447 : vector<16x8xf32> to vector<16x8xbf16>
    %c0_264 = arith.constant 0 : index
    %c0_265 = arith.constant 0 : index
    %c0_266 = arith.constant 0 : index
    %449 = vector.load %arg23[%c0_264, %c0_265, %c0_266] : memref<3x8x4xbf16, #tpu.memory_space<vmem>>, vector<1x8x4xbf16>
    %450 = vector.shape_cast %449 : vector<1x8x4xbf16> to vector<8x4xbf16>
    %cst_267 = arith.constant dense<0.000000e+00> : vector<16x4xf32>
    %451 = tpu.matmul %448, %450, %cst_267 {dimension_numbers = #tpu.dot_dimension_numbers<[1], [0], [0], [1], [0, 0, 1, 1], [], []>} : vector<16x8xbf16>, vector<8x4xbf16>, vector<16x4xf32> -> vector<16x4xf32>
    %c1_268 = arith.constant 1 : index
    %c0_269 = arith.constant 0 : index
    %c0_270 = arith.constant 0 : index
    %452 = vector.load %arg23[%c1_268, %c0_269, %c0_270] : memref<3x8x4xbf16, #tpu.memory_space<vmem>>, vector<1x8x4xbf16>
    %453 = vector.shape_cast %452 : vector<1x8x4xbf16> to vector<8x4xbf16>
    %cst_271 = arith.constant dense<0.000000e+00> : vector<16x4xf32>
    %454 = tpu.matmul %448, %453, %cst_271 {dimension_numbers = #tpu.dot_dimension_numbers<[1], [0], [0], [1], [0, 0, 1, 1], [], []>} : vector<16x8xbf16>, vector<8x4xbf16>, vector<16x4xf32> -> vector<16x4xf32>
    %c2_272 = arith.constant 2 : index
    %c0_273 = arith.constant 0 : index
    %c0_274 = arith.constant 0 : index
    %455 = vector.load %arg23[%c2_272, %c0_273, %c0_274] : memref<3x8x4xbf16, #tpu.memory_space<vmem>>, vector<1x8x4xbf16>
    %456 = vector.shape_cast %455 : vector<1x8x4xbf16> to vector<8x4xbf16>
    %cst_275 = arith.constant dense<0.000000e+00> : vector<16x4xf32>
    %457 = tpu.matmul %448, %456, %cst_275 {dimension_numbers = #tpu.dot_dimension_numbers<[1], [0], [0], [1], [0, 0, 1, 1], [], []>} : vector<16x8xbf16>, vector<8x4xbf16>, vector<16x4xf32> -> vector<16x4xf32>
    %cst_276 = arith.constant 0.000000e+00 : f32
    %458 = vector.broadcast %cst_276 : f32 to vector<1x4xf32>
    %459 = vector.extract_strided_slice %451 {offsets = [0, 0], sizes = [15, 4], strides = [1, 1]} : vector<16x4xf32> to vector<15x4xf32>
    %460 = tpu.concatenate %458, %459 in 0 : vector<1x4xf32>, vector<15x4xf32> -> vector<16x4xf32>
    %461 = arith.addf %460, %454 : vector<16x4xf32>
    %cst_277 = arith.constant 0.000000e+00 : f32
    %462 = vector.broadcast %cst_277 : f32 to vector<1x4xf32>
    %463 = vector.extract_strided_slice %457 {offsets = [1, 0], sizes = [15, 4], strides = [1, 1]} : vector<16x4xf32> to vector<15x4xf32>
    %464 = tpu.concatenate %463, %462 in 0 : vector<15x4xf32>, vector<1x4xf32> -> vector<16x4xf32>
    %465 = arith.addf %461, %464 : vector<16x4xf32>
    %c0_278 = arith.constant 0 : index
    %c0_279 = arith.constant 0 : index
    %466 = vector.load %arg24[%c0_278, %c0_279] : memref<1x4xf32, #tpu.memory_space<vmem>>, vector<1x4xf32>
    %467 = vector.broadcast %466 : vector<1x4xf32> to vector<16x4xf32>
    %468 = arith.addf %465, %467 : vector<16x4xf32>
    %469 = arith.negf %468 : vector<16x4xf32>
    %470 = math.exp %469 : vector<16x4xf32>
    %cst_280 = arith.constant 1.000000e+00 : f32
    %471 = vector.broadcast %cst_280 : f32 to vector<16x4xf32>
    %472 = arith.addf %471, %470 : vector<16x4xf32>
    %473 = arith.divf %471, %472 : vector<16x4xf32>
    %c0_281 = arith.constant 0 : index
    %c0_282 = arith.constant 0 : index
    %c0_283 = arith.constant 0 : index
    %474 = vector.load %arg25[%c0_281, %c0_282, %c0_283] : memref<1x16x4xf32, #tpu.memory_space<vmem>>, vector<1x16x4xf32>
    %475 = vector.shape_cast %474 : vector<1x16x4xf32> to vector<16x4xf32>
    %476 = vector.shape_cast %473 : vector<16x4xf32> to vector<1x16x4xf32>
    tpu.vector_store %arg25[%c0_281, %c0_282, %c0_283], %476 {strides = array<i32>} : memref<1x16x4xf32, #tpu.memory_space<vmem>>, vector<1x16x4xf32>,
    return
  }
  func.func @transform_0(%arg0: i32, %arg1: memref<2xi32, #tpu.memory_space<smem>>) -> (i32, i32, i32) {
    %c0_i32 = arith.constant 0 : i32
    %c0_i32_0 = arith.constant 0 : i32
    %c0_i32_1 = arith.constant 0 : i32
    return %arg0, %c0_i32, %c0_i32_0 : i32, i32, i32
  }
  func.func @transform_1(%arg0: i32, %arg1: memref<2xi32, #tpu.memory_space<smem>>) -> (i32, i32, i32) {
    %0 = arith.index_cast %arg0 : i32 to index
    %1 = memref.load %arg1[%0] : memref<2xi32, #tpu.memory_space<smem>>
    %c0_i32 = arith.constant 0 : i32
    %c0_i32_0 = arith.constant 0 : i32
    %c0_i32_1 = arith.constant 0 : i32
    return %1, %c0_i32, %c0_i32_0 : i32, i32, i32
  }
  func.func @transform_2(%arg0: i32, %arg1: memref<2xi32, #tpu.memory_space<smem>>) -> (i32, i32, i32) {
    %c0_i32 = arith.constant 0 : i32
    %c0_i32_0 = arith.constant 0 : i32
    %c0_i32_1 = arith.constant 0 : i32
    %c0_i32_2 = arith.constant 0 : i32
    return %c0_i32, %c0_i32_0, %c0_i32_1 : i32, i32, i32
  }
  func.func @transform_3(%arg0: i32, %arg1: memref<2xi32, #tpu.memory_space<smem>>) -> (i32, i32) {
    %c0_i32 = arith.constant 0 : i32
    %c0_i32_0 = arith.constant 0 : i32
    %c0_i32_1 = arith.constant 0 : i32
    return %c0_i32, %c0_i32_0 : i32, i32
  }
  func.func @transform_4(%arg0: i32, %arg1: memref<2xi32, #tpu.memory_space<smem>>) -> (i32, i32, i32) {
    %c0_i32 = arith.constant 0 : i32
    %c0_i32_0 = arith.constant 0 : i32
    %c0_i32_1 = arith.constant 0 : i32
    %c0_i32_2 = arith.constant 0 : i32
    return %c0_i32, %c0_i32_0, %c0_i32_1 : i32, i32, i32
  }
  func.func @transform_5(%arg0: i32, %arg1: memref<2xi32, #tpu.memory_space<smem>>) -> (i32, i32) {
    %c0_i32 = arith.constant 0 : i32
    %c0_i32_0 = arith.constant 0 : i32
    %c0_i32_1 = arith.constant 0 : i32
    return %c0_i32, %c0_i32_0 : i32, i32
  }
  func.func @transform_6(%arg0: i32, %arg1: memref<2xi32, #tpu.memory_space<smem>>) -> (i32, i32, i32) {
    %0 = arith.index_cast %arg0 : i32 to index
    %1 = memref.load %arg1[%0] : memref<2xi32, #tpu.memory_space<smem>>
    %c0_i32 = arith.constant 0 : i32
    %c0_i32_0 = arith.constant 0 : i32
    %c0_i32_1 = arith.constant 0 : i32
    return %1, %c0_i32, %c0_i32_0 : i32, i32, i32
  }
  func.func @transform_7(%arg0: i32, %arg1: memref<2xi32, #tpu.memory_space<smem>>) -> (i32, i32, i32) {
    %c0_i32 = arith.constant 0 : i32
    %c0_i32_0 = arith.constant 0 : i32
    %c0_i32_1 = arith.constant 0 : i32
    %c0_i32_2 = arith.constant 0 : i32
    return %c0_i32, %c0_i32_0, %c0_i32_1 : i32, i32, i32
  }
  func.func @transform_8(%arg0: i32, %arg1: memref<2xi32, #tpu.memory_space<smem>>) -> (i32, i32) {
    %c0_i32 = arith.constant 0 : i32
    %c0_i32_0 = arith.constant 0 : i32
    %c0_i32_1 = arith.constant 0 : i32
    return %c0_i32, %c0_i32_0 : i32, i32
  }
  func.func @transform_9(%arg0: i32, %arg1: memref<2xi32, #tpu.memory_space<smem>>) -> (i32, i32, i32) {
    %c0_i32 = arith.constant 0 : i32
    %c0_i32_0 = arith.constant 0 : i32
    %c0_i32_1 = arith.constant 0 : i32
    %c0_i32_2 = arith.constant 0 : i32
    return %c0_i32, %c0_i32_0, %c0_i32_1 : i32, i32, i32
  }
  func.func @transform_10(%arg0: i32, %arg1: memref<2xi32, #tpu.memory_space<smem>>) -> (i32, i32) {
    %c0_i32 = arith.constant 0 : i32
    %c0_i32_0 = arith.constant 0 : i32
    %c0_i32_1 = arith.constant 0 : i32
    return %c0_i32, %c0_i32_0 : i32, i32
  }
  func.func @transform_11(%arg0: i32, %arg1: memref<2xi32, #tpu.memory_space<smem>>) -> (i32, i32, i32) {
    %c0_i32 = arith.constant 0 : i32
    %c0_i32_0 = arith.constant 0 : i32
    %c0_i32_1 = arith.constant 0 : i32
    %c0_i32_2 = arith.constant 0 : i32
    return %c0_i32, %c0_i32_0, %c0_i32_1 : i32, i32, i32
  }
  func.func @transform_12(%arg0: i32, %arg1: memref<2xi32, #tpu.memory_space<smem>>) -> (i32, i32) {
    %c0_i32 = arith.constant 0 : i32
    %c0_i32_0 = arith.constant 0 : i32
    %c0_i32_1 = arith.constant 0 : i32
    return %c0_i32, %c0_i32_0 : i32, i32
  }
  func.func @transform_13(%arg0: i32, %arg1: memref<2xi32, #tpu.memory_space<smem>>) -> (i32, i32, i32) {
    %0 = arith.index_cast %arg0 : i32 to index
    %1 = memref.load %arg1[%0] : memref<2xi32, #tpu.memory_space<smem>>
    %c0_i32 = arith.constant 0 : i32
    %c0_i32_0 = arith.constant 0 : i32
    %c0_i32_1 = arith.constant 0 : i32
    return %1, %c0_i32, %c0_i32_0 : i32, i32, i32
  }
  func.func @transform_14(%arg0: i32, %arg1: memref<2xi32, #tpu.memory_space<smem>>) -> (i32, i32, i32) {
    %c0_i32 = arith.constant 0 : i32
    %c0_i32_0 = arith.constant 0 : i32
    %c0_i32_1 = arith.constant 0 : i32
    %c0_i32_2 = arith.constant 0 : i32
    return %c0_i32, %c0_i32_0, %c0_i32_1 : i32, i32, i32
  }
  func.func @transform_15(%arg0: i32, %arg1: memref<2xi32, #tpu.memory_space<smem>>) -> (i32, i32) {
    %c0_i32 = arith.constant 0 : i32
    %c0_i32_0 = arith.constant 0 : i32
    %c0_i32_1 = arith.constant 0 : i32
    return %c0_i32, %c0_i32_0 : i32, i32
  }
  func.func @transform_16(%arg0: i32, %arg1: memref<2xi32, #tpu.memory_space<smem>>) -> (i32, i32, i32) {
    %c0_i32 = arith.constant 0 : i32
    %c0_i32_0 = arith.constant 0 : i32
    %c0_i32_1 = arith.constant 0 : i32
    %c0_i32_2 = arith.constant 0 : i32
    return %c0_i32, %c0_i32_0, %c0_i32_1 : i32, i32, i32
  }
  func.func @transform_17(%arg0: i32, %arg1: memref<2xi32, #tpu.memory_space<smem>>) -> (i32, i32) {
    %c0_i32 = arith.constant 0 : i32
    %c0_i32_0 = arith.constant 0 : i32
    %c0_i32_1 = arith.constant 0 : i32
    return %c0_i32, %c0_i32_0 : i32, i32
  }
  func.func @transform_18(%arg0: i32, %arg1: memref<2xi32, #tpu.memory_space<smem>>) -> (i32, i32, i32) {
    %0 = arith.index_cast %arg0 : i32 to index
    %1 = memref.load %arg1[%0] : memref<2xi32, #tpu.memory_space<smem>>
    %c0_i32 = arith.constant 0 : i32
    %c0_i32_0 = arith.constant 0 : i32
    %c0_i32_1 = arith.constant 0 : i32
    return %1, %c0_i32, %c0_i32_0 : i32, i32, i32
  }
  func.func @transform_19(%arg0: i32, %arg1: memref<2xi32, #tpu.memory_space<smem>>) -> (i32, i32, i32) {
    %c0_i32 = arith.constant 0 : i32
    %c0_i32_0 = arith.constant 0 : i32
    %c0_i32_1 = arith.constant 0 : i32
    %c0_i32_2 = arith.constant 0 : i32
    return %c0_i32, %c0_i32_0, %c0_i32_1 : i32, i32, i32
  }
  func.func @transform_20(%arg0: i32, %arg1: memref<2xi32, #tpu.memory_space<smem>>) -> (i32, i32) {
    %c0_i32 = arith.constant 0 : i32
    %c0_i32_0 = arith.constant 0 : i32
    %c0_i32_1 = arith.constant 0 : i32
    return %c0_i32, %c0_i32_0 : i32, i32
  }
  func.func @transform_21(%arg0: i32, %arg1: memref<2xi32, #tpu.memory_space<smem>>) -> (i32, i32, i32) {
    %c0_i32 = arith.constant 0 : i32
    %c0_i32_0 = arith.constant 0 : i32
    %c0_i32_1 = arith.constant 0 : i32
    %c0_i32_2 = arith.constant 0 : i32
    return %c0_i32, %c0_i32_0, %c0_i32_1 : i32, i32, i32
  }
  func.func @transform_22(%arg0: i32, %arg1: memref<2xi32, #tpu.memory_space<smem>>) -> (i32, i32) {
    %c0_i32 = arith.constant 0 : i32
    %c0_i32_0 = arith.constant 0 : i32
    %c0_i32_1 = arith.constant 0 : i32
    return %c0_i32, %c0_i32_0 : i32, i32
  }
  func.func @transform_23(%arg0: i32, %arg1: memref<2xi32, #tpu.memory_space<smem>>) -> (i32, i32, i32) {
    %c0_i32 = arith.constant 0 : i32
    %c0_i32_0 = arith.constant 0 : i32
    %c0_i32_1 = arith.constant 0 : i32
    return %arg0, %c0_i32, %c0_i32_0 : i32, i32, i32
  }
}

</mosaic_0001>

<bundles_post_ra>
// kernel: _lambda_.1
= control target key start
LH: loop header
LB: loop body
LE: loop exit
PB: predicated region body
PF: predicated region fallthrough
CT: control target
= control target key end

     0   :  { %s3963_s28 = smov [#allocation7]   ;;  %s4848_s0 = inlined_call_operand.hbm [shape: s32[2], index: 0, kind: input, shape index: {}]   ;;  %s4849_s1 = inlined_call_operand.vmem [shape: f32[2,16,4], index: 1, kind: input, shape index: {}]   ;;  %s4850_s2 = inlined_call_operand.hbm [shape: f32[8,2,4], index: 2, kind: input, shape index: {}]   ;;  %s4851_s3 = inlined_call_operand.hbm [shape: bf16[3,4,8], index: 3, kind: input, shape index: {}]   ;;  %s4852_s4 = inlined_call_operand.hbm [shape: f32[1,8], index: 4, kind: input, shape index: {}]   ;;  %s4853_s5 = inlined_call_operand.hbm [shape: bf16[3,8,8], index: 5, kind: input, shape index: {}]   ;;  %s4854_s6 = inlined_call_operand.hbm [shape: f32[1,8], index: 6, kind: input, shape index: {}]   ;;  %s4855_s7 = inlined_call_operand.hbm [shape: f32[8,2,8], index: 7, kind: input, shape index: {}]   ;;  %s4856_s8 = inlined_call_operand.hbm [shape: bf16[3,8,16], index: 8, kind: input, shape index: {}]   ;;  %s4857_s9 = inlined_call_operand.hbm [shape: f32[1,16], index: 9, kind: input, shape index: {}]   ;;  %s4858_s10 = inlined_call_operand.hbm [shape: bf16[3,16,16], index: 10, kind: input, shape index: {}]   ;;  %s4859_s11 = inlined_call_operand.hbm [shape: f32[1,16], index: 11, kind: input, shape index: {}]   ;;  %s4860_s12 = inlined_call_operand.hbm [shape: bf16[4,16,16], index: 12, kind: input, shape index: {}]   ;;  %s4861_s13 = inlined_call_operand.hbm [shape: f32[1,16], index: 13, kind: input, shape index: {}]   ;;  %s4862_s14 = inlined_call_operand.hbm [shape: f32[8,4,16], index: 14, kind: input, shape index: {}]   ;;  %s4863_s15 = inlined_call_operand.vmem [shape: bf16[6,16,16], index: 15, kind: input, shape index: {}]   ;;  %s4864_s16 = inlined_call_operand.hbm [shape: f32[1,16], index: 16, kind: input, shape index: {}]   ;;  %s4865_s17 = inlined_call_operand.hbm [shape: bf16[4,16,8], index: 17, kind: input, shape index: {}]   ;;  %s4866_s18 = inlined_call_operand.hbm [shape: f32[1,8], index: 18, kind: input, shape index: {}]   ;;  %s4867_s19 = inlined_call_operand.hbm [shape: f32[8,4,8], index: 19, kind: input, shape index: {}]   ;;  %s4868_s20 = inlined_call_operand.hbm [shape: bf16[6,8,8], index: 20, kind: input, shape index: {}]   ;;  %s4869_s21 = inlined_call_operand.hbm [shape: f32[1,8], index: 21, kind: input, shape index: {}]   ;;  %s4870_s22 = inlined_call_operand.vmem [shape: bf16[3,8,4], index: 22, kind: input, shape index: {}]   ;;  %s4871_s23 = inlined_call_operand.vmem [shape: f32[1,4], index: 23, kind: input, shape index: {}]   ;;  %s4872_s24 = inlined_call_operand.vmem [shape: f32[2,16,4], index: 24, kind: output, shape index: {}]  }
   0x1   :  { %4899 = sst [smem:[#allocation71_spill]] %s4848_s0 }
   0x2   :  { %4900 = sst [smem:[#allocation72_spill]] %s4849_s1 }
   0x3   :  { %4901 = sst [smem:[#allocation73_spill]] %s4850_s2 }
   0x4   :  { %4902 = sst [smem:[#allocation74_spill]] %s4851_s3 }
   0x5   :  { %4903 = sst [smem:[#allocation75_spill]] %s4852_s4 }
   0x6   :  { %4904 = sst [smem:[#allocation76_spill]] %s4853_s5 }
   0x7   :  { %4905 = sst [smem:[#allocation77_spill]] %s4854_s6 }
   0x8   :  { %4906 = sst [smem:[#allocation78_spill]] %s4855_s7 }
   0x9   :  { %4907 = sst [smem:[#allocation79_spill]] %s4856_s8 }
   0xa   :  { %4908 = sst [smem:[#allocation80_spill]] %s4857_s9 }
   0xb   :  { %4909 = sst [smem:[#allocation81_spill]] %s4858_s10 }
   0xc   :  { %4910 = sst [smem:[#allocation82_spill]] %s4859_s11 }
   0xd   :  { %4911 = sst [smem:[#allocation83_spill]] %s4860_s12 }
   0xe   :  { %4912 = sst [smem:[#allocation84_spill]] %s4861_s13 }
   0xf   :  { %4913 = sst [smem:[#allocation85_spill]] %s4862_s14 }
  0x10   :  { %4914 = sst [smem:[#allocation86_spill]] %s4863_s15 }
  0x11   :  { %4915 = sst [smem:[#allocation87_spill]] %s4864_s16 }
  0x12   :  { %4916 = sst [smem:[#allocation88_spill]] %s4865_s17 }
  0x13   :  { %4917 = sst [smem:[#allocation89_spill]] %s4866_s18 }
  0x14   :  { %4918 = sst [smem:[#allocation90_spill]] %s4867_s19 }
  0x15   :  { %4919 = sst [smem:[#allocation91_spill]] %s4868_s20 }
  0x16   :  { %4920 = sst [smem:[#allocation92_spill]] %s4869_s21 }
  0x17   :  { %4921 = sst [smem:[#allocation93_spill]] %s4870_s22 }
  0x18   :  { %4922 = sst [smem:[#allocation94_spill]] %s4871_s23 }
  0x19   :  { %4923 = sst [smem:[#allocation95_spill]] %s4872_s24 }
  0x1a   :  { %s4924_s27 = sld [smem:[#allocation71_spill]] }
  0x20   :  { %s30_s15 = sshll.u32 %s4924_s27, 4  ;;  %s31_s15 = int_to_ptr.hbm [resolvable:$true] %s30_s15 }
  0x21   :  { %33 = dma.hbm_to_smem %s31_s15, 16, %s3963_s28, [#allocation6] }
  0x22   :  { %3849 = dma.done.wait [#allocation6], 16 }
  0x23   :  { %3850 = vsyncadd [#allocation6], 4294967280 }
  0x24   :  { %36 = sfence }
  0x25   :  { %37 = vsyncpa [#allocation9], 0 }
  0x26   :  { %39 = vsyncpa [#allocation9 + $0x1], 0 }
  0x27   :  { %40 = vsyncpa [#allocation11], 0 }
  0x28   :  { %41 = vsyncpa [#allocation14], 0 }
  0x29   :  { %42 = vsyncpa [#allocation17], 0 }
  0x2a   :  { %44 = vsyncpa [#allocation17 + $0x1], 0 }
  0x2b   :  { %45 = vsyncpa [#allocation20], 0 }
  0x2c   :  { %46 = vsyncpa [#allocation23], 0 }
  0x2d   :  { %47 = vsyncpa [#allocation26], 0  ;;  %s4112_s6 = smov 0   ;;  %s4114_s2 = smov 0  }
  0x2e   :  { %s4116_s29 = smov 0   ;;  %s4118_s0 = smov 0  }
  0x2f   :  { %s4120_s15 = smov 0   ;;  %s4122_s7 = smov 0  }
  0x30   :  { %s4124_s30 = smov 0   ;;  %s4126_s3 = smov 0  }
  0x31   :  { %s4128_s25 = smov 0   ;;  %s4130_s8 = smov 0  }
  0x32   :  { %s4132_s4 = smov 0   ;;  %s4134_s1 = smov 0  }
  0x33   :  { %s4136_s5 = smov 0  }
  0x34 LB: > { %4925 = sst [smem:[#allocation58_spill]] %s3913_s6  ;;  %s4181_s23 = sadd.s32 4294967295, %s3961_s5   ;;  %s3961_s5 = sphi %s4136_s5, %s5048_s5   ;;  %s3957_s1 = sphi %s4134_s1, %s5039_s1   ;;  %s3953_s4 = sphi %s4132_s4, %s5038_s4   ;;  %s3949_s8 = sphi %s4130_s8, %s5047_s8   ;;  %s3945_s25 = sphi %s4128_s25, %s5046_s25   ;;  %s3941_s3 = sphi %s4126_s3, %s5045_s3   ;;  %s3937_s30 = sphi %s4124_s30, %s5035_s30   ;;  %s3933_s7 = sphi %s4122_s7, %s5044_s7   ;;  %s3929_s15 = sphi %s4120_s15, %s5043_s15   ;;  %s3925_s0 = sphi %s4118_s0, %s5042_s0   ;;  %s3921_s29 = sphi %s4116_s29, %s5041_s29   ;;  %s3917_s2 = sphi %s4114_s2, %s5040_s2   ;;  %s3913_s6 = sphi %s4112_s6, %s5031_s6  }
  0x35   : > { %4926 = sst [smem:[#allocation59_spill]] %s3917_s2  ;;  %p2700_p0 = scmp.ge.s32.totalorder %s3961_s5, 1 }
  0x36   : > { %4927 = sst [smem:[#allocation60_spill]] %s3921_s29  ;;  %p4897_p1 = scmp.eq.s32.totalorder %s4181_s23, 0 }
  0x37   : > { %4928 = sst [smem:[#allocation61_spill]] %s3937_s30  ;;  %p600_p2 = scmp.lt.s32.totalorder %s3961_s5, 3 }
  0x38   : > { %4929 = sst [smem:[#allocation62_spill]] %s3941_s3  ;;  %s3964_s19 = smov [#allocation10]  }
  0x39   : > { %4930 = sst [smem:[#allocation63_spill]] %s3945_s25  ;;  %p4186_p3 = pnand %p2700_p0, %p600_p2 }
  0x3a   : > { %4931 = sst [smem:[#allocation64_spill]] %s3953_s4  ;;  %s613_s6 = sshll.u32 %s3964_s19, 4  ;;  %s614_s6 = int_to_ptr.vmem [resolvable:$true] %s613_s6 }
  0x3b   : > { %4932 = sst [smem:[#allocation65_spill]] %s3957_s1  ;;  %p2963_p4 = pneg %p4186_p3 }
  0x3c   : > { %s4933_s28 = sld [smem:[#allocation74_spill]]  ;;  %s3965_s21 = smov [#allocation13]  }
  0x3d   : > { %s4934_s22 = scalar_select %p4186_p3, 1, 0 }
  0x3e   : > { %p4197_p5 = pnand %p2963_p4, %p4897_p1  ;;  %s639_s30 = sshll.u32 %s3965_s21, 4  ;;  %s640_s30 = int_to_ptr.vmem [resolvable:$true] %s639_s30 }
  0x3f   : > { %4935 = sst [smem:[#allocation66_spill]] %s4934_s22  ;;  %s3966_s25 = smov 32  }
  0x40   : > { %s3967_s19 = smov 2   ;;  %s4884_s22 = smov 64  }
  0x41   : > { %s4886_s26 = smov 4   ;;  %s4938_s3 = sld [smem:[#allocation75_spill]] }
  0x42   : > { %s611_s24 = sshll.u32 %s4933_s28, 4  ;;  %s4936_s28 = sld [smem:[#allocation76_spill]]  ;;  %s612_s24 = int_to_ptr.hbm [resolvable:$true] %s611_s24 }
  0x43   : > { %2966 = dma.hbm_to_vmem [thread:$0]  (!%p4197_p5), %s612_s24, 96, %s614_s6, [#allocation11], %s3966_s25, %s3966_s25, %s3967_s19  }
  0x44   : > { %s3970_s21 = smov [#allocation12]   ;;  %s4939_s25 = sld [smem:[#allocation77_spill]] }
  0x45   : > { %s628_s14 = sshll.u32 %s3970_s21, 4  ;;  %s4227_s24 = sadd.s32 1, %s3961_s5   ;;  %s629_s14 = int_to_ptr.vmem [resolvable:$true] %s628_s14 }
  0x46   : > { %s83_s6 = sld [smem:[#allocation7 + %s3961_s5]]  ;;  %p95_p6 = scmp.ne.s32.totalorder %s3957_s1, %s3953_s4 }
  0x47   : > { %s626_s20 = sshll.u32 %s4938_s3, 4  ;;  %p4896_p7 = scmp.eq.s32.totalorder %s3961_s5, 0  ;;  %s627_s20 = int_to_ptr.hbm [resolvable:$true] %s626_s20 }
  0x48   : > { %s637_s29 = sshll.u32 %s4936_s28, 4  ;;  %s4940_s28 = sld [smem:[#allocation79_spill]]  ;;  %s638_s29 = int_to_ptr.hbm [resolvable:$true] %s637_s29 }
  0x49   : > { %2972 = dma.hbm_to_vmem [thread:$0]  (!%p4197_p5), %s638_s29, 192, %s640_s30, [#allocation14], %s4884_s22, %s4884_s22, %s4886_s26  }
  0x4a   : > { %s652_s19 = sshll.u32 %s4939_s25, 4  ;;  %s3971_s29 = smov [#allocation15]   ;;  %s653_s19 = int_to_ptr.hbm [resolvable:$true] %s652_s19 }
  0x4b   : > { %2969 = dma.hbm_to_vmem [thread:$0]  (!%p4197_p5), %s627_s20, 16, %s629_s14, [#allocation11]  }
  0x4c   : > { %s654_s30 = sshll.u32 %s3971_s29, 4  ;;  %s3972_s14 = smov [#allocation18]   ;;  %s655_s30 = int_to_ptr.vmem [resolvable:$true] %s654_s30 }
  0x4d   : > { %2975 = dma.hbm_to_vmem [thread:$0]  (!%p4197_p5), %s653_s19, 16, %s655_s30, [#allocation14]  }
  0x4e   : > { %s663_s21 = sshll.u32 %s4940_s28, 4  ;;  %s665_s20 = sshll.u32 %s3972_s14, 4  ;;  %s664_s21 = int_to_ptr.hbm [resolvable:$true] %s663_s21  ;;  %s666_s20 = int_to_ptr.vmem [resolvable:$true] %s665_s20 }
  0x4f   : > { %2978 = dma.hbm_to_vmem [thread:$0]  (!%p4197_p5), %s664_s21, 192, %s666_s20, [#allocation17], %s4884_s22, %s4884_s22, %s4886_s26  }
  0x50   : > { %s84_s25 = sld [smem:[#allocation7 + %s4227_s24]]  ;;  %p101_p8 = scmp.ne.s32.totalorder %s3953_s4, %s3949_s8 }
  0x51   : > { %s88_s19 = sadd.s32 1, %s3957_s1  ;;  %p4893_p9 = scmp.lt.s32.totalorder %s3961_s5, 2 }
  0x52   : > { %p4240_p10 = por %p4896_p7, %p95_p6  ;;  %p4246_p11 = por %p4897_p1, %p101_p8 }
  0x53   : > { %s826_s27 = sand.u32 1, %s3957_s1   ;;  %s4947_s9 = sld [smem:[#allocation80_spill]] }
  0x54   : > { %s4942_s30 = scalar_select %p4246_p11, 1, 0 }
  0x55   : > { %s2717_s8 = sshll.u32 %s826_s27, 1  ;;  %p4256_p12 = pnand %p4893_p9, %p4240_p10 }
  0x56   : > { %4943 = sst [smem:[#allocation67_spill]] %s4942_s30  ;;  %s85_s21 = ssub.s32 %s83_s6, %s84_s25 }
  0x57   : > { %p86_p13 = scmp.eq.s32.totalorder %s85_s21, 0  ;;  %s828_s14 = scalar_lea.vmem [#allocation8], %s2717_s8 }
  0x58   : > { %s4260_s20 = sshll.u32 %s828_s14, 4  ;;  %s3973_s8 = smov [#allocation19]  }
  0x59   : > { %4945 = sst [smem:[#allocation68_spill]] %s4260_s20  ;;  %s678_s25 = sshll.u32 %s4947_s9, 4  ;;  %s679_s25 = int_to_ptr.hbm [resolvable:$true] %s678_s25 }
  0x5a   : > { %s2917_s22 = scalar_select %p4240_p10, [#allocation7], [#allocation34] }
  0x5b   : > { %s4265_s26 = scalar_select %p86_p13, %s3957_s1, %s88_s19  }
  0x5c   : > { %s2918_s3 = scalar_select %p4240_p10, %s3961_s5, 0 }
  0x5d   : > { %4946 = sst [smem:[#allocation69_spill]] %s4265_s26  ;;  %s5050_s22 = smov (!%p4893_p9, %s2917_s22), [#allocation38] }
  0x5e   : > { %s5052_s3 = smov (!%p4893_p9, %s2918_s3), 0  ;;  %s680_s21 = sshll.u32 %s3973_s8, 4  ;;  %s681_s21 = int_to_ptr.vmem [resolvable:$true] %s680_s21 }
  0x5f   : > { %s829_s27 = sld [smem:[%s5050_s22 + %s5052_s3]]  ;;  %s3974_s22 = smov [#allocation22]  }
  0x60   : > { %s4948_s11 = sld [smem:[#allocation82_spill]]  ;;  %s706_s3 = sshll.u32 %s3974_s22, 4  ;;  %s707_s3 = int_to_ptr.vmem [resolvable:$true] %s706_s3 }
  0x61   : > { %2981 = dma.hbm_to_vmem [thread:$0]  (!%p4197_p5), %s679_s25, 16, %s681_s21, [#allocation20]  }
  0x62   : > { %s4949_s30 = sld [smem:[#allocation73_spill]]  ;;  %s4952_s14 = sand.u32 1, %s3961_s5  }
  0x63   : > { %s4951_s16 = sld [smem:[#allocation87_spill]]  ;;  %s4291_s19 = scalar_lea.sflag [#allocation9], %s4952_s14 }
  0x64   : > { %p3411_p2 = pneg %p4256_p12 }
  0x65   : > { %s2718_s26 = sshll.u32 %s829_s27, 1 }
  0x66   : > { %s704_s29 = sshll.u32 %s4948_s11, 4  ;;  %s705_s29 = int_to_ptr.hbm [resolvable:$true] %s704_s29 }
  0x68   : > { %s4950_s13 = smov %s4949_s30  ;;  %s833_s6 = scalar_lea.hbm %s4949_s30, %s2718_s26 }
  0x69   : > { %s835_s9 = sshll.u32 %s833_s6, 4  ;;  %s745_s12 = sshll.u32 %s4951_s16, 4  ;;  %s836_s9 = int_to_ptr.hbm [resolvable:$true] %s835_s9  ;;  %s746_s12 = int_to_ptr.hbm [resolvable:$true] %s745_s12 }
  0x6a   : > { %s3407_s25 = sshra.s32 %s836_s9, 4  ;;  %s3414_s20 = scalar_lea.hbm %s4950_s13, 16  ;;  %s3408_s25 = int_to_ptr.hbm [resolvable:$true] %s3407_s25 }
  0x6b   : > { %s3409_s27 = scalar_lea.hbm %s3408_s25, 2  ;;  %p3415_p8 = scmp.lt.s32.totalorder %s3408_s25, %s4950_s13 }
  0x6c   : > { %p3410_p0 = scmp.ne.s32.totalorder %s3408_s25, %s3409_s27  ;;  %p3416_p10 = scmp.lt.s32.totalorder %s3414_s20, %s3409_s27 }
  0x6e   : > { %p3412_p4 = pnand %p3411_p2, %p3410_p0  ;;  %p3417_p13 = por %p3416_p10, %p3415_p8 }
  0x70   : > { %p3413_p6 = pneg %p3412_p4 }
  0x72   : > { %p3418_p9 = pnand %p3417_p13, %p3413_p6 }
  0x74   : > { %3421 = shalt.err (!%p3418_p9)
}
  0x75   : > { %s4953_s22 = sld [smem:[#allocation68_spill]]  ;;  %s3975_s25 = smov [#allocation28]  }
  0x76   : > { %2987 = dma.hbm_to_vmem [thread:$0]  (!%p4197_p5), %s705_s29, 16, %s707_s3, [#allocation23]  }
  0x77   : > { %s4955_s17 = sld [smem:[#allocation88_spill]]  ;;  %s747_s27 = sshll.u32 %s3975_s25, 4  ;;  %s748_s27 = int_to_ptr.vmem [resolvable:$true] %s747_s27 }
  0x78   : > { %2996 = dma.hbm_to_vmem [thread:$0]  (!%p4197_p5), %s746_s12, 16, %s748_s27, [#allocation11]  }
  0x79   : > { %s4956_s18 = sld [smem:[#allocation89_spill]]  ;;  %s4957_s26 = smov 4  }
  0x7a   : > { %s4958_s20 = smov 64   ;;  %s3977_s21 = smov [#allocation30]  }
  0x7b   : > { %s4954_s30 = int_to_ptr.vmem [resolvable:$true] %s4953_s22  ;;  %s773_s4 = sshll.u32 %s3977_s21, 4  ;;  %s774_s4 = int_to_ptr.vmem [resolvable:$true] %s773_s4 }
  0x7c   : > { %3014 = dma.hbm_to_vmem [thread:$0]  (!%p4256_p12), %s836_s9, 32, %s4954_s30, %s4291_s19  }
  0x7d   : > { %s756_s14 = sshll.u32 %s4955_s17, 4  ;;  %s3976_s9 = smov [#allocation29]   ;;  %s757_s14 = int_to_ptr.hbm [resolvable:$true] %s756_s14 }
  0x7e   : > { %s758_s28 = sshll.u32 %s3976_s9, 4  ;;  %s349_s12 = sld [smem:[#allocation7 + %s3961_s5]]  ;;  %s759_s28 = int_to_ptr.vmem [resolvable:$true] %s758_s28 }
  0x7f   : > { %s771_s1 = sshll.u32 %s4956_s18, 4  ;;  %s350_s22 = sld [smem:[#allocation7 + %s4227_s24]]  ;;  %s772_s1 = int_to_ptr.hbm [resolvable:$true] %s771_s1 }
  0x80   : > { %2999 = dma.hbm_to_vmem [thread:$0]  (!%p4197_p5), %s757_s14, 512, %s759_s28, [#allocation14], %s4958_s20, %s4958_s20, %s4957_s26  }
  0x81   : > { %3002 = dma.hbm_to_vmem [thread:$0]  (!%p4197_p5), %s772_s1, 16, %s774_s4, [#allocation17]  }
  0x82   : > { %s354_s30 = sadd.s32 1, %s3933_s7  ;;  %p361_p9 = scmp.ne.s32.totalorder %s3933_s7, %s3929_s15 }
  0x83   : > { %p367_p12 = scmp.ne.s32.totalorder %s3929_s15, %s3925_s0  ;;  %s866_s6 = sand.u32 1, %s3933_s7  }
  0x84   : > { %s4959_s10 = sld [smem:[#allocation81_spill]]  ;;  %p4336_p0 = por %p361_p9, %p4896_p7 }
  0x85   : > { %p4342_p2 = por %p367_p12, %p4897_p1  ;;  %s2721_s0 = sshll.u32 %s866_s6, 2 }
  0x86   : > { %p4962_p4 = scmp.lt.s32.totalorder %s3961_s5, 2  ;;  %s351_s29 = ssub.s32 %s349_s12, %s350_s22 }
  0x87   : > { %s868_s3 = scalar_lea.vmem [#allocation27], %s2721_s0  ;;  %p352_p8 = scmp.eq.s32.totalorder %s351_s29, 0 }
  0x88   : > { %p4350_p6 = pnand %p4962_p4, %p4336_p0  ;;  %s4354_s1 = sshll.u32 %s868_s3, 4 }
  0x89   : > { %4964 = sst [smem:[#allocation68_spill]] %s4354_s1  ;;  %p4966_p10 = pmov %p4962_p4 }
  0x8a   : > { %s689_s14 = sshll.u32 %s4959_s10, 4  ;;  %p4967_p13 = pmov %p4962_p4  ;;  %s690_s14 = int_to_ptr.hbm [resolvable:$true] %s689_s14 }
  0x8b   : > { %s2923_s21 = scalar_select %p4336_p0, [#allocation7], [#allocation36] }
  0x8c   : > { %s4360_s4 = scalar_select %p352_p8, %s3933_s7, %s354_s30  }
  0x8d   : > { %s2924_s6 = scalar_select %p4336_p0, %s3961_s5, 0 }
  0x8e   : > { %4965 = sst [smem:[#allocation70_spill]] %s4360_s4  ;;  %s5054_s21 = smov (!%p4966_p10, %s2923_s21), [#allocation40] }
  0x8f   : > { %s5056_s6 = smov (!%p4967_p13, %s2924_s6), 0  ;;  %s3978_s25 = smov [#allocation21]  }
  0x90   : > { %s869_s8 = sld [smem:[%s5054_s21 + %s5056_s6]]  ;;  %s691_s10 = sshll.u32 %s3978_s25, 4  ;;  %s692_s10 = int_to_ptr.vmem [resolvable:$true] %s691_s10 }
  0x91   : > { %s4968_s0 = sld [smem:[#allocation83_spill]]  ;;  %s3979_s30 = smov [#allocation24]  }
  0x92   : > { %2984 = dma.hbm_to_vmem [thread:$0]  (!%p4197_p5), %s690_s14, 384, %s692_s10, [#allocation20], %s4958_s20, %s4958_s20, %s4957_s26  }
  0x93   : > { %s4379_s27 = sshll.u32 %s3979_s30, 4  ;;  %s4969_s21 = sld [smem:[#allocation84_spill]]  ;;  %s718_s27 = int_to_ptr.vmem [resolvable:$true] %s4379_s27 }
  0x94   : > { %s3980_s16 = smov [#allocation25]   ;;  %s4972_s18 = sld [smem:[#allocation91_spill]] }
  0x95   : > { %s732_s10 = sshll.u32 %s3980_s16, 4  ;;  %p3591_p12 = pneg %p4350_p6  ;;  %s733_s10 = int_to_ptr.vmem [resolvable:$true] %s732_s10 }
  0x96   : > { %s2722_s25 = sshll.u32 %s869_s8, 2 }
  0x97   : > { %s715_s3 = sshll.u32 %s4968_s0, 4  ;;  %s4970_s0 = sld [smem:[#allocation85_spill]]  ;;  %s4377_s3 = int_to_ptr.hbm [resolvable:$true] %s715_s3 }
  0x99   : > { %s730_s6 = sshll.u32 %s4969_s21, 4  ;;  %s731_s6 = int_to_ptr.hbm [resolvable:$true] %s730_s6 }
  0x9a   : > { %s782_s4 = sshll.u32 %s4972_s18, 4  ;;  %s783_s4 = int_to_ptr.hbm [resolvable:$true] %s782_s4 }
  0x9d   : > { %s4971_s11 = smov %s4970_s0  ;;  %s873_s13 = scalar_lea.hbm %s4970_s0, %s2722_s25 }
  0x9e   : > { %s875_s14 = sshll.u32 %s873_s13, 4  ;;  %s3594_s25 = scalar_lea.hbm %s4971_s11, 32  ;;  %s876_s14 = int_to_ptr.hbm [resolvable:$true] %s875_s14 }
  0x9f   : > { %s3587_s1 = sshra.s32 %s876_s14, 4  ;;  %s3588_s1 = int_to_ptr.hbm [resolvable:$true] %s3587_s1 }
  0xa0   : > { %s3589_s29 = scalar_lea.hbm %s3588_s1, 4  ;;  %p3595_p8 = scmp.lt.s32.totalorder %s3588_s1, %s4971_s11 }
  0xa1   : > { %p3590_p9 = scmp.ne.s32.totalorder %s3588_s1, %s3589_s29  ;;  %p3596_p10 = scmp.lt.s32.totalorder %s3594_s25, %s3589_s29 }
  0xa3   : > { %p3592_p0 = pnand %p3591_p12, %p3590_p9  ;;  %p3597_p13 = por %p3596_p10, %p3595_p8 }
  0xa5   : > { %p3593_p4 = pneg %p3592_p0 }
  0xa7   : > { %p3598_p7 = pnand %p3597_p13, %p3593_p4 }
  0xa9   : > { %3601 = shalt.err (!%p3598_p7)
}
  0xaa   : > { %s4973_s17 = sld [smem:[#allocation68_spill]]  ;;  %s3981_s0 = smov [#allocation32]  }
  0xab   : > { %s4975_s12 = sld [smem:[#allocation62_spill]]  ;;  %s784_s30 = sshll.u32 %s3981_s0, 4  ;;  %s785_s30 = int_to_ptr.vmem [resolvable:$true] %s784_s30 }
  0xac   : > { %s4976_s22 = sld [smem:[#allocation63_spill]]  ;;  %p4980_p12 = scmp.eq.s32.totalorder %s3961_s5, 0 }
  0xad   : > { %2990 = dma.hbm_to_vmem [thread:$0]  (!%p4197_p5), %s4377_s3, 512, %s718_s27, [#allocation23], %s4958_s20, %s4958_s20, %s4957_s26  }
  0xae   : > { %s4977_s28 = sld [smem:[#allocation61_spill]]  ;;  %s3982_s3 = smov [#allocation33]  }
  0xaf   : > { %2993 = dma.hbm_to_vmem [thread:$0]  (!%p4197_p5), %s731_s6, 16, %s733_s10, [#allocation26]  }
  0xb0   : > { %s4974_s18 = int_to_ptr.vmem [resolvable:$true] %s4973_s17  ;;  %s799_s27 = sshll.u32 %s3982_s3, 4  ;;  %s800_s27 = int_to_ptr.vmem [resolvable:$true] %s799_s27 }
  0xb1   : > { %3024 = dma.hbm_to_vmem [thread:$0]  (!%p4350_p6), %s876_s14, 64, %s4974_s18, %s4291_s19  }
  0xb2   : > { %s4978_s14 = sld [smem:[#allocation92_spill]]  ;;  %p207_p7 = scmp.ne.s32.totalorder %s4976_s22, %s4975_s12 }
  0xb3   : > { %3005 = dma.hbm_to_vmem [thread:$0]  (!%p4197_p5), %s783_s4, 384, %s785_s30, [#allocation11], %s4958_s20, %s4958_s20, %s4957_s26  }
  0xb4   : > { %s195_s6 = sld [smem:[#allocation7 + %s3961_s5]]  ;;  %p213_p6 = scmp.ne.s32.totalorder %s4975_s12, %s4977_s28 }
  0xb5   : > { %s196_s10 = sld [smem:[#allocation7 + %s4227_s24]]  ;;  %s846_s21 = sand.u32 1, %s4976_s22  }
  0xb6   : > { %s200_s25 = sadd.s32 1, %s4976_s22  ;;  %p4432_p9 = por %p213_p6, %p4897_p1 }
  0xb7   : > { %s4981_s20 = sld [smem:[#allocation59_spill]]  ;;  %p209_p0 = por %p207_p7, %p4980_p12 }
  0xb8   : > { %s797_s8 = sshll.u32 %s4978_s14, 4  ;;  %s4982_s2 = sld [smem:[#allocation60_spill]]  ;;  %s798_s8 = int_to_ptr.hbm [resolvable:$true] %s797_s8 }
  0xb9   : > { %3008 = dma.hbm_to_vmem [thread:$0]  (!%p4197_p5), %s798_s8, 16, %s800_s27, [#allocation14]  }
  0xba   : > { %s4983_s4 = sld [smem:[#allocation58_spill]]  ;;  %s2719_s16 = sshll.u32 %s846_s21, 1 }
  0xbb   : > { %s197_s13 = ssub.s32 %s195_s6, %s196_s10  ;;  %p4984_p4 = scmp.lt.s32.totalorder %s3961_s5, 2 }
  0xbc   : > { %p198_p5 = scmp.eq.s32.totalorder %s197_s13, 0  ;;  %s848_s0 = scalar_lea.vmem [#allocation16], %s2719_s16 }
  0xbd   : > { %p4440_p8 = pnand %p4984_p4, %p209_p0  ;;  %p4986_p10 = pmov %p4984_p4 }
  0xbe   : > { %s2920_s18 = scalar_select %p209_p0, [#allocation7], [#allocation35] }
  0xbf   : > { %s5058_s22 = smov (!%p198_p5, %s4976_s22), %s200_s25  ;;  %p4987_p13 = pmov %p4984_p4 }
  0xc0   : > { %s2921_s12 = scalar_select %p209_p0, %s3961_s5, 0 }
  0xc1   : > { %s5060_s18 = smov (!%p4986_p10, %s2920_s18), [#allocation39]  ;;  %s4452_s30 = sshll.u32 %s848_s0, 4  ;;  %s858_s30 = int_to_ptr.vmem [resolvable:$true] %s4452_s30 }
  0xc2   : > { %s5062_s12 = smov (!%p4987_p13, %s2921_s12), 0  ;;  %s4455_s1 = sld [smem:[#allocation7 + %s3961_s5]] }
  0xc3   : > { %s849_s28 = sld [smem:[%s5060_s18 + %s5062_s12]]  ;;  %p473_p7 = scmp.ne.s32.totalorder %s4982_s2, %s4981_s20 }
  0xc4   : > { %s4458_s29 = sld [smem:[#allocation7 + %s4227_s24]]  ;;  %p479_p6 = scmp.ne.s32.totalorder %s4981_s20, %s4983_s4 }
  0xc5   : > { %s466_s14 = sadd.s32 1, %s4982_s2  ;;  %s4989_s10 = sld [smem:[#allocation78_spill]] }
  0xc6   : > { %p4468_p12 = por %p479_p6, %p4897_p1  ;;  %s886_s25 = sand.u32 1, %s4982_s2  }
  0xc7   : > { %p4990_p0 = scmp.eq.s32.totalorder %s3961_s5, 0  ;;  %s4992_s4 = sand.u32 1, %s3961_s5  }
  0xc8   : > { %s4988_s3 = scalar_select %p4468_p12, 1, 0 }
  0xc9   : > { %s2720_s8 = sshll.u32 %s849_s28, 1  ;;  %p4478_p5 = por %p473_p7, %p4990_p0 }
  0xca   : > { %s463_s20 = ssub.s32 %s4455_s1, %s4458_s29  ;;  %s845_s18 = scalar_lea.sflag [#allocation17], %s4992_s4 }
  0xcb   : > { %s853_s21 = scalar_lea.hbm %s4989_s10, %s2720_s8  ;;  %p3741_p10 = pneg %p4440_p8 }
  0xcc   : > { %s855_s16 = sshll.u32 %s853_s21, 4  ;;  %s3744_s27 = scalar_lea.hbm %s4989_s10, 16  ;;  %s856_s16 = int_to_ptr.hbm [resolvable:$true] %s855_s16 }
  0xcd   : > { %s3737_s12 = sshra.s32 %s856_s16, 4  ;;  %s3738_s12 = int_to_ptr.hbm [resolvable:$true] %s3737_s12 }
  0xce   : > { %s3739_s28 = scalar_lea.hbm %s3738_s12, 2  ;;  %p3745_p7 = scmp.lt.s32.totalorder %s3738_s12, %s4989_s10 }
  0xcf   : > { %p3740_p4 = scmp.ne.s32.totalorder %s3738_s12, %s3739_s28  ;;  %p3746_p0 = scmp.lt.s32.totalorder %s3744_s27, %s3739_s28 }
  0xd1   : > { %p3742_p13 = pnand %p3741_p10, %p3740_p4  ;;  %p3747_p1 = por %p3746_p0, %p3745_p7 }
  0xd3   : > { %p3743_p6 = pneg %p3742_p13 }
  0xd5   : > { %p3748_p12 = pnand %p3747_p1, %p3743_p6 }
  0xd7   : > { %3751 = shalt.err (!%p3748_p12)
}
  0xd8   : > { %3019 = dma.hbm_to_vmem [thread:$0]  (!%p4440_p8), %s856_s16, 32, %s858_s30, %s845_s18  }
  0xd9   : > { %p464_p4 = scmp.eq.s32.totalorder %s463_s20, 0  ;;  %s2723_s1 = sshll.u32 %s886_s25, 2 }
  0xda   : > { %s2926_s29 = scalar_select %p4478_p5, [#allocation7], [#allocation37] }
  0xdb   : > { %s5064_s2 = smov (!%p464_p4, %s4982_s2), %s466_s14  ;;  %p4993_p1 = scmp.lt.s32.totalorder %s3961_s5, 2 }
  0xdc   : > { %s2927_s4 = scalar_select %p4478_p5, %s3961_s5, 0 }
  0xdd   : > { %s5066_s29 = smov (!%p4993_p1, %s2926_s29), [#allocation41]  ;;  %p4994_p12 = pmov %p4993_p1 }
  0xde   : > { %p4995_p10 = pmov %p4993_p1  ;;  %s888_s16 = scalar_lea.vmem [#allocation31], %s2723_s1 }
  0xdf   : > { %s5068_s4 = smov (!%p4994_p12, %s2927_s4), 0  ;;  %s897_s25 = sshll.u32 %s888_s16, 4  ;;  %s898_s25 = int_to_ptr.vmem [resolvable:$true] %s897_s25 }
  0xe0   : > { %p4512_p13 = pnand %p4995_p10, %p4478_p5  ;;  %s889_s30 = sld [smem:[%s5066_s29 + %s5068_s4]] }
  0xe1   : > { %s4997_s12 = sld [smem:[#allocation90_spill]] }
  0xe2   : > { %p3771_p5 = pneg %p4512_p13 }
  0xe6   : > { %s2724_s20 = sshll.u32 %s889_s30, 2 }
  0xe7   : > { %s893_s28 = scalar_lea.hbm %s4997_s12, %s2724_s20  ;;  %s3774_s6 = scalar_lea.hbm %s4997_s12, 32 }
  0xe8   : > { %s895_s0 = sshll.u32 %s893_s28, 4  ;;  %s896_s0 = int_to_ptr.hbm [resolvable:$true] %s895_s0 }
  0xe9   : > { %s3767_s8 = sshra.s32 %s896_s0, 4  ;;  %s3768_s8 = int_to_ptr.hbm [resolvable:$true] %s3767_s8 }
  0xea   : > { %s3769_s13 = scalar_lea.hbm %s3768_s8, 4  ;;  %p3775_p0 = scmp.lt.s32.totalorder %s3768_s8, %s4997_s12 }
  0xeb   : > { %p3770_p8 = scmp.ne.s32.totalorder %s3768_s8, %s3769_s13  ;;  %p3776_p4 = scmp.lt.s32.totalorder %s3774_s6, %s3769_s13 }
  0xed   : > { %p3772_p6 = pnand %p3771_p5, %p3770_p8  ;;  %p3777_p1 = por %p3776_p4, %p3775_p0 }
  0xef   : > { %p3773_p7 = pneg %p3772_p6 }
  0xf1   : > { %p3778_p12 = pnand %p3777_p1, %p3773_p7 }
  0xf3   : > { %3781 = shalt.err (!%p3778_p12)
}
  0xf4   : > { %3029 = dma.hbm_to_vmem [thread:$0]  (!%p4512_p13), %s896_s0, 64, %s898_s25, %s4291_s19  }
  0xf5   : > { %906 = sbr.rel (%p4186_p3) target bundleno = 1949 (0x79d), region = 112  ;;  %s4999_s4 = sld [smem:[#allocation64_spill]] (!%p4186_p3) }
  0xf6   : > { %s908_s16 = sand.u32 (!%p4186_p3), 1, %s4181_s23  }
  0xf7   : > { %s4536_s14 = scalar_lea.sflag (!%p4186_p3), [#allocation9], %s908_s16 }
  0xfb   : > { %s910_s20 = sand.u32 1, %s4999_s4  }
  0xfc   : > { %s4534_s18 = sshll.u32 %s910_s20, 1 }
  0xfd   : > { %s912_s28 = scalar_lea.vmem [#allocation8], %s4534_s18 }
  0xfe   : > { %3852 = dma.done.wait (%p4246_p11), %s4536_s14, 32  }
  0xff   : > { %3854 = vsyncadd (%p4246_p11), %s4536_s14, 4294967264  ;;  %p5001_p3 = scmp.eq.s32.totalorder %s4181_s23, 0 }
 0x101   : > { %3856 = dma.done.wait (%p5001_p3), [#allocation11], 112   ;;  %p5002_p10 = pmov %p5001_p3 }
 0x102   : > { %p5003_p13 = pmov %p5001_p3 }
 0x103   : > { %3858 = vsyncadd (%p5002_p10), [#allocation11], 4294967184 }
 0x104   : > { %3860 = dma.done.wait (%p5003_p13), [#allocation14], 208   ;;  %p5004_p8 = pmov %p5001_p3 }
 0x105   : > { %s5005_s19 = sld [smem:[#allocation62_spill]]  ;;  %s939_s0 = scalar_lea.sflag [#allocation17], %s908_s16 }
 0x106   : > { %3862 = vsyncadd (%p5004_p8), [#allocation14], 4294967088 }
 0x10b   : > { %s940_s17 = sand.u32 1, %s5005_s19  }
 0x10c   : > { %s4554_s25 = sshll.u32 %s940_s17, 1 }
 0x10d   : > { %s942_s8 = scalar_lea.vmem [#allocation16], %s4554_s25 }
 0x10e   : > { %3864 = dma.done.wait (%p4432_p9), %s939_s0, 32  }
 0x10f   : > { %3866 = vsyncadd (%p4432_p9), %s939_s0, 4294967264  ;;  %p5006_p11 = pmov %p5001_p3 }
 0x110   : > { %p5007_p5 = pmov %p5001_p3 }
 0x111   : > { %3868 = dma.done.wait (%p5006_p11), [#allocation17], 192  }
 0x112   : > { %3870 = vsyncadd (%p5007_p5), [#allocation17], 4294967104  ;;  %p5008_p6 = pmov %p5001_p3 }
 0x113   : > { %p5009_p7 = pmov %p5001_p3 }
 0x114   : > { %3872 = dma.done.wait (%p5008_p6), [#allocation20], 400  }
 0x115   : > { %3874 = vsyncadd (%p5009_p7), [#allocation20], 4294966896  ;;  %p5010_p0 = pmov %p5001_p3 }
 0x117   : > { %3876 = dma.done.wait (%p5010_p0), [#allocation23], 528   ;;  %p5011_p4 = pmov %p5010_p0 }
 0x118   : > { %p5012_p9 = pmov %p5010_p0 }
 0x119   : > { %3878 = vsyncadd (%p5011_p4), [#allocation23], 4294966768 }
 0x11a   : > { %3880 = dma.done.wait (%p5012_p9), [#allocation26], 16   ;;  %p5013_p1 = pmov %p5010_p0 }
 0x11b   : > { %s980_s26 = sand.u32 1, %s3929_s15  }
 0x11c   : > { %3882 = vsyncadd (%p5013_p1), [#allocation26], 4294967280  ;;  %s4578_s13 = sshll.u32 %s980_s26, 2 }
 0x11d   : > { %s982_s5 = scalar_lea.vmem [#allocation27], %s4578_s13 }
 0x11e   : > { %3884 = dma.done.wait (%p4342_p2), %s4536_s14, 64  }
 0x11f   : > { %3886 = vsyncadd (%p4342_p2), %s4536_s14, 4294967232  ;;  %p5014_p12 = pmov %p5010_p0 }
 0x120   : > { %p5015_p3 = pmov %p5010_p0 }
 0x121   : > { %3888 = dma.done.wait (%p5014_p12), [#allocation11], 16  }
 0x122   : > { %3890 = vsyncadd (%p5015_p3), [#allocation11], 4294967280  ;;  %p5016_p10 = pmov %p5010_p0 }
 0x123   : > { %p5017_p13 = pmov %p5010_p0 }
 0x124   : > { %3892 = dma.done.wait (%p5016_p10), [#allocation14], 512  }
 0x125   : > { %3894 = vsyncadd (%p5017_p13), [#allocation14], 4294966784  ;;  %p5018_p8 = pmov %p5010_p0 }
 0x126   : > { %p5019_p11 = pmov %p5010_p0 }
 0x127   : > { %3896 = dma.done.wait (%p5018_p8), [#allocation17], 16  }
 0x128   : > { %3898 = vsyncadd (%p5019_p11), [#allocation17], 4294967280  ;;  %s5020_s9 = sld [smem:[#allocation59_spill]]  ;;  %p5021_p2 = scmp.ne.s32.totalorder %s4988_s3, 0 }
 0x12e   : > { %s1005_s27 = sand.u32 1, %s5020_s9  }
 0x12f   : > { %s4600_s6 = sshll.u32 %s1005_s27, 2 }
 0x130   : > { %s1007_s21 = scalar_lea.vmem [#allocation31], %s4600_s6 }
 0x131   : > { %3900 = dma.done.wait (%p5021_p2), %s4536_s14, 64  }
 0x132   : > { %3902 = vsyncadd (%p5021_p2), %s4536_s14, 4294967232  ;;  %p5022_p5 = pmov %p5010_p0 }
 0x133   : > { %p5023_p6 = pmov %p5010_p0 }
 0x134   : > { %3904 = dma.done.wait (%p5022_p5), [#allocation11], 384  }
 0x135   : > { %3906 = vsyncadd (%p5023_p6), [#allocation11], 4294966912  ;;  %p5024_p7 = pmov %p5010_p0 }
 0x137   : > { %3908 = dma.done.wait (%p5024_p7), [#allocation14], 16  }
 0x138   : > { %3910 = vsyncadd (%p5010_p0), [#allocation14], 4294967280  ;;  %p1101_p4 = scmp.lt.s32.totalorder %s4181_s23, 1  ;;  %vm1171_vm0 = vcmask 1041408   ;;  %s5025_s4 = sld [smem:[#allocation72_spill]]  ;;  %vm1119_vm1 = vcmask 31744  }
 0x139   : > { %v1167_v0 = vld [vmem:[#allocation10] sm:$0x3]  ;;  %v1190_v1 = vld [vmem:[#allocation10 + $0x2] sm:$0x3]  ;;  %v1209_v2 = vld [vmem:[#allocation10 + $0x4] sm:$0x3] }
 0x13a   : > { %s5070_s23 = smov (!%p1101_p4, %s4181_s23), 1  ;;  %v1173_v3 = vsel %vm1171_vm0, %v1167_v0, 0  ;;  %v1192_v4 = vsel %vm1171_vm0, %v1190_v1, 0  ;;  %v1211_v5 = vsel %vm1171_vm0, %v1209_v2, 0  ;;  %v1118_v38 = vld [vmem:[%s912_s28] sm:$0x3] }
 0x13b   : > { %s2868_s3 = sshll.u32 %s5070_s23, 4  ;;  %1182 = vmatpush.bf16.msra.mxu0 %v1173_v3  ;;  %1201 = vmatpush.bf16.msra.mxu1 %v1192_v4  ;;  %v1160_v43 = vperm.slane %v1118_v38, 0  ;;  %v1163_v47 = vperm.slane %v1118_v38, 1  ;;  %vm1267_vm5 = vcmask 1043456   ;;  %v1305_v53 = vld [vmem:[#allocation13 + $0x8] sm:$0xf] }
 0x13c   : > { %1220 = vmatpush.bf16.msra.mxu2 %v1211_v5  ;;  %v1286_v54 = vld [vmem:[#allocation13 + $0x4] sm:$0xf]  ;;  %v1307_v55 = vsel %vm1267_vm5, %v1305_v53, 0  ;;  %v1262_v57 = vld [vmem:[#allocation13] sm:$0xf]  ;;  %vm1229_vm6 = vcmask 1040384  }
 0x13d   : > { %v1288_v56 = vsel %vm1267_vm5, %v1286_v54, 0  ;;  %v1269_v58 = vsel %vm1267_vm5, %v1262_v57, 0  ;;  %vm1240_vm7 = vcmask 1046528   ;;  %vm1263_vm8 = vcmask 64512   ;;  %v4652_v54 = vld [vmem:[%s1007_s21] sm:$0xf] }
 0x13e   : > { %s1105_s30 = scalar_lea.vmem %s5025_s4, %s2868_s3  ;;  %1278 = vmatpush.bf16.msra.mxu3 %v1269_v58  ;;  %vm1355_vm14 = vcmask 57344   ;;  %s5026_s18 = sld [smem:[#allocation86_spill]] }
 0x13f   : > { %v1116_v6 = vld [vmem:[%s1105_s30] sm:$0xff]  ;;  %v1117_v7 = vld [vmem:[%s1105_s30 + $0x8] sm:$0xff]  ;;  %1316 = vmatpush.bf16.msrb.mxu1 %v1307_v55  ;;  %1297 = vmatpush.bf16.msrb.mxu0 %v1288_v56  ;;  %v2132_v56 = vperm.slane %v4652_v54, 2  ;;  %s5027_s6 = sld [smem:[#allocation93_spill]] }
 0x140   : > { %v1120_v8 = vsel %vm1119_vm1, %v1116_v6, 0.0  ;;  %v1121_v9 = vsel %vm1119_vm1, %v1117_v7, 0.0  ;;  %v1130_v10 = vmul.f32 %v1116_v6, %v1116_v6  ;;  %v1131_v11 = vmul.f32 %v1117_v7, %v1117_v7  ;;  %s5029_s14 = sld [smem:[#allocation94_spill]] }
 0x141   : > { %v1122_v12 = vadd.f32 %v1121_v9, %v1120_v8  ;;  %v3186_v9 = vld [vmem:[#allocation12] ss:$0 sm:$0xff]  ;;  %s5030_s17 = sld [smem:[#allocation95_spill]] }
 0x142   : > { %v1132_v13 = vsel %vm1119_vm1, %v1130_v10, 0.0  ;;  %v1133_v14 = vsel %vm1119_vm1, %v1131_v11, 0.0 }
 0x143   : > { %v1123_v15 = vrot.slane %v1122_v12, 4  ;;  %v1134_v16 = vadd.f32 %v1133_v14, %v1132_v13 }
 0x145   : > { %v1124_v17 = vadd.f32 %v1123_v15, %v1122_v12  ;;  %v1135_v18 = vrot.slane %v1134_v16, 4  ;;  %s5028_s21 = smov %s5027_s6 }
 0x147   : > { %v1125_v19 = vrot.slane %v1124_v17, 2  ;;  %v1136_v20 = vadd.f32 %v1135_v18, %v1134_v16  ;;  %s1114_s25 = scalar_lea.vmem %s5030_s17, %s2868_s3 }
 0x149   : > { %v1126_v21 = vadd.f32 %v1125_v19, %v1124_v17  ;;  %v1137_v22 = vrot.slane %v1136_v20, 2 }
 0x14b   : > { %v1127_v23 = vrot.slane %v1126_v21, 1  ;;  %v1138_v24 = vadd.f32 %v1137_v22, %v1136_v20 }
 0x14d   : > { %v1128_v25 = vadd.f32 %v1127_v23, %v1126_v21  ;;  %v1139_v26 = vrot.slane %v1138_v24, 1 }
 0x14f   : > { %v1129_v27 = vmul.f32 0.0625, %v1128_v25  ;;  %v1140_v28 = vadd.f32 %v1139_v26, %v1138_v24 }
 0x151   : > { %v1141_v29 = vmul.f32 0.0625, %v1140_v28  ;;  %v1142_v30 = vmul.f32 %v1129_v27, %v1129_v27  ;;  %v1145_v40 = vsub.f32 %v1116_v6, %v1129_v27  ;;  %v1146_v41 = vsub.f32 %v1117_v7, %v1129_v27 }
 0x153   : > { %v1143_v31 = vsub.f32 %v1141_v29, %v1142_v30 }
 0x155   : > { %v1144_v32 = vmax.f32 %v1143_v31, 0.0 }
 0x157   : > { %v1147_v33 = vadd.f32 1e-05, %v1144_v32 }
 0x159   : > { %3195 = vrsqrt.f32 %v1147_v33  ;;  %vm1154_vm2 = vweird.f32 %v1147_v33 }
 0x15f   : > { %v3196_v34 = vpop.eup %3195 }
 0x160   : > { %v1149_v35 = vmul.f32 %v3196_v34, %v1147_v33  ;;  %vm1155_vm3 = vweird.f32 %v3196_v34 }
 0x161   : > { %vm1156_vm4 = vmor %vm1154_vm2, %vm1155_vm3 }
 0x162   : > { %v1150_v36 = vmul.f32 %v3196_v34, %v1149_v35 }
 0x164   : > { %v1151_v37 = vmul.f32 0.5, %v1150_v36 }
 0x166   : > { %v1152_v39 = vsub.f32 1.5, %v1151_v37 }
 0x168   : > { %v1153_v42 = vmul.f32 %v3196_v34, %v1152_v39 }
 0x16a   : > { %v1157_v44 = vsel %vm1156_vm4, %v3196_v34, %v1153_v42 }
 0x16b   : > { %v1158_v45 = vmul.f32 %v1157_v44, %v1145_v40  ;;  %v1159_v46 = vmul.f32 %v1157_v44, %v1146_v41 }
 0x16d   : > { %v1161_v48 = vmul.f32 %v1160_v43, %v1158_v45  ;;  %v1162_v49 = vmul.f32 %v1160_v43, %v1159_v46 }
 0x16f   : > { %v1164_v50 = vadd.f32 %v1163_v47, %v1161_v48  ;;  %v1165_v51 = vadd.f32 %v1163_v47, %v1162_v49 }
 0x171   : > { %v1166_v52 = vpack.c.bf16 %v1165_v51, %v1164_v50 }
 0x173   : > { %2749 = vmatmul.msk.bf16.vlgmr.msra.gmra.mxu0 %vm1119_vm1, %v1166_v52  ;;  %2750 = vmatmul.msk.bf16.vlgmr.msra.gmra.mxu1 %vm1119_vm1, %v1166_v52 }
 0x174   : > { %2751 = vmatmul.msk.bf16.vlgmr.msra.gmra.mxu2 %vm1119_vm1, %v1166_v52 }
 0x1f0   : > { %v1184_v59 = vpop.f32.mrf.mxu0  ;;  %v1203_v60 = vpop.f32.mrf.mxu1 }
 0x1f1   : > { %v1230_v63 = vrot.slane %v1184_v59, 7 }
 0x1f3   : > { %v1235_v1 = vsel %vm1229_vm6, 0.0, %v1230_v63 }
 0x1f4   : > { %v1236_v7 = vadd.f32 %v1235_v1, %v1203_v60  ;;  %v2135_v60 = vperm.slane %v4652_v54, 3 }
 0x1f7   : > { %v1222_v61 = vpop.f32.mrf.mxu2 }
 0x1f8   : > { %v1186_v62 = vpop.f32.mrf.mxu0  ;;  %v1241_v4 = vrot.slane %v1222_v61, 1  ;;  %v1205_v5 = vpop.f32.mrf.mxu1 }
 0x1f9   : > { %v1231_v0 = vrot.slane %v1186_v62, 7 }
 0x1fb   : > { %v1232_v2 = vsel %vm1229_vm6, %v1230_v63, %v1231_v0 }
 0x1fc   : > { %v1237_v8 = vadd.f32 %v1232_v2, %v1205_v5  ;;  %v1406_v2 = vld [vmem:[#allocation18] sm:$0xf] }
 0x1fd   : > { %v1411_v5 = vsel %vm1267_vm5, %v1406_v2, 0 }
 0x1fe   : > { %1420 = vmatpush.bf16.msrb.mxu2 %v1411_v5 }
 0x1ff   : > { %v1224_v3 = vpop.f32.mrf.mxu2 }
 0x200   : > { %v1242_v6 = vrot.slane %v1224_v3, 1  ;;  %v1427_v3 = vld [vmem:[#allocation18 + $0x4] sm:$0xf] }
 0x202   : > { %v1243_v10 = vsel %vm1240_vm7, %v1241_v4, %v1242_v6  ;;  %v1246_v11 = vsel %vm1240_vm7, %v1242_v6, 0.0  ;;  %v1445_v4 = vld [vmem:[#allocation18 + $0x8] sm:$0xf]  ;;  %v1429_v6 = vsel %vm1267_vm5, %v1427_v3, 0  ;;  %v1367_v3 = vld [vmem:[%s942_s8] sm:$0x3] }
 0x203   : > { %v1247_v12 = vadd.f32 %v1243_v10, %v1236_v7  ;;  %v1248_v13 = vadd.f32 %v1246_v11, %v1237_v8  ;;  %v1447_v7 = vsel %vm1267_vm5, %v1445_v4, 0  ;;  %1438 = vmatpush.bf16.msrb.mxu3 %v1429_v6  ;;  %v3983_v8 = vmov 0.0  }
 0x204   : > { %1456 = vmatpush.bf16.msra.mxu0 %v1447_v7  ;;  %1356 = vst.msk [vmem:[#allocation2] sm:$0x1] %vm1355_vm14, %v3983_v8  ;;  %v1401_v7 = vperm.slane %v1367_v3, 0 }
 0x205   : > { %v1253_v14 = vadd.f32 %v3186_v9, %v1247_v12  ;;  %v1254_v15 = vadd.f32 %v3186_v9, %v1248_v13 }
 0x207   : > { %vm1256_vm9 = vcmp.gt.f32.partialorder %v1254_v15, 0.0  ;;  %v1258_v16 = vmul.f32 0.2, %v1254_v15  ;;  %vm1255_vm10 = vcmp.gt.f32.partialorder %v1253_v14, 0.0  ;;  %v1257_v17 = vmul.f32 0.2, %v1253_v14 }
 0x209   : > { %v1259_v18 = vsel %vm1255_vm10, %v1253_v14, %v1257_v17  ;;  %v1260_v19 = vsel %vm1256_vm9, %v1254_v15, %v1258_v16  ;;  %vm1489_vm10 = vcmask 130048  }
 0x20a   : > { %v1261_v20 = vpack.c.bf16 %v1260_v19, %v1259_v18  ;;  %v2092_v21 = vsel %vm1263_vm8, %v1259_v18, 0.0  ;;  %v2093_v22 = vsel %vm1263_vm8, %v1260_v19, 0.0  ;;  %v2102_v23 = vmul.f32 %v1259_v18, %v1259_v18 }
 0x20b   : > { %v2094_v24 = vadd.f32 %v2093_v22, %v2092_v21  ;;  %v2103_v25 = vmul.f32 %v1260_v19, %v1260_v19 }
 0x20c   : > { %2752 = vmatmul.msk.bf16.vlgmr.msra.gmra.mxu3 %vm1263_vm8, %v1261_v20  ;;  %v2104_v26 = vsel %vm1263_vm8, %v2102_v23, 0.0  ;;  %2753 = vmatmul.msk.bf16.vlgmr.msrb.gmra.mxu0 %vm1263_vm8, %v1261_v20 }
 0x20d   : > { %v2095_v27 = vrot.slane %v2094_v24, 4  ;;  %v2105_v28 = vsel %vm1263_vm8, %v2103_v25, 0.0  ;;  %2754 = vmatmul.msk.bf16.vlgmr.msrb.gmra.mxu1 %vm1263_vm8, %v1261_v20 }
 0x20e   : > { %v2106_v29 = vadd.f32 %v2105_v28, %v2104_v26 }
 0x20f   : > { %v2096_v30 = vadd.f32 %v2095_v27, %v2094_v24 }
 0x210   : > { %v2107_v31 = vrot.slane %v2106_v29, 4 }
 0x211   : > { %v2097_v32 = vrot.slane %v2096_v30, 2 }
 0x212   : > { %v2108_v33 = vadd.f32 %v2107_v31, %v2106_v29 }
 0x213   : > { %v2098_v34 = vadd.f32 %v2097_v32, %v2096_v30 }
 0x214   : > { %v2109_v35 = vrot.slane %v2108_v33, 2 }
 0x215   : > { %v2099_v36 = vrot.slane %v2098_v34, 1 }
 0x216   : > { %v2110_v37 = vadd.f32 %v2109_v35, %v2108_v33 }
 0x217   : > { %v2100_v38 = vadd.f32 %v2099_v36, %v2098_v34 }
 0x218   : > { %v2111_v39 = vrot.slane %v2110_v37, 1 }
 0x219   : > { %v2101_v40 = vmul.f32 0.0625, %v2100_v38 }
 0x21a   : > { %v2112_v41 = vadd.f32 %v2111_v39, %v2110_v37 }
 0x21b   : > { %v2114_v42 = vmul.f32 %v2101_v40, %v2101_v40  ;;  %v2117_v43 = vsub.f32 %v1259_v18, %v2101_v40  ;;  %v2118_v44 = vsub.f32 %v1260_v19, %v2101_v40  ;;  %v3187_v18 = vld [vmem:[#allocation15] ss:$0 sm:$0xff] }
 0x21c   : > { %v2113_v45 = vmul.f32 0.0625, %v2112_v41 }
 0x21e   : > { %v2115_v46 = vsub.f32 %v2113_v45, %v2114_v42 }
 0x220   : > { %v2116_v47 = vmax.f32 %v2115_v46, 0.0 }
 0x222   : > { %v2119_v48 = vadd.f32 1e-05, %v2116_v47 }
 0x224   : > { %3197 = vrsqrt.f32 %v2119_v48  ;;  %vm2126_vm12 = vweird.f32 %v2119_v48 }
 0x22a   : > { %v3198_v49 = vpop.eup %3197 }
 0x22b   : > { %v2121_v50 = vmul.f32 %v3198_v49, %v2119_v48  ;;  %vm2127_vm11 = vweird.f32 %v3198_v49 }
 0x22c   : > { %vm2128_vm13 = vmor %vm2126_vm12, %vm2127_vm11  ;;  %vm1568_vm11 = vcmask 122880  }
 0x22d   : > { %v2122_v51 = vmul.f32 %v3198_v49, %v2121_v50  ;;  %1569 = vst.msk [vmem:[#allocation3] sm:$0x1] %vm1568_vm11, %v3983_v8  ;;  %v2880_v8 = vld [vmem:[%s5026_s18 + $0x20] sm:$0xff] }
 0x22f   : > { %v2123_v52 = vmul.f32 0.5, %v2122_v51 }
 0x231   : > { %v2124_v53 = vsub.f32 1.5, %v2123_v52 }
 0x233   : > { %v2125_v55 = vmul.f32 %v3198_v49, %v2124_v53 }
 0x235   : > { %v2129_v57 = vsel %vm2128_vm13, %v3198_v49, %v2125_v55 }
 0x236   : > { %v2130_v58 = vmul.f32 %v2129_v57, %v2117_v43  ;;  %v2131_v59 = vmul.f32 %v2129_v57, %v2118_v44 }
 0x238   : > { %v2133_v61 = vmul.f32 %v2132_v56, %v2130_v58  ;;  %v2134_v62 = vmul.f32 %v2132_v56, %v2131_v59 }
 0x23a   : > { %v2136_v63 = vadd.f32 %v2135_v60, %v2133_v61  ;;  %v2137_v0 = vadd.f32 %v2135_v60, %v2134_v62 }
 0x23c   : > { %v4656_v1 = vpack.c.bf16 %v2137_v0, %v2136_v63 }
 0x289   : > { %v1299_v11 = vpop.f32.mrf.mxu0 }
 0x28a   : > { %v1318_v9 = vpop.f32.mrf.mxu1 }
 0x28b   : > { %v1335_v15 = vrot.slane %v1318_v9, 1 }
 0x28f   : > { %v1280_v10 = vpop.f32.mrf.mxu3 }
 0x290   : > { %v1325_v12 = vrot.slane %v1280_v10, 7 }
 0x291   : > { %v1301_v24 = vpop.f32.mrf.mxu0 }
 0x292   : > { %v1330_v13 = vsel %vm1229_vm6, 0.0, %v1325_v12  ;;  %v1320_v14 = vpop.f32.mrf.mxu1 }
 0x293   : > { %v1331_v16 = vadd.f32 %v1330_v13, %v1299_v11  ;;  %v1336_v17 = vrot.slane %v1320_v14, 1  ;;  %v1403_v11 = vperm.slane %v1367_v3, 1 }
 0x295   : > { %v1337_v19 = vsel %vm1240_vm7, %v1335_v15, %v1336_v17  ;;  %v1340_v28 = vsel %vm1240_vm7, %v1336_v17, 0.0  ;;  %v2872_v15 = vld [vmem:[#allocation21 + $0x10] sm:$0xff]  ;;  %v2870_v17 = vld [vmem:[#allocation21] sm:$0xff] }
 0x296   : > { %v1341_v20 = vadd.f32 %v1337_v19, %v1331_v16  ;;  %1544 = vmatpush.bf16.msra.mxu3 %v2872_v15  ;;  %v2871_v16 = vld [vmem:[#allocation21 + $0x8] sm:$0xff]  ;;  %1500 = vmatpush.bf16.msra.mxu1 %v2870_v17 }
 0x297   : > { %v1282_v21 = vpop.f32.mrf.mxu3  ;;  %1522 = vmatpush.bf16.msra.mxu2 %v2871_v16 }
 0x298   : > { %v1347_v22 = vadd.f32 %v3187_v18, %v1341_v20  ;;  %v1326_v23 = vrot.slane %v1282_v21, 7 }
 0x29a   : > { %vm1349_vm15 = vcmp.gt.f32.partialorder %v1347_v22, 0.0  ;;  %v1351_v25 = vmul.f32 0.2, %v1347_v22  ;;  %v1327_v26 = vsel %vm1229_vm6, %v1325_v12, %v1326_v23 }
 0x29b   : > { %v1332_v27 = vadd.f32 %v1327_v26, %v1301_v24  ;;  %v3188_v26 = vld [vmem:[#allocation19] ss:$0 sm:$0xff] }
 0x29c   : > { %v1353_v29 = vsel %vm1349_vm15, %v1347_v22, %v1351_v25 }
 0x29d   : > { %1357 = vst.msk [vmem:[#allocation2 + $0x1] sm:$0xff] %vm1263_vm8, %v1353_v29  ;;  %v1342_v30 = vadd.f32 %v1340_v28, %v1332_v27 }
 0x29f   : > { %v1348_v31 = vadd.f32 %v3187_v18, %v1342_v30 }
 0x2a1   : > { %vm1350_vm0 = vcmp.gt.f32.partialorder %v1348_v31, 0.0  ;;  %v1352_v32 = vmul.f32 0.2, %v1348_v31 }
 0x2a3   : > { %v1354_v33 = vsel %vm1350_vm0, %v1348_v31, %v1352_v32  ;;  %vm1659_vm0 = vcmask 1042432  }
 0x2a4   : > { %1358 = vst.msk [vmem:[#allocation2 + $0x9] sm:$0xff] %vm1263_vm8, %v1354_v33 }
 0x2ab   : > { %v1359_v34 = vld [vmem:[#allocation2] ss:$2 sm:$0xff]  ;;  %v1361_v35 = vld [vmem:[#allocation2 + $0x1] ss:$2 sm:$0xff] }
 0x2ac   : > { %v1362_v36 = vadd.f32 %v1361_v35, %v1359_v34  ;;  %v1364_v37 = vld [vmem:[#allocation2 + $0x2] ss:$2 sm:$0xff] }
 0x2ae   : > { %v1365_v38 = vadd.f32 %v1364_v37, %v1362_v36 }
 0x2b0   : > { %v1366_v39 = vmul.f32 0.33333334, %v1365_v38 }
 0x2b2   : > { %v1368_v40 = vsel %vm1263_vm8, %v1366_v39, 0.0  ;;  %v1376_v41 = vmul.f32 %v1366_v39, %v1366_v39 }
 0x2b3   : > { %v1369_v42 = vrot.slane %v1368_v40, 4 }
 0x2b4   : > { %v1377_v43 = vsel %vm1263_vm8, %v1376_v41, 0.0 }
 0x2b5   : > { %v1370_v44 = vadd.f32 %v1369_v42, %v1368_v40  ;;  %v1378_v45 = vrot.slane %v1377_v43, 4 }
 0x2b7   : > { %v1371_v46 = vrot.slane %v1370_v44, 2  ;;  %v1379_v47 = vadd.f32 %v1378_v45, %v1377_v43 }
 0x2b9   : > { %v1372_v48 = vadd.f32 %v1371_v46, %v1370_v44  ;;  %v1380_v49 = vrot.slane %v1379_v47, 2 }
 0x2bb   : > { %v1373_v50 = vrot.slane %v1372_v48, 1  ;;  %v1381_v51 = vadd.f32 %v1380_v49, %v1379_v47 }
 0x2bd   : > { %v1374_v52 = vadd.f32 %v1373_v50, %v1372_v48  ;;  %v1382_v53 = vrot.slane %v1381_v51, 1 }
 0x2bf   : > { %v1375_v55 = vmul.f32 0.125, %v1374_v52  ;;  %v1383_v56 = vadd.f32 %v1382_v53, %v1381_v51  ;;  %v2876_v51 = vld [vmem:[#allocation24 + $0x18] sm:$0xff]  ;;  %v2875_v52 = vld [vmem:[#allocation24 + $0x10] sm:$0xff]  ;;  %v2873_v53 = vld [vmem:[#allocation24] sm:$0xff] }
 0x2c0   : > { %1598 = vmatpush.bf16.msrb.mxu0 %v2873_v53  ;;  %v2879_v53 = vld [vmem:[%s5026_s18 + $0x8] sm:$0xff] }
 0x2c1   : > { %v1384_v57 = vmul.f32 0.125, %v1383_v56  ;;  %v1385_v58 = vmul.f32 %v1375_v55, %v1375_v55  ;;  %v1388_v6 = vsub.f32 %v1366_v39, %v1375_v55 }
 0x2c3   : > { %v1386_v59 = vsub.f32 %v1384_v57, %v1385_v58  ;;  %v2874_v57 = vld [vmem:[#allocation24 + $0x8] sm:$0xff] }
 0x2c4   : > { %1620 = vmatpush.bf16.msrb.mxu1 %v2874_v57 }
 0x2c5   : > { %v1387_v60 = vmax.f32 %v1386_v59, 0.0 }
 0x2c7   : > { %v1389_v61 = vadd.f32 1e-05, %v1387_v60 }
 0x2c9   : > { %3199 = vrsqrt.f32 %v1389_v61  ;;  %vm1396_vm3 = vweird.f32 %v1389_v61 }
 0x2cf   : > { %v3200_v62 = vpop.eup %3199 }
 0x2d0   : > { %v1391_v63 = vmul.f32 %v3200_v62, %v1389_v61  ;;  %vm1397_vm2 = vweird.f32 %v3200_v62 }
 0x2d1   : > { %vm1398_vm4 = vmor %vm1396_vm3, %vm1397_vm2 }
 0x2d2   : > { %v1392_v0 = vmul.f32 %v3200_v62, %v1391_v63  ;;  %v2878_v63 = vld [vmem:[%s5026_s18 + $0x18] sm:$0xff] }
 0x2d4   : > { %v1393_v2 = vmul.f32 0.5, %v1392_v0 }
 0x2d6   : > { %v1394_v4 = vsub.f32 1.5, %v1393_v2 }
 0x2d8   : > { %v1395_v5 = vmul.f32 %v3200_v62, %v1394_v4 }
 0x2da   : > { %v1399_v9 = vsel %vm1398_vm4, %v3200_v62, %v1395_v5 }
 0x2db   : > { %v1400_v10 = vmul.f32 %v1399_v9, %v1388_v6  ;;  %v3189_v9 = vld [vmem:[#allocation22] ss:$0 sm:$0xff] }
 0x2dd   : > { %v1402_v12 = vmul.f32 %v1401_v7, %v1400_v10 }
 0x2df   : > { %v1404_v13 = vadd.f32 %v1403_v11, %v1402_v12 }
 0x2e1   : > { %v1405_v14 = vpack.c.bf16 %v1404_v13, %v1404_v13 }
 0x2e3   : > { %2755 = vmatmul.msk.bf16.vlgmr.msrb.gmra.mxu2 %vm1263_vm8, %v1405_v14  ;;  %2756 = vmatmul.msk.bf16.vlgmr.msrb.gmra.mxu3 %vm1263_vm8, %v1405_v14 }
 0x2e4   : > { %2757 = vmatmul.msk.bf16.vlgmr.msra.gmra.mxu0 %vm1263_vm8, %v1405_v14  ;;  %1645 = vmatpush.bf16.msrb.mxu2 %v2876_v51 }
 0x2e5   : > { %1674 = vmatpush.bf16.msrb.mxu3 %v2875_v52  ;;  %1794 = vmatpush.bf16.msra.mxu0 %v2878_v63  ;;  %v2877_v52 = vld [vmem:[%s5026_s18] sm:$0xff] }
 0x361   : > { %v1458_v18 = vpop.f32.mrf.mxu0 }
 0x362   : > { %v1468_v21 = vrot.slane %v1458_v18, 1 }
 0x364   : > { %v1470_v27 = vsel %vm1240_vm7, %v1468_v21, 0.0 }
 0x366   : > { %v1422_v19 = vpop.f32.mrf.mxu2  ;;  %v1440_v20 = vpop.f32.mrf.mxu3 }
 0x367   : > { %v1463_v22 = vrot.slane %v1422_v19, 7 }
 0x369   : > { %v1465_v23 = vsel %vm1229_vm6, 0.0, %v1463_v22  ;;  %v1460_v24 = vpop.f32.mrf.mxu0 }
 0x36a   : > { %v1466_v25 = vadd.f32 %v1465_v23, %v1440_v20 }
 0x36c   : > { %v1471_v28 = vadd.f32 %v1470_v27, %v1466_v25 }
 0x36e   : > { %v1476_v29 = vadd.f32 %v3188_v26, %v1471_v28  ;;  %v1424_v30 = vpop.f32.mrf.mxu2  ;;  %v1442_v31 = vpop.f32.mrf.mxu3 }
 0x36f   : > { %v4708_v31 = vld [vmem:[%s982_s5] sm:$0xf] }
 0x370   : > { %vm1477_vm9 = vcmp.gt.f32.partialorder %v1476_v29, 0.0  ;;  %v1478_v32 = vmul.f32 0.2, %v1476_v29 }
 0x372   : > { %v4677_v33 = vsel %vm1477_vm9, %v1476_v29, %v1478_v32  ;;  %v2882_v29 = vld [vmem:[%s5026_s18 + $0x28] sm:$0xff] }
 0x373   : > { %v1480_v34 = vpack.c.bf16 %v4677_v33, %v4677_v33  ;;  %v1734_v35 = vsel %vm1489_vm10, %v4677_v33, 0.0  ;;  %v1742_v36 = vmul.f32 %v4677_v33, %v4677_v33 }
 0x374   : > { %v1735_v37 = vrot.slane %v1734_v35, 4 }
 0x375   : > { %2762 = vmatmul.msk.bf16.vlgmr.msra.gmra.mxu1 %vm1489_vm10, %v1480_v34  ;;  %2767 = vmatmul.msk.bf16.vlgmr.msra.gmra.mxu2 %vm1489_vm10, %v1480_v34  ;;  %v1743_v38 = vsel %vm1489_vm10, %v1742_v36, 0.0 }
 0x376   : > { %2772 = vmatmul.msk.bf16.vlgmr.msra.gmra.mxu3 %vm1489_vm10, %v1480_v34  ;;  %v1736_v39 = vadd.f32 %v1735_v37, %v1734_v35  ;;  %v1744_v40 = vrot.slane %v1743_v38, 4  ;;  %1841 = vmatpush.bf16.msra.mxu2 %v2880_v8  ;;  %v1767_v35 = vperm.slane %v4708_v31, 2  ;;  %v1769_v37 = vperm.slane %v4708_v31, 3 }
 0x377   : > { %1816 = vmatpush.bf16.msra.mxu1 %v2877_v52  ;;  %1860 = vmatpush.bf16.msra.mxu3 %v2879_v53 }
 0x378   : > { %v1737_v41 = vrot.slane %v1736_v39, 2  ;;  %v1745_v42 = vadd.f32 %v1744_v40, %v1743_v38 }
 0x37a   : > { %v1738_v43 = vadd.f32 %v1737_v41, %v1736_v39  ;;  %v1746_v44 = vrot.slane %v1745_v42, 2 }
 0x37c   : > { %v1739_v45 = vrot.slane %v1738_v43, 1  ;;  %v1747_v46 = vadd.f32 %v1746_v44, %v1745_v42  ;;  %v3190_v42 = vld [vmem:[#allocation25] ss:$0 sm:$0xff] }
 0x37e   : > { %v1740_v47 = vadd.f32 %v1739_v45, %v1738_v43  ;;  %v1748_v48 = vrot.slane %v1747_v46, 1 }
 0x380   : > { %v4689_v49 = vmul.f32 0.125, %v1740_v47  ;;  %v1749_v50 = vadd.f32 %v1748_v48, %v1747_v46 }
 0x382   : > { %v1750_v55 = vmul.f32 0.125, %v1749_v50  ;;  %v1751_v56 = vmul.f32 %v4689_v49, %v4689_v49  ;;  %v1754_v32 = vsub.f32 %v4677_v33, %v4689_v49 }
 0x384   : > { %v1752_v58 = vsub.f32 %v1750_v55, %v1751_v56 }
 0x386   : > { %v1753_v59 = vmax.f32 %v1752_v58, 0.0 }
 0x388   : > { %v1755_v60 = vadd.f32 1e-05, %v1753_v59 }
 0x38a   : > { %3201 = vrsqrt.f32 %v1755_v60  ;;  %vm1762_vm14 = vweird.f32 %v1755_v60 }
 0x390   : > { %v3202_v7 = vpop.eup %3201 }
 0x391   : > { %v1757_v12 = vmul.f32 %v3202_v7, %v1755_v60  ;;  %vm1763_vm13 = vweird.f32 %v3202_v7 }
 0x392   : > { %vm1764_vm15 = vmor %vm1762_vm14, %vm1763_vm13 }
 0x393   : > { %v1758_v17 = vmul.f32 %v3202_v7, %v1757_v12 }
 0x395   : > { %v1759_v19 = vmul.f32 0.5, %v1758_v17 }
 0x397   : > { %v1760_v20 = vsub.f32 1.5, %v1759_v19 }
 0x399   : > { %v1761_v26 = vmul.f32 %v3202_v7, %v1760_v20 }
 0x39b   : > { %v1765_v30 = vsel %vm1764_vm15, %v3202_v7, %v1761_v26  ;;  %v2881_v26 = vld [vmem:[%s5026_s18 + $0x10] sm:$0xff] }
 0x39c   : > { %v1766_v34 = vmul.f32 %v1765_v30, %v1754_v32 }
 0x39e   : > { %v1768_v36 = vmul.f32 %v1767_v35, %v1766_v34 }
 0x3a0   : > { %v1770_v38 = vadd.f32 %v1769_v37, %v1768_v36 }
 0x3a2   : > { %v1772_v39 = vpack.c.bf16 %v1770_v38, %v1770_v38  ;;  %v1730_v38 = vperm.slane %v4708_v31, 0 }
 0x3f2   : > { %v1502_v61 = vpop.f32.mrf.mxu1 }
 0x3f3   : > { %v1551_v62 = vrot.slane %v1502_v61, 7 }
 0x3f5   : > { %v1553_v2 = vsel %vm1229_vm6, 0.0, %v1551_v62 }
 0x3f8   : > { %v1524_v0 = vpop.f32.mrf.mxu2 }
 0x3f9   : > { %v1554_v3 = vadd.f32 %v1553_v2, %v1524_v0  ;;  %v1546_v4 = vpop.f32.mrf.mxu3 }
 0x3fa   : > { %v1556_v5 = vrot.slane %v1546_v4, 1  ;;  %v1504_v6 = vpop.f32.mrf.mxu1 }
 0x3fc   : > { %v1558_v10 = vsel %vm1240_vm7, %v1556_v5, 0.0 }
 0x3fd   : > { %v1559_v11 = vadd.f32 %v1558_v10, %v1554_v3 }
 0x3ff   : > { %v1564_v13 = vadd.f32 %v3189_v9, %v1559_v11 }
 0x400   : > { %v1526_v14 = vpop.f32.mrf.mxu2 }
 0x401   : > { %vm1565_vm12 = vcmp.gt.f32.partialorder %v1564_v13, 0.0  ;;  %v1566_v15 = vmul.f32 0.2, %v1564_v13  ;;  %v1548_v16 = vpop.f32.mrf.mxu3 }
 0x403   : > { %v1567_v18 = vsel %vm1565_vm12, %v1564_v13, %v1566_v15 }
 0x404   : > { %1570 = vst.msk [vmem:[#allocation3 + $0x1] sm:$0xff] %vm1489_vm10, %v1567_v18 }
 0x40b   : > { %v1571_v21 = vld [vmem:[#allocation3] ss:$2 sm:$0xf]  ;;  %v1573_v22 = vld [vmem:[#allocation3 + $0x1] ss:$2 sm:$0xf] }
 0x40c   : > { %v1574_v23 = vadd.f32 %v1573_v22, %v1571_v21  ;;  %v1576_v24 = vld [vmem:[#allocation3 + $0x2] ss:$2 sm:$0xf] }
 0x40e   : > { %v1577_v25 = vadd.f32 %v1576_v24, %v1574_v23 }
 0x410   : > { %v1578_v27 = vmul.f32 0.33333334, %v1577_v25 }
 0x412   : > { %v1579_v28 = vpack.c.bf16 %v1578_v27, %v1578_v27 }
 0x414   : > { %2777 = vmatmul.msk.bf16.vlgmr.msrb.gmra.mxu0 %vm1489_vm10, %v1579_v28  ;;  %2782 = vmatmul.msk.bf16.vlgmr.msrb.gmra.mxu1 %vm1489_vm10, %v1579_v28 }
 0x415   : > { %2787 = vmatmul.msk.bf16.vlgmr.msrb.gmra.mxu2 %vm1489_vm10, %v1579_v28  ;;  %2792 = vmatmul.msk.bf16.vlgmr.msrb.gmra.mxu3 %vm1489_vm10, %v1579_v28 }
 0x416   : > { %1885 = vmatpush.bf16.msrb.mxu0 %v2882_v29  ;;  %1904 = vmatpush.bf16.msrb.mxu1 %v2881_v26 }
 0x424   : > { %2799 = vmatmul.msk.bf16.vlgmr.msra.gmra.mxu0 %vm1489_vm10, %v1772_v39 }
 0x425   : > { %2813 = vmatmul.msk.bf16.vlgmr.msra.gmra.mxu2 %vm1489_vm10, %v1772_v39 }
 0x434   : > { %2827 = vmatmul.msk.bf16.vlgmr.msrb.gmra.mxu0 %vm1489_vm10, %v1772_v39 }
 0x491   : > { %v1600_v33 = vpop.f32.mrf.mxu0  ;;  %v1622_v40 = vpop.f32.mrf.mxu1 }
 0x492   : > { %v1652_v41 = vrot.slane %v1600_v33, 7 }
 0x494   : > { %v1654_v43 = vsel %vm1229_vm6, 0.0, %v1652_v41 }
 0x495   : > { %v1655_v44 = vadd.f32 %v1654_v43, %v1622_v40  ;;  %v1732_v40 = vperm.slane %v4708_v31, 1  ;;  %v2186_v31 = vld [vmem:[#allocation32 + $0x10] sm:$0xf] }
 0x497   : > { %v1684_v45 = vadd.f32 %v3190_v42, %v1655_v44  ;;  %v2883_v44 = vld [vmem:[#allocation29] sm:$0xff] }
 0x498   : > { %v1647_v46 = vpop.f32.mrf.mxu2  ;;  %v1676_v47 = vpop.f32.mrf.mxu3  ;;  %1947 = vmatpush.bf16.msrb.mxu2 %v2883_v44 }
 0x499   : > { %vm1685_vm2 = vcmp.gt.f32.partialorder %v1684_v45, 0.0  ;;  %v1686_v48 = vmul.f32 0.2, %v1684_v45  ;;  %v1657_v49 = vrot.slane %v1647_v46, 1  ;;  %v1602_v50 = vpop.f32.mrf.mxu0  ;;  %v1624_v51 = vpop.f32.mrf.mxu1  ;;  %v2886_v46 = vld [vmem:[#allocation29 + $0x18] sm:$0xff] }
 0x49a   : > { %1994 = vmatpush.bf16.msra.mxu0 %v2886_v46  ;;  %v2188_v51 = vsel %vm1267_vm5, %v2186_v31, 0 }
 0x49b   : > { %v1687_v55 = vsel %vm1685_vm2, %v1684_v45, %v1686_v48  ;;  %v1660_v56 = vsel %vm1659_vm0, %v1657_v49, 0.0  ;;  %v2884_v45 = vld [vmem:[#allocation29 + $0x8] sm:$0xff]  ;;  %v2142_v49 = vld [vmem:[#allocation32 + $0xc] sm:$0xf] }
 0x49c   : > { %1692 = vst [vmem:[#allocation4] ss:$2 sm:$0xf] %v1687_v55  ;;  %v1677_v57 = vadd.f32 %v1676_v47, %v1660_v56  ;;  %v2885_v47 = vld [vmem:[#allocation29 + $0x10] sm:$0xff]  ;;  %1969 = vmatpush.bf16.msrb.mxu3 %v2884_v45  ;;  %v2147_v50 = vsel %vm1267_vm5, %v2142_v49, 0 }
 0x49d   : > { %2156 = vmatpush.bf16.msra.mxu2 %v2147_v50 }
 0x49e   : > { %v1688_v58 = vadd.f32 %v3190_v42, %v1677_v57  ;;  %2197 = vmatpush.bf16.msrb.mxu0 %v2188_v51 }
 0x4a0   : > { %vm1689_vm3 = vcmp.gt.f32.partialorder %v1688_v58, 0.0  ;;  %v1690_v59 = vmul.f32 0.2, %v1688_v58  ;;  %v1649_v60 = vpop.f32.mrf.mxu2  ;;  %v1678_v61 = vpop.f32.mrf.mxu3 }
 0x4a1   : > { %v4728_v62 = vpop.f32.mrf.mxu0 }
 0x4a2   : > { %v1691_v63 = vsel %vm1689_vm3, %v1688_v58, %v1690_v59 }
 0x4a3   : > { %1694 = vst [vmem:[#allocation4 + $0x1] ss:$2 sm:$0xf] %v1691_v63 }
 0x4a8   : > { %v4730_v8 = vpop.f32.mrf.mxu2 }
 0x4a9   : > { %v1798_v0 = vpop.f32.mrf.mxu0 }
 0x4aa   : > { %v1695_v2 = vld [vmem:[#allocation4] sm:$0xff] }
 0x4ab   : > { %v1697_v3 = vsel %vm1489_vm10, %v1695_v2, 0.0  ;;  %v1705_v4 = vmul.f32 %v1695_v2, %v1695_v2 }
 0x4ac   : > { %v1698_v5 = vrot.slane %v1697_v3, 4 }
 0x4ad   : > { %v1706_v6 = vsel %vm1489_vm10, %v1705_v4, 0.0 }
 0x4ae   : > { %v1699_v7 = vadd.f32 %v1698_v5, %v1697_v3  ;;  %v1707_v9 = vrot.slane %v1706_v6, 4 }
 0x4b0   : > { %v1845_v10 = vpop.f32.mrf.mxu2  ;;  %v1700_v11 = vrot.slane %v1699_v7, 2  ;;  %v1708_v12 = vadd.f32 %v1707_v9, %v1706_v6  ;;  %v2224_v9 = vld [vmem:[#allocation32 + $0x14] sm:$0xf] }
 0x4b1   : > { %v1887_v13 = vpop.f32.mrf.mxu0 }
 0x4b2   : > { %v1701_v14 = vadd.f32 %v1700_v11, %v1699_v7  ;;  %v1709_v15 = vrot.slane %v1708_v12, 2  ;;  %v2226_v11 = vsel %vm1267_vm5, %v2224_v9, 0 }
 0x4b4   : > { %v1702_v16 = vrot.slane %v1701_v14, 1  ;;  %v1710_v17 = vadd.f32 %v1709_v15, %v1708_v12 }
 0x4b6   : > { %v1703_v18 = vadd.f32 %v1702_v16, %v1701_v14  ;;  %v1711_v19 = vrot.slane %v1710_v17, 1  ;;  %v3192_v14 = vld [vmem:[#allocation30] ss:$0 sm:$0xff] }
 0x4b8   : > { %v1704_v20 = vmul.f32 0.125, %v1703_v18  ;;  %v1712_v21 = vadd.f32 %v1711_v19, %v1710_v17 }
 0x4b9   : > { %v1889_v22 = vpop.f32.mrf.mxu0 }
 0x4ba   : > { %v1713_v23 = vmul.f32 0.125, %v1712_v21  ;;  %v1714_v24 = vmul.f32 %v1704_v20, %v1704_v20  ;;  %v1717_v37 = vsub.f32 %v1695_v2, %v1704_v20  ;;  %v3191_v2 = vld [vmem:[#allocation28] ss:$0 sm:$0xff] }
 0x4bc   : > { %v1715_v25 = vsub.f32 %v1713_v23, %v1714_v24 }
 0x4be   : > { %v1716_v27 = vmax.f32 %v1715_v25, 0.0 }
 0x4c0   : > { %v1718_v28 = vadd.f32 1e-05, %v1716_v27 }
 0x4c2   : > { %3203 = vrsqrt.f32 %v1718_v28  ;;  %vm1725_vm9 = vweird.f32 %v1718_v28 }
 0x4c8   : > { %v3204_v29 = vpop.eup %3203 }
 0x4c9   : > { %v1720_v30 = vmul.f32 %v3204_v29, %v1718_v28  ;;  %vm1726_vm4 = vweird.f32 %v3204_v29 }
 0x4ca   : > { %vm1727_vm11 = vmor %vm1725_vm9, %vm1726_vm4 }
 0x4cb   : > { %v1721_v32 = vmul.f32 %v3204_v29, %v1720_v30  ;;  %v2140_v30 = vld [vmem:[#allocation32] sm:$0xf] }
 0x4cd   : > { %v1722_v34 = vmul.f32 0.5, %v1721_v32  ;;  %v2167_v32 = vsel %vm1267_vm5, %v2140_v30, 0 }
 0x4cf   : > { %v1723_v35 = vsub.f32 1.5, %v1722_v34  ;;  %v2184_v34 = vld [vmem:[#allocation32 + $0x4] sm:$0xf] }
 0x4d1   : > { %v1724_v36 = vmul.f32 %v3204_v29, %v1723_v35 }
 0x4d3   : > { %v1728_v39 = vsel %vm1727_vm11, %v3204_v29, %v1724_v36  ;;  %v2205_v36 = vsel %vm1267_vm5, %v2184_v34, 0 }
 0x4d4   : > { %v1729_v33 = vmul.f32 %v1728_v39, %v1717_v37 }
 0x4d6   : > { %v1731_v41 = vmul.f32 %v1730_v38, %v1729_v33 }
 0x4d8   : > { %v1733_v42 = vadd.f32 %v1732_v40, %v1731_v41 }
 0x4da   : > { %v1771_v43 = vpack.c.bf16 %v1733_v42, %v1733_v42 }
 0x4dc   : > { %2804 = vmatmul.msk.bf16.vlgmr.msra.gmra.mxu1 %vm1489_vm10, %v1771_v43  ;;  %2818 = vmatmul.msk.bf16.vlgmr.msra.gmra.mxu3 %vm1489_vm10, %v1771_v43 }
 0x4dd   : > { %2022 = vmatpush.bf16.msra.mxu1 %v2885_v47  ;;  %2176 = vmatpush.bf16.msra.mxu3 %v2167_v32 }
 0x4ec   : > { %2832 = vmatmul.msk.bf16.vlgmr.msrb.gmra.mxu1 %vm1489_vm10, %v1771_v43 }
 0x4ed   : > { %2214 = vmatpush.bf16.msrb.mxu1 %v2205_v36 }
 0x559   : > { %v1818_v48 = vpop.f32.mrf.mxu1 }
 0x55a   : > { %v1819_v55 = vadd.f32 %v1818_v48, %v4728_v62 }
 0x55c   : > { %v1911_v57 = vrot.slane %v1819_v55, 7 }
 0x55e   : > { %v1913_v61 = vsel %vm1229_vm6, 0.0, %v1911_v57 }
 0x55f   : > { %v1862_v52 = vpop.f32.mrf.mxu3 }
 0x560   : > { %v1863_v58 = vadd.f32 %v1862_v52, %v4730_v8 }
 0x561   : > { %v1820_v53 = vpop.f32.mrf.mxu1 }
 0x562   : > { %v1914_v0 = vadd.f32 %v1913_v61, %v1863_v58 }
 0x567   : > { %v1864_v56 = vpop.f32.mrf.mxu3 }
 0x569   : > { %v1906_v59 = vpop.f32.mrf.mxu1 }
 0x56a   : > { %v1907_v60 = vadd.f32 %v1906_v59, %v1887_v13 }
 0x56c   : > { %v1916_v63 = vrot.slane %v1907_v60, 1 }
 0x56e   : > { %v1918_v3 = vsel %vm1240_vm7, %v1916_v63, 0.0  ;;  %v2222_v63 = vld [vmem:[#allocation32 + $0x8] sm:$0xf] }
 0x56f   : > { %v1919_v4 = vadd.f32 %v1918_v3, %v1914_v0  ;;  %v2243_v0 = vsel %vm1267_vm5, %v2222_v63, 0 }
 0x571   : > { %v1924_v5 = vadd.f32 %v3191_v2, %v1919_v4  ;;  %v1908_v6 = vpop.f32.mrf.mxu1 }
 0x573   : > { %vm1925_vm12 = vcmp.gt.f32.partialorder %v1924_v5, 0.0  ;;  %v1926_v7 = vmul.f32 0.2, %v1924_v5 }
 0x575   : > { %v1927_v62 = vsel %vm1925_vm12, %v1924_v5, %v1926_v7 }
 0x576   : > { %v1928_v10 = vpack.c.bf16 %v1927_v62, %v1927_v62 }
 0x578   : > { %2837 = vmatmul.msk.bf16.vlgmr.msrb.gmra.mxu2 %vm1489_vm10, %v1928_v10  ;;  %2842 = vmatmul.msk.bf16.vlgmr.msrb.gmra.mxu3 %vm1489_vm10, %v1928_v10 }
 0x579   : > { %2847 = vmatmul.msk.bf16.vlgmr.msra.gmra.mxu0 %vm1489_vm10, %v1928_v10  ;;  %2852 = vmatmul.msk.bf16.vlgmr.msra.gmra.mxu1 %vm1489_vm10, %v1928_v10 }
 0x57a   : > { %2235 = vmatpush.bf16.msrb.mxu2 %v2226_v11  ;;  %2252 = vmatpush.bf16.msrb.mxu3 %v2243_v0 }
 0x588   : > { %2853 = vmatmul.msk.bf16.vlgmr.msra.gmra.mxu2 %vm1263_vm8, %v4656_v1 }
 0x589   : > { %2855 = vmatmul.msk.bf16.vlgmr.msrb.gmra.mxu0 %vm1263_vm8, %v4656_v1 }
 0x598   : > { %2857 = vmatmul.msk.bf16.vlgmr.msrb.gmra.mxu2 %vm1263_vm8, %v4656_v1 }
 0x5f6   : > { %v1996_v8 = vpop.f32.mrf.mxu0  ;;  %v2024_v12 = vpop.f32.mrf.mxu1 }
 0x5f7   : > { %v2006_v13 = vrot.slane %v1996_v8, 1  ;;  %v2086_v8 = vperm.slane %v4652_v54, 0 }
 0x5f9   : > { %v2008_v15 = vsel %vm1240_vm7, %v2006_v13, 0.0 }
 0x5fa   : > { %v2025_v16 = vadd.f32 %v2024_v12, %v2008_v15  ;;  %v2089_v15 = vperm.slane %v4652_v54, 1 }
 0x5fb   : > { %v1949_v17 = vpop.f32.mrf.mxu2  ;;  %v1971_v18 = vpop.f32.mrf.mxu3 }
 0x5fc   : > { %v2036_v19 = vadd.f32 %v3192_v14, %v2025_v16  ;;  %v2001_v20 = vrot.slane %v1949_v17, 7 }
 0x5fe   : > { %vm2037_vm10 = vcmp.gt.f32.partialorder %v2036_v19, 0.0  ;;  %v2038_v21 = vmul.f32 0.2, %v2036_v19  ;;  %v2003_v22 = vsel %vm1229_vm6, 0.0, %v2001_v20  ;;  %v1998_v23 = vpop.f32.mrf.mxu0  ;;  %v2026_v24 = vpop.f32.mrf.mxu1 }
 0x5ff   : > { %v2004_v25 = vadd.f32 %v2003_v22, %v1971_v18  ;;  %v2292_v24 = vld [vmem:[%s5028_s21] sm:$0xf] }
 0x600   : > { %v2039_v26 = vsel %vm2037_vm10, %v2036_v19, %v2038_v21  ;;  %v2862_v21 = vld [vmem:[%s5027_s6 + $0x8] sm:$0xf] }
 0x601   : > { %2042 = vst [vmem:[#allocation5 + $0x1] ss:$2 sm:$0xff] %v2039_v26  ;;  %v2032_v1 = vadd.f32 %v3192_v14, %v2004_v25  ;;  %v2335_v22 = vsel %vm1267_vm5, %v2862_v21, 0  ;;  %v2860_v25 = vld [vmem:[%s5028_s21 + $0x4] sm:$0xf] }
 0x602   : > { %2344 = vmatpush.bf16.msra.mxu2 %v2335_v22 }
 0x603   : > { %vm2033_vm13 = vcmp.gt.f32.partialorder %v2032_v1, 0.0  ;;  %v2034_v27 = vmul.f32 0.2, %v2032_v1  ;;  %v1951_v28 = vpop.f32.mrf.mxu2  ;;  %v1973_v29 = vpop.f32.mrf.mxu3 }
 0x605   : > { %v2035_v35 = vsel %vm2033_vm13, %v2032_v1, %v2034_v27  ;;  %v2297_v1 = vsel %vm1267_vm5, %v2292_v24, 0  ;;  %v2316_v27 = vsel %vm1267_vm5, %v2860_v25, 0 }
 0x606   : > { %2040 = vst [vmem:[#allocation5] ss:$2 sm:$0xff] %v2035_v35  ;;  %2306 = vmatpush.bf16.msra.mxu0 %v2297_v1  ;;  %2325 = vmatpush.bf16.msra.mxu1 %v2316_v27  ;;  %v2199_v32 = vpop.f32.mrf.mxu0 }
 0x60b   : > { %v2158_v23 = vpop.f32.mrf.mxu2 }
 0x60d   : > { %v2043_v37 = vld [vmem:[#allocation5] sm:$0xff]  ;;  %v2044_v38 = vld [vmem:[#allocation5 + $0x8] sm:$0xff] }
 0x60e   : > { %v2046_v39 = vsel %vm1263_vm8, %v2043_v37, 0.0  ;;  %v2047_v33 = vsel %vm1263_vm8, %v2044_v38, 0.0  ;;  %v2056_v40 = vmul.f32 %v2043_v37, %v2043_v37  ;;  %v2057_v41 = vmul.f32 %v2044_v38, %v2044_v38 }
 0x60f   : > { %v2048_v42 = vadd.f32 %v2047_v33, %v2046_v39 }
 0x610   : > { %v2058_v43 = vsel %vm1263_vm8, %v2056_v40, 0.0  ;;  %v2059_v44 = vsel %vm1263_vm8, %v2057_v41, 0.0 }
 0x611   : > { %v2049_v45 = vrot.slane %v2048_v42, 4  ;;  %v2060_v46 = vadd.f32 %v2059_v44, %v2058_v43 }
 0x613   : > { %v2050_v47 = vadd.f32 %v2049_v45, %v2048_v42  ;;  %v2061_v48 = vrot.slane %v2060_v46, 4  ;;  %v2160_v26 = vpop.f32.mrf.mxu2  ;;  %v2201_v42 = vpop.f32.mrf.mxu0 }
 0x615   : > { %v2051_v49 = vrot.slane %v2050_v47, 2  ;;  %v2062_v31 = vadd.f32 %v2061_v48, %v2060_v46 }
 0x617   : > { %v2052_v50 = vadd.f32 %v2051_v49, %v2050_v47  ;;  %v2063_v51 = vrot.slane %v2062_v31, 2 }
 0x619   : > { %v2053_v52 = vrot.slane %v2052_v50, 1  ;;  %v2064_v53 = vadd.f32 %v2063_v51, %v2062_v31  ;;  %v3193_v51 = vld [vmem:[#allocation33] ss:$0 sm:$0xff] }
 0x61b   : > { %v2054_v55 = vadd.f32 %v2053_v52, %v2052_v50  ;;  %v2065_v56 = vrot.slane %v2064_v53, 1  ;;  %v2237_v30 = vpop.f32.mrf.mxu2 }
 0x61d   : > { %v2055_v57 = vmul.f32 0.0625, %v2054_v55  ;;  %v2066_v58 = vadd.f32 %v2065_v56, %v2064_v53 }
 0x61f   : > { %v2067_v59 = vmul.f32 0.0625, %v2066_v58  ;;  %v2068_v60 = vmul.f32 %v2055_v57, %v2055_v57  ;;  %v2071_v10 = vsub.f32 %v2043_v37, %v2055_v57  ;;  %v2072_v11 = vsub.f32 %v2044_v38, %v2055_v57 }
 0x621   : > { %v2069_v61 = vsub.f32 %v2067_v59, %v2068_v60 }
 0x623   : > { %v2070_v2 = vmax.f32 %v2069_v61, 0.0  ;;  %v2239_v40 = vpop.f32.mrf.mxu2 }
 0x625   : > { %v2073_v3 = vadd.f32 1e-05, %v2070_v2 }
 0x627   : > { %3205 = vrsqrt.f32 %v2073_v3  ;;  %vm2080_vm15 = vweird.f32 %v2073_v3 }
 0x62d   : > { %v3206_v4 = vpop.eup %3205 }
 0x62e   : > { %v2075_v5 = vmul.f32 %v3206_v4, %v2073_v3  ;;  %vm2081_vm14 = vweird.f32 %v3206_v4 }
 0x62f   : > { %vm2082_vm0 = vmor %vm2080_vm15, %vm2081_vm14 }
 0x630   : > { %v2076_v6 = vmul.f32 %v3206_v4, %v2075_v5 }
 0x632   : > { %v2077_v7 = vmul.f32 0.5, %v2076_v6 }
 0x634   : > { %v2078_v9 = vsub.f32 1.5, %v2077_v7 }
 0x636   : > { %v2079_v62 = vmul.f32 %v3206_v4, %v2078_v9 }
 0x638   : > { %v2083_v12 = vsel %vm2082_vm0, %v3206_v4, %v2079_v62 }
 0x639   : > { %v2084_v13 = vmul.f32 %v2083_v12, %v2071_v10  ;;  %v2085_v14 = vmul.f32 %v2083_v12, %v2072_v11 }
 0x63b   : > { %v2087_v16 = vmul.f32 %v2086_v8, %v2084_v13  ;;  %v2088_v17 = vmul.f32 %v2086_v8, %v2085_v14 }
 0x63d   : > { %v2090_v18 = vadd.f32 %v2089_v15, %v2087_v16  ;;  %v2091_v19 = vadd.f32 %v2089_v15, %v2088_v17  ;;  %v3194_v15 = vld [vmem:[%s5029_s14] ss:$0 sm:$0xff] }
 0x63f   : > { %v2138_v20 = vpack.c.bf16 %v2091_v19, %v2090_v18 }
 0x641   : > { %2854 = vmatmul.msk.bf16.vlgmr.msra.gmra.mxu3 %vm1263_vm8, %v2138_v20  ;;  %2856 = vmatmul.msk.bf16.vlgmr.msrb.gmra.mxu1 %vm1263_vm8, %v2138_v20 }
 0x651   : > { %2858 = vmatmul.msk.bf16.vlgmr.msrb.gmra.mxu3 %vm1263_vm8, %v2138_v20 }
 0x6be   : > { %v2216_v29 = vpop.f32.mrf.mxu1 }
 0x6bf   : > { %v2217_v46 = vadd.f32 %v2216_v29, %v2199_v32 }
 0x6c4   : > { %v2178_v54 = vpop.f32.mrf.mxu3 }
 0x6c5   : > { %v2179_v35 = vadd.f32 %v2178_v54, %v2158_v23 }
 0x6c6   : > { %v2218_v39 = vpop.f32.mrf.mxu1 }
 0x6c7   : > { %v2261_v37 = vrot.slane %v2179_v35, 7  ;;  %v2219_v47 = vadd.f32 %v2218_v39, %v2201_v42 }
 0x6c9   : > { %v2266_v43 = vsel %vm1229_vm6, 0.0, %v2261_v37 }
 0x6ca   : > { %v2267_v31 = vadd.f32 %v2266_v43, %v2217_v46 }
 0x6cc   : > { %v2180_v28 = vpop.f32.mrf.mxu3 }
 0x6cd   : > { %v2181_v36 = vadd.f32 %v2180_v28, %v2160_v26 }
 0x6cf   : > { %v2262_v38 = vrot.slane %v2181_v36, 7 }
 0x6d1   : > { %v2263_v44 = vsel %vm1229_vm6, %v2261_v37, %v2262_v38 }
 0x6d2   : > { %v2268_v50 = vadd.f32 %v2263_v44, %v2219_v47 }
 0x6d4   : > { %v2254_v34 = vpop.f32.mrf.mxu3 }
 0x6d5   : > { %v2255_v33 = vadd.f32 %v2254_v34, %v2237_v30 }
 0x6d7   : > { %v2271_v48 = vrot.slane %v2255_v33, 1 }
 0x6dc   : > { %v2256_v41 = vpop.f32.mrf.mxu3 }
 0x6dd   : > { %v2257_v45 = vadd.f32 %v2256_v41, %v2239_v40 }
 0x6df   : > { %v2272_v49 = vrot.slane %v2257_v45, 1 }
 0x6e1   : > { %v2273_v52 = vsel %vm1240_vm7, %v2271_v48, %v2272_v49  ;;  %v2276_v53 = vsel %vm1240_vm7, %v2272_v49, 0.0 }
 0x6e2   : > { %v2277_v55 = vadd.f32 %v2273_v52, %v2267_v31  ;;  %v2278_v56 = vadd.f32 %v2276_v53, %v2268_v50 }
 0x6e4   : > { %v2283_v57 = vadd.f32 %v3193_v51, %v2277_v55  ;;  %v2284_v58 = vadd.f32 %v3193_v51, %v2278_v56 }
 0x6e6   : > { %vm2285_vm5 = vcmp.gt.f32.partialorder %v2283_v57, 0.0  ;;  %vm2286_vm2 = vcmp.gt.f32.partialorder %v2284_v58, 0.0  ;;  %v2287_v59 = vmul.f32 0.2, %v2283_v57  ;;  %v2288_v60 = vmul.f32 0.2, %v2284_v58 }
 0x6e8   : > { %v2289_v61 = vsel %vm2285_vm5, %v2283_v57, %v2287_v59  ;;  %v2290_v63 = vsel %vm2286_vm2, %v2284_v58, %v2288_v60 }
 0x6e9   : > { %v2291_v0 = vpack.c.bf16 %v2290_v63, %v2289_v61 }
 0x6eb   : > { %2859 = vmatmul.msk.bf16.vlgmr.msra.gmra.mxu0 %vm1263_vm8, %v2291_v0  ;;  %2861 = vmatmul.msk.bf16.vlgmr.msra.gmra.mxu1 %vm1263_vm8, %v2291_v0 }
 0x6ec   : > { %2863 = vmatmul.msk.bf16.vlgmr.msra.gmra.mxu2 %vm1263_vm8, %v2291_v0 }
 0x768   : > { %v2308_v2 = vpop.f32.mrf.mxu0  ;;  %v2327_v3 = vpop.f32.mrf.mxu1 }
 0x769   : > { %v2353_v6 = vrot.slane %v2308_v2, 7 }
 0x76b   : > { %v2358_v9 = vsel %vm1229_vm6, 0.0, %v2353_v6 }
 0x76c   : > { %v2359_v13 = vadd.f32 %v2358_v9, %v2327_v3 }
 0x76f   : > { %v2346_v4 = vpop.f32.mrf.mxu2 }
 0x770   : > { %v2310_v5 = vpop.f32.mrf.mxu0  ;;  %v2363_v11 = vrot.slane %v2346_v4, 1  ;;  %v2329_v8 = vpop.f32.mrf.mxu1 }
 0x771   : > { %v2354_v7 = vrot.slane %v2310_v5, 7 }
 0x773   : > { %v2355_v62 = vsel %vm1229_vm6, %v2353_v6, %v2354_v7 }
 0x774   : > { %v2360_v14 = vadd.f32 %v2355_v62, %v2329_v8 }
 0x777   : > { %v2348_v10 = vpop.f32.mrf.mxu2 }
 0x778   : > { %v2364_v12 = vrot.slane %v2348_v10, 1 }
 0x77a   : > { %v2365_v16 = vsel %vm1240_vm7, %v2363_v11, %v2364_v12  ;;  %v2368_v17 = vsel %vm1240_vm7, %v2364_v12, 0.0 }
 0x77b   : > { %v2369_v18 = vadd.f32 %v2365_v16, %v2359_v13  ;;  %v2370_v19 = vadd.f32 %v2368_v17, %v2360_v14 }
 0x77d   : > { %v2375_v20 = vadd.f32 %v3194_v15, %v2369_v18  ;;  %v2376_v21 = vadd.f32 %v3194_v15, %v2370_v19 }
 0x77f   : > { %v2864_v22 = vmul.f32 -1.442695, %v2375_v20  ;;  %v2865_v23 = vmul.f32 -1.442695, %v2376_v21 }
 0x781   : > { %3207 = vpow2.f32 %v2864_v22 }
 0x782   : > { %3209 = vpow2.f32 %v2865_v23 }
 0x787   : > { %v3208_v54 = vpop.eup %3207 }
 0x788   : > { %v3210_v24 = vpop.eup %3209  ;;  %v2383_v25 = vadd.f32 1.0, %v3208_v54 }
 0x789   : > { %v2384_v26 = vadd.f32 1.0, %v3210_v24 }
 0x78a   : > { %3211 = vrcp.f32 %v2383_v25  ;;  %v2396_v32 = vand.u32 2147483648, %v2383_v25  ;;  %v2394_v36 = vand.u32 2147483647, %v2383_v25  ;;  %vm2390_vm8 = vweird.f32 %v2383_v25 }
 0x78b   : > { %3213 = vrcp.f32 %v2384_v26  ;;  %v2411_v37 = vand.u32 2147483648, %v2384_v26  ;;  %v2409_v39 = vand.u32 2147483647, %v2384_v26  ;;  %vm2405_vm4 = vweird.f32 %v2384_v26 }
 0x78c   : > { %v2397_v40 = vor.u32 1.1754944e-38, %v2396_v32  ;;  %vm2395_vm9 = vcmp.eq.f32.partialorder %v2394_v36, 8.507059e+37 }
 0x78d   : > { %v2412_v43 = vor.u32 1.1754944e-38, %v2411_v37  ;;  %vm2410_vm12 = vcmp.eq.f32.partialorder %v2409_v39, 8.507059e+37 }
 0x790   : > { %v3212_v1 = vpop.eup %3211 }
 0x791   : > { %v3214_v27 = vpop.eup %3213  ;;  %v2386_v28 = vmul.f32 %v3212_v1, %v2383_v25  ;;  %vm2391_vm6 = vweird.f32 %v3212_v1 }
 0x792   : > { %v2401_v29 = vmul.f32 %v3214_v27, %v2384_v26  ;;  %vm2406_vm7 = vweird.f32 %v3214_v27  ;;  %vm2392_vm3 = vmor %vm2390_vm8, %vm2391_vm6 }
 0x793   : > { %v2387_v30 = vsub.f32 1.0, %v2386_v28  ;;  %vm2407_vm11 = vmor %vm2405_vm4, %vm2406_vm7 }
 0x794   : > { %v2402_v34 = vsub.f32 1.0, %v2401_v29 }
 0x795   : > { %v2388_v35 = vmul.f32 %v3212_v1, %v2387_v30 }
 0x796   : > { %v2403_v38 = vmul.f32 %v3214_v27, %v2402_v34 }
 0x797   : > { %v2389_v33 = vadd.f32 %v3212_v1, %v2388_v35 }
 0x798   : > { %v2404_v41 = vadd.f32 %v3214_v27, %v2403_v38 }
 0x799   : > { %v2393_v42 = vsel %vm2392_vm3, %v3212_v1, %v2389_v33 }
 0x79a   : > { %v2398_v44 = vsel %vm2395_vm9, %v2397_v40, %v2393_v42  ;;  %v2408_v45 = vsel %vm2407_vm11, %v3214_v27, %v2404_v41 }
 0x79b   : > { %v2413_v46 = vsel %vm2410_vm12, %v2412_v43, %v2408_v45  ;;  %2415 = vst.msk [vmem:[%s1114_s25] sm:$0xff] %vm1119_vm1, %v2398_v44 }
 0x79c   : > { %2416 = vst.msk [vmem:[%s1114_s25 + $0x8] sm:$0xff] %vm1119_vm1, %v2413_v46 }
 0x79d PF: > { %s5031_s6 = sld [smem:[#allocation59_spill]]  ;;  %s5033_s3 = smov %s5064_s2 }
 0x79e   : > { %s5032_s23 = sld [smem:[#allocation60_spill]]  ;;  %p50_p9 = scmp.ge.s32.totalorder %s4227_s24, 4  }
 0x79f   : > { %s5034_s8 = sld [smem:[#allocation70_spill]]  ;;  %s5041_s29 = smov %s5033_s3 }
 0x7a0   : > { %s5035_s30 = sld [smem:[#allocation62_spill]]  ;;  %s5042_s0 = smov %s3929_s15 }
 0x7a1   : > { %s5036_s26 = sld [smem:[#allocation63_spill]]  ;;  %s5043_s15 = smov %s3933_s7 }
 0x7a2   : > { %s5037_s13 = sld [smem:[#allocation64_spill]]  ;;  %s5046_s25 = smov %s5058_s22 }
 0x7a3   : > { %s5038_s4 = sld [smem:[#allocation65_spill]]  ;;  %s5048_s5 = smov %s4227_s24 }
 0x7a4   : > { %s5039_s1 = sld [smem:[#allocation69_spill]]  ;;  %s5040_s2 = smov %s5032_s23 }
 0x7a5   : > { %s5044_s7 = smov %s5034_s8  ;;  %52 = sbr.rel (!%p50_p9) target bundleno = 52 (0x34), region = 282 }
 0x7a7   : > { %s5045_s3 = smov %s5036_s26 }
 0x7a8   : > { %s5047_s8 = smov %s5037_s13 }
 0x7aa   :  { %2438 = vsyncpa [#allocation9], 1 }
 0x7ab   :  { %2440 = vsyncpa [#allocation9 + $0x1], 1 }
 0x7ac   :  { %2441 = vsyncpa [#allocation11], 1 }
 0x7ad   :  { %2442 = vsyncpa [#allocation14], 1 }
 0x7ae   :  { %2443 = vsyncpa [#allocation17], 1 }
 0x7af   :  { %2445 = vsyncpa [#allocation17 + $0x1], 1 }
 0x7b0   :  { %2446 = vsyncpa [#allocation20], 1 }
 0x7b1   :  { %2447 = vsyncpa [#allocation23], 1 }
 0x7b2   :  { %2448 = vsyncpa [#allocation26], 1 }

</bundles_post_ra>
